<compile_context>
chip_gen: v7x
topology: tpu7x:2x2x1
jax: 0.10.0
libtpu: 0.0.40
codegen_flags: <defaults>
</compile_context>

<pallas_src>
import jax
import jax.numpy as jnp
from jax.experimental import pallas as pl
from jax.experimental.pallas import tpu as pltpu


def decoder_kernel(enc_ref, yg_ref, wide_ref, istack_ref, gates_ref, tcol_ref,
                   out_ref):
    Bb, TE = enc_ref.shape                    # TE = T * E (flat lane domain)
    T = out_ref.shape[1]
    E = istack_ref.shape[1]
    G4 = gates_ref.shape[1]                   # 4 * D
    D = G4 // 4

    # static row offsets into the packed weight blocks (all multiples of 8)
    w1h_o = TE                                # wide: [0:TE]=kron(I,w1enc)
    w1c_o = TE + D                            #       [TE:TE+D]=w1h tiled
    bc_o = TE + 2 * D                         #       [TE+D:TE+2D]=w1c tiled
    b1_o = bc_o + T                           #       [bc_o:bc_o+T]=bcast, [b1_o]=b1

    # loop-invariant encoder half of the attention MLP's first layer, computed
    # in the flat lane domain with a block-diagonal weight (no relayout).
    enc_proj = (jnp.dot(enc_ref[...], wide_ref[:TE, :],
                        preferred_element_type=jnp.float32)
                + wide_ref[b1_o:b1_o + 1, :])                     # (Bb, T*E)

    def step(t, carry):
        h, c, _ = carry                       # (Bb, D), (Bb, D), (Bb, E)
        enc = enc_ref[...]                    # cheap VMEM re-read each step

        # ---- attention over the T encoder positions (lane-dense) ----
        hc_proj = (jnp.dot(h, wide_ref[w1h_o:w1c_o, :],
                           preferred_element_type=jnp.float32)
                   + jnp.dot(c, wide_ref[w1c_o:bc_o, :],
                             preferred_element_type=jnp.float32))  # (Bb, T*E)
        z = jnp.tanh(enc_proj + hc_proj)                           # (Bb, T*E)
        # E->1 score projection via a block-diagonal matmul on the idle MXU.
        # (b2 dropped: softmax is invariant to a constant shift.)
        scores = jnp.dot(z, tcol_ref[:TE, :],
                         preferred_element_type=jnp.float32)       # (Bb, T)
        scores = scores - jnp.max(scores, axis=1, keepdims=True)
        p = jnp.exp(scores)
        inv_den = pl.reciprocal(jnp.sum(p, axis=1, keepdims=True), approx=True)
        attn = p * inv_den                                         # (Bb, T)
        # broadcast attn over each E-block and reduce to the context, both on
        # the MXU (kron(I,ones) bcast matrix + stacked-identity projector).
        attn_x = jnp.dot(attn, wide_ref[bc_o:b1_o, :],
                         preferred_element_type=jnp.float32)       # (Bb, T*E)
        context = jnp.dot(attn_x * enc, istack_ref[...],
                          preferred_element_type=jnp.float32)      # (Bb, E)

        # ---- LSTM cell step with the fc layer folded into the gates ----
        gates = (jnp.dot(h, gates_ref[:D, :],
                         preferred_element_type=jnp.float32)
                 + jnp.dot(context, gates_ref[D:D + E, :],
                           preferred_element_type=jnp.float32)
                 + yg_ref[t]
                 + gates_ref[D + E:D + E + 1, :])                  # (Bb, 4D) i,f,g,o
        i_g = jax.nn.sigmoid(gates[:, :D])
        f_g = jax.nn.sigmoid(gates[:, D:2 * D])
        g_g = jnp.tanh(gates[:, 2 * D:3 * D])
        o_g = jax.nn.sigmoid(gates[:, 3 * D:])
        c_new = f_g * c + i_g * g_g
        h_new = o_g * jnp.tanh(c_new)
        return (h_new, c_new, context)

    h0 = jnp.zeros((Bb, D), jnp.float32)
    c0 = jnp.zeros((Bb, D), jnp.float32)
    ctx0 = jnp.zeros((Bb, E), jnp.float32)
    h, c, context = jax.lax.fori_loop(0, T, step, (h0, c0, ctx0), unroll=True)

    # ---- final head: fc_final([hidden, context]) -> (Bb, T) ----
    out_ref[...] = (jnp.dot(h, tcol_ref[TE:TE + D, :],
                            preferred_element_type=jnp.float32)
                    + jnp.dot(context, tcol_ref[TE + D:TE + D + E, :],
                              preferred_element_type=jnp.float32)
                    + tcol_ref[TE + D + E:TE + D + E + 1, :])


def decoder_forward(params, input_encoded, y_history, D):
    B, T, E = input_encoded.shape
    TE = T * E
    f32 = jnp.float32

    # ---- weight preparation (static-shape XLA glue, done once) ----
    w1t = params['attn_w1'].T                                    # (2D+E, E)
    w1h_tiled = jnp.tile(w1t[:D], (1, T))                        # (D, T*E)
    w1c_tiled = jnp.tile(w1t[D:2 * D], (1, T))                   # (D, T*E)
    w1enc_bd = jnp.kron(jnp.eye(T, dtype=f32), w1t[2 * D:])      # (T*E, T*E)
    b1_tiled = jnp.tile(params['attn_b1'].reshape(1, E), (1, T)) # (1, T*E)
    bcast = jnp.kron(jnp.eye(T, dtype=f32), jnp.ones((1, E), f32))        # (T, T*E)
    w2bd = jnp.kron(jnp.eye(T, dtype=f32), params['attn_w2'].T)           # (T*E, T)
    istack = jnp.kron(jnp.ones((T, 1), f32), jnp.eye(E, dtype=f32))       # (T*E, E)

    wfc_t = params['fc_w'].T                                     # (E+1, 1)
    wfc_ctx = wfc_t[:E]                                          # (E, 1)
    wfc_y = wfc_t[E, 0]                                          # scalar
    bfc = params['fc_b'][0]                                      # scalar
    wih_row = params['w_ih'][:, 0].reshape(1, 4 * D)             # (1, 4D)
    whh = params['w_hh'].T                                       # (D, 4D)
    wctx_gates = wfc_ctx @ wih_row                               # (E, 4D) fc folded in
    blstm = ((params['b_ih'] + params['b_hh']).reshape(1, 4 * D)
             + bfc * wih_row)                                    # (1, 4D)
    # per-step y contribution to the gates, precomputed outside the kernel
    y_gates = (y_history.T * wfc_y)[:, :, None] * wih_row[0][None, None, :]  # (T, B, 4D)

    wf_t = params['fcf_w'].T                                     # (D+E, T)
    bf = params['fcf_b'].reshape(1, T)

    enc_flat = input_encoded.reshape(B, TE)
    # packed inputs (segment starts are all multiples of 8 sublanes)
    wide_pack = jnp.concatenate(
        [w1enc_bd, w1h_tiled, w1c_tiled, bcast, b1_tiled], axis=0)        # (TE+2D+T+1, TE)
    gates_pack = jnp.concatenate([whh, wctx_gates, blstm], axis=0)        # (D+E+1, 4D)
    tcol_pack = jnp.concatenate([w2bd, wf_t[:D], wf_t[D:], bf], axis=0)   # (TE+D+E+1, T)

    def run(bb, semantics):
        grid = (B // bb,)
        in_specs = [
            pl.BlockSpec((bb, TE), lambda i: (i, 0)),            # enc_flat
            pl.BlockSpec((T, bb, 4 * D), lambda i: (0, i, 0)),   # y_gates
            pl.BlockSpec(wide_pack.shape, lambda i: (0, 0)),     # packed attn weights
            pl.BlockSpec(istack.shape, lambda i: (0, 0)),        # stacked identity
            pl.BlockSpec(gates_pack.shape, lambda i: (0, 0)),    # packed gate weights
            pl.BlockSpec(tcol_pack.shape, lambda i: (0, 0)),     # packed T-column weights
        ]
        out_spec = pl.BlockSpec((bb, T), lambda i: (i, 0))
        return pl.pallas_call(
            decoder_kernel,
            out_shape=jax.ShapeDtypeStruct((B, T), jnp.float32),
            grid=grid,
            in_specs=in_specs,
            out_specs=out_spec,
            compiler_params=pltpu.CompilerParams(dimension_semantics=semantics),
        )(enc_flat, y_gates, wide_pack, istack, gates_pack, tcol_pack)

    # Single program on 1-TensorCore chips (v5e/v6e) -- a batch split there is
    # pure serial overhead.  On v7x (2 TensorCores) split the batch across the
    # cores with CORE_PARALLEL semantics; fall back safely if unsupported.
    kind = ""
    try:
        kind = jax.devices()[0].device_kind.lower()
    except Exception:
        pass
    if "v7" in kind and B % 2 == 0 and (B // 2) % 8 == 0:
        try:
            return run(B // 2, (pltpu.CORE_PARALLEL,))
        except Exception:
            pass
    return run(B, ("arbitrary",))


def decoder_ref(params, input_encoded, y_history, D):
    """Pure-JAX reference mirroring the PyTorch forward."""
    B, T, E = input_encoded.shape
    h = jnp.zeros((B, D), jnp.float32)
    c = jnp.zeros((B, D), jnp.float32)
    context = jnp.zeros((B, E), jnp.float32)
    for t in range(T):
        x = jnp.concatenate([
            jnp.broadcast_to(h[:, None, :], (B, T, D)),
            jnp.broadcast_to(c[:, None, :], (B, T, D)),
            input_encoded], axis=2).reshape(B * T, 2 * D + E)
        z = jnp.tanh(x @ params['attn_w1'].T + params['attn_b1'])
        scores = (z @ params['attn_w2'].T + params['attn_b2']).reshape(B, T)
        attn = jax.nn.softmax(scores, axis=-1)
        context = jnp.einsum('bt,bte->be', attn, input_encoded)
        fc_in = jnp.concatenate([context, y_history[:, t:t + 1]], axis=1)
        y_tilde = fc_in @ params['fc_w'].T + params['fc_b']
        gates = (y_tilde @ params['w_ih'].T + h @ params['w_hh'].T
                 + params['b_ih'] + params['b_hh'])
        i = jax.nn.sigmoid(gates[:, :D])
        f = jax.nn.sigmoid(gates[:, D:2 * D])
        g = jnp.tanh(gates[:, 2 * D:3 * D])
        o = jax.nn.sigmoid(gates[:, 3 * D:])
        c = f * c + i * g
        h = o * jnp.tanh(c)
    return jnp.concatenate([h, context], axis=1) @ params['fcf_w'].T + params['fcf_b']


def init_params(key, E, D, T):
    ks = jax.random.split(key, 12)
    s = 0.1
    return {
        'attn_w1': jax.random.normal(ks[0], (E, 2 * D + E), jnp.float32) * s,
        'attn_b1': jax.random.normal(ks[1], (E,), jnp.float32) * s,
        'attn_w2': jax.random.normal(ks[2], (1, E), jnp.float32) * s,
        'attn_b2': jax.random.normal(ks[3], (1,), jnp.float32) * s,
        'w_ih':    jax.random.normal(ks[4], (4 * D, 1), jnp.float32) * s,
        'w_hh':    jax.random.normal(ks[5], (4 * D, D), jnp.float32) * s,
        'b_ih':    jax.random.normal(ks[6], (4 * D,), jnp.float32) * s,
        'b_hh':    jax.random.normal(ks[7], (4 * D,), jnp.float32) * s,
        'fc_w':    jax.random.normal(ks[8], (1, E + 1), jnp.float32),  # .normal_() in torch
        'fc_b':    jax.random.normal(ks[9], (1,), jnp.float32) * s,
        'fcf_w':   jax.random.normal(ks[10], (T, D + E), jnp.float32) * s,
        'fcf_b':   jax.random.normal(ks[11], (T,), jnp.float32) * s,
    }


if __name__ == "__main__":
    B, T, E, D = 16, 8, 32, 32   # batch, time window, encoder hidden, decoder hidden
    key = jax.random.PRNGKey(0)
    kp, k1, k2 = jax.random.split(key, 3)
    params = init_params(kp, E, D, T)
    input_encoded = jax.random.normal(k1, (B, T, E), jnp.float32)
    y_history = jax.random.normal(k2, (B, T), jnp.float32)

    out = decoder_forward(params, input_encoded, y_history, D)
    out = jax.block_until_ready(out)

    ref = decoder_ref(params, input_encoded, y_history, D)
    assert out.shape == (B, T)
    assert jnp.allclose(out, ref, atol=2e-3, rtol=2e-3), (out, ref)
    print("KERNEL_OK")
</pallas_src>

<mosaic_0001>
module attributes {stable_mosaic.version = 11 : i64} {
  func.func @decoder_kernel(%arg0: i32, %arg1: memref<16x256xf32, #tpu.memory_space<vmem>>, %arg2: memref<8x16x128xf32, #tpu.memory_space<vmem>>, %arg3: memref<329x256xf32, #tpu.memory_space<vmem>>, %arg4: memref<256x32xf32, #tpu.memory_space<vmem>>, %arg5: memref<65x128xf32, #tpu.memory_space<vmem>>, %arg6: memref<321x8xf32, #tpu.memory_space<vmem>>, %arg7: memref<16x8xf32, #tpu.memory_space<vmem>>) attributes {dimension_semantics = [#tpu.dimension_semantics<arbitrary>], iteration_bounds = array<i64: 1>, scalar_prefetch = 0 : i64, scratch_operands = 0 : i64, tpu.core_type = #tpu.core_type<tc>, window_params = [{transform_indices = @transform_0, window_bounds = array<i64: 16, 256>}, {transform_indices = @transform_1, window_bounds = array<i64: 8, 16, 128>}, {pipeline_mode = #tpu.pipeline_mode<synchronous>, transform_indices = @transform_2, window_bounds = array<i64: 329, 256>}, {pipeline_mode = #tpu.pipeline_mode<synchronous>, transform_indices = @transform_3, window_bounds = array<i64: 256, 32>}, {pipeline_mode = #tpu.pipeline_mode<synchronous>, transform_indices = @transform_4, window_bounds = array<i64: 65, 128>}, {pipeline_mode = #tpu.pipeline_mode<synchronous>, transform_indices = @transform_5, window_bounds = array<i64: 321, 8>}, {transform_indices = @transform_6, window_bounds = array<i64: 16, 8>}]} {
    %c0 = arith.constant 0 : index
    %c0_0 = arith.constant 0 : index
    %0 = vector.load %arg1[%c0, %c0_0] : memref<16x256xf32, #tpu.memory_space<vmem>>, vector<16x256xf32>
    %c0_1 = arith.constant 0 : index
    %c0_2 = arith.constant 0 : index
    %1 = vector.load %arg3[%c0_1, %c0_2] : memref<329x256xf32, #tpu.memory_space<vmem>>, vector<256x256xf32>
    %cst = arith.constant dense<0.000000e+00> : vector<16x256xf32>
    %2 = tpu.matmul %0, %1, %cst {dimension_numbers = #tpu.dot_dimension_numbers<[1], [0], [0], [1], [0, 0, 1, 1], [], []>} : vector<16x256xf32>, vector<256x256xf32>, vector<16x256xf32> -> vector<16x256xf32>
    %c328 = arith.constant 328 : index
    %c0_3 = arith.constant 0 : index
    %3 = vector.load %arg3[%c328, %c0_3] : memref<329x256xf32, #tpu.memory_space<vmem>>, vector<1x256xf32>
    %4 = vector.broadcast %3 : vector<1x256xf32> to vector<16x256xf32>
    %5 = arith.addf %2, %4 : vector<16x256xf32>
    %cst_4 = arith.constant 0.000000e+00 : f32
    %6 = vector.broadcast %cst_4 : f32 to vector<16x32xf32>
    %cst_5 = arith.constant 0.000000e+00 : f32
    %7 = vector.broadcast %cst_5 : f32 to vector<16x32xf32>
    %cst_6 = arith.constant 0.000000e+00 : f32
    %8 = vector.broadcast %cst_6 : f32 to vector<16x32xf32>
    %c0_i32 = arith.constant 0 : i32
    %c0_7 = arith.constant 0 : index
    %c0_8 = arith.constant 0 : index
    %9 = vector.load %arg1[%c0_7, %c0_8] : memref<16x256xf32, #tpu.memory_space<vmem>>, vector<16x256xf32>
    %c256 = arith.constant 256 : index
    %c0_9 = arith.constant 0 : index
    %10 = vector.load %arg3[%c256, %c0_9] : memref<329x256xf32, #tpu.memory_space<vmem>>, vector<32x256xf32>
    %cst_10 = arith.constant dense<0.000000e+00> : vector<16x256xf32>
    %11 = tpu.matmul %6, %10, %cst_10 {dimension_numbers = #tpu.dot_dimension_numbers<[1], [0], [0], [1], [0, 0, 1, 1], [], []>} : vector<16x32xf32>, vector<32x256xf32>, vector<16x256xf32> -> vector<16x256xf32>
    %c288 = arith.constant 288 : index
    %c0_11 = arith.constant 0 : index
    %12 = vector.load %arg3[%c288, %c0_11] : memref<329x256xf32, #tpu.memory_space<vmem>>, vector<32x256xf32>
    %cst_12 = arith.constant dense<0.000000e+00> : vector<16x256xf32>
    %13 = tpu.matmul %7, %12, %cst_12 {dimension_numbers = #tpu.dot_dimension_numbers<[1], [0], [0], [1], [0, 0, 1, 1], [], []>} : vector<16x32xf32>, vector<32x256xf32>, vector<16x256xf32> -> vector<16x256xf32>
    %14 = arith.addf %11, %13 : vector<16x256xf32>
    %15 = arith.addf %5, %14 : vector<16x256xf32>
    %16 = math.tanh %15 : vector<16x256xf32>
    %c0_13 = arith.constant 0 : index
    %c0_14 = arith.constant 0 : index
    %17 = vector.load %arg6[%c0_13, %c0_14] : memref<321x8xf32, #tpu.memory_space<vmem>>, vector<256x8xf32>
    %cst_15 = arith.constant dense<0.000000e+00> : vector<16x8xf32>
    %18 = tpu.matmul %16, %17, %cst_15 {dimension_numbers = #tpu.dot_dimension_numbers<[1], [0], [0], [1], [0, 0, 1, 1], [], []>} : vector<16x256xf32>, vector<256x8xf32>, vector<16x8xf32> -> vector<16x8xf32>
    %cst_16 = arith.constant dense<0xFF800000> : vector<16xf32>
    %19 = vector.multi_reduction <maximumf>, %18, %cst_16 [1] : vector<16x8xf32> to vector<16xf32>
    %20 = vector.shape_cast %19 : vector<16xf32> to vector<16x1xf32>
    %21 = vector.broadcast %20 : vector<16x1xf32> to vector<16x8xf32>
    %22 = arith.subf %18, %21 : vector<16x8xf32>
    %23 = math.exp %22 : vector<16x8xf32>
    %cst_17 = arith.constant dense<0.000000e+00> : vector<16xf32>
    %24 = vector.multi_reduction <add>, %23, %cst_17 [1] : vector<16x8xf32> to vector<16xf32>
    %25 = vector.shape_cast %24 : vector<16xf32> to vector<16x1xf32>
    %26 = tpu.reciprocal %25 {approx = true} : vector<16x1xf32> -> vector<16x1xf32>
    %27 = vector.broadcast %26 : vector<16x1xf32> to vector<16x8xf32>
    %28 = arith.mulf %23, %27 : vector<16x8xf32>
    %c320 = arith.constant 320 : index
    %c0_18 = arith.constant 0 : index
    %29 = vector.load %arg3[%c320, %c0_18] : memref<329x256xf32, #tpu.memory_space<vmem>>, vector<8x256xf32>
    %cst_19 = arith.constant dense<0.000000e+00> : vector<16x256xf32>
    %30 = tpu.matmul %28, %29, %cst_19 {dimension_numbers = #tpu.dot_dimension_numbers<[1], [0], [0], [1], [0, 0, 1, 1], [], []>} : vector<16x8xf32>, vector<8x256xf32>, vector<16x256xf32> -> vector<16x256xf32>
    %31 = arith.mulf %30, %9 : vector<16x256xf32>
    %c0_20 = arith.constant 0 : index
    %c0_21 = arith.constant 0 : index
    %32 = vector.load %arg4[%c0_20, %c0_21] : memref<256x32xf32, #tpu.memory_space<vmem>>, vector<256x32xf32>
    %cst_22 = arith.constant dense<0.000000e+00> : vector<16x32xf32>
    %33 = tpu.matmul %31, %32, %cst_22 {dimension_numbers = #tpu.dot_dimension_numbers<[1], [0], [0], [1], [0, 0, 1, 1], [], []>} : vector<16x256xf32>, vector<256x32xf32>, vector<16x32xf32> -> vector<16x32xf32>
    %c0_23 = arith.constant 0 : index
    %c0_24 = arith.constant 0 : index
    %34 = vector.load %arg5[%c0_23, %c0_24] : memref<65x128xf32, #tpu.memory_space<vmem>>, vector<32x128xf32>
    %cst_25 = arith.constant dense<0.000000e+00> : vector<16x128xf32>
    %35 = tpu.matmul %6, %34, %cst_25 {dimension_numbers = #tpu.dot_dimension_numbers<[1], [0], [0], [1], [0, 0, 1, 1], [], []>} : vector<16x32xf32>, vector<32x128xf32>, vector<16x128xf32> -> vector<16x128xf32>
    %c32 = arith.constant 32 : index
    %c0_26 = arith.constant 0 : index
    %36 = vector.load %arg5[%c32, %c0_26] : memref<65x128xf32, #tpu.memory_space<vmem>>, vector<32x128xf32>
    %cst_27 = arith.constant dense<0.000000e+00> : vector<16x128xf32>
    %37 = tpu.matmul %33, %36, %cst_27 {dimension_numbers = #tpu.dot_dimension_numbers<[1], [0], [0], [1], [0, 0, 1, 1], [], []>} : vector<16x32xf32>, vector<32x128xf32>, vector<16x128xf32> -> vector<16x128xf32>
    %38 = arith.addf %35, %37 : vector<16x128xf32>
    %39 = arith.index_cast %c0_i32 : i32 to index
    %c0_28 = arith.constant 0 : index
    %c0_29 = arith.constant 0 : index
    %40 = vector.load %arg2[%39, %c0_28, %c0_29] : memref<8x16x128xf32, #tpu.memory_space<vmem>>, vector<1x16x128xf32>
    %41 = vector.shape_cast %40 : vector<1x16x128xf32> to vector<16x128xf32>
    %42 = arith.addf %38, %41 : vector<16x128xf32>
    %c64 = arith.constant 64 : index
    %c0_30 = arith.constant 0 : index
    %43 = vector.load %arg5[%c64, %c0_30] : memref<65x128xf32, #tpu.memory_space<vmem>>, vector<1x128xf32>
    %44 = vector.broadcast %43 : vector<1x128xf32> to vector<16x128xf32>
    %45 = arith.addf %42, %44 : vector<16x128xf32>
    %46 = vector.extract_strided_slice %45 {offsets = [0, 0], sizes = [16, 32], strides = [1, 1]} : vector<16x128xf32> to vector<16x32xf32>
    %47 = arith.negf %46 : vector<16x32xf32>
    %48 = math.exp %47 : vector<16x32xf32>
    %cst_31 = arith.constant 1.000000e+00 : f32
    %49 = vector.broadcast %cst_31 : f32 to vector<16x32xf32>
    %50 = arith.addf %49, %48 : vector<16x32xf32>
    %51 = arith.divf %49, %50 : vector<16x32xf32>
    %52 = vector.extract_strided_slice %45 {offsets = [0, 32], sizes = [16, 32], strides = [1, 1]} : vector<16x128xf32> to vector<16x32xf32>
    %53 = arith.negf %52 : vector<16x32xf32>
    %54 = math.exp %53 : vector<16x32xf32>
    %cst_32 = arith.constant 1.000000e+00 : f32
    %55 = vector.broadcast %cst_32 : f32 to vector<16x32xf32>
    %56 = arith.addf %55, %54 : vector<16x32xf32>
    %57 = arith.divf %55, %56 : vector<16x32xf32>
    %58 = vector.extract_strided_slice %45 {offsets = [0, 64], sizes = [16, 32], strides = [1, 1]} : vector<16x128xf32> to vector<16x32xf32>
    %59 = math.tanh %58 : vector<16x32xf32>
    %60 = vector.extract_strided_slice %45 {offsets = [0, 96], sizes = [16, 32], strides = [1, 1]} : vector<16x128xf32> to vector<16x32xf32>
    %61 = arith.negf %60 : vector<16x32xf32>
    %62 = math.exp %61 : vector<16x32xf32>
    %cst_33 = arith.constant 1.000000e+00 : f32
    %63 = vector.broadcast %cst_33 : f32 to vector<16x32xf32>
    %64 = arith.addf %63, %62 : vector<16x32xf32>
    %65 = arith.divf %63, %64 : vector<16x32xf32>
    %66 = arith.mulf %57, %7 : vector<16x32xf32>
    %67 = arith.mulf %51, %59 : vector<16x32xf32>
    %68 = arith.addf %66, %67 : vector<16x32xf32>
    %69 = math.tanh %68 : vector<16x32xf32>
    %70 = arith.mulf %65, %69 : vector<16x32xf32>
    %c1_i32 = arith.constant 1 : i32
    %c0_34 = arith.constant 0 : index
    %c0_35 = arith.constant 0 : index
    %71 = vector.load %arg1[%c0_34, %c0_35] : memref<16x256xf32, #tpu.memory_space<vmem>>, vector<16x256xf32>
    %c256_36 = arith.constant 256 : index
    %c0_37 = arith.constant 0 : index
    %72 = vector.load %arg3[%c256_36, %c0_37] : memref<329x256xf32, #tpu.memory_space<vmem>>, vector<32x256xf32>
    %cst_38 = arith.constant dense<0.000000e+00> : vector<16x256xf32>
    %73 = tpu.matmul %70, %72, %cst_38 {dimension_numbers = #tpu.dot_dimension_numbers<[1], [0], [0], [1], [0, 0, 1, 1], [], []>} : vector<16x32xf32>, vector<32x256xf32>, vector<16x256xf32> -> vector<16x256xf32>
    %c288_39 = arith.constant 288 : index
    %c0_40 = arith.constant 0 : index
    %74 = vector.load %arg3[%c288_39, %c0_40] : memref<329x256xf32, #tpu.memory_space<vmem>>, vector<32x256xf32>
    %cst_41 = arith.constant dense<0.000000e+00> : vector<16x256xf32>
    %75 = tpu.matmul %68, %74, %cst_41 {dimension_numbers = #tpu.dot_dimension_numbers<[1], [0], [0], [1], [0, 0, 1, 1], [], []>} : vector<16x32xf32>, vector<32x256xf32>, vector<16x256xf32> -> vector<16x256xf32>
    %76 = arith.addf %73, %75 : vector<16x256xf32>
    %77 = arith.addf %5, %76 : vector<16x256xf32>
    %78 = math.tanh %77 : vector<16x256xf32>
    %c0_42 = arith.constant 0 : index
    %c0_43 = arith.constant 0 : index
    %79 = vector.load %arg6[%c0_42, %c0_43] : memref<321x8xf32, #tpu.memory_space<vmem>>, vector<256x8xf32>
    %cst_44 = arith.constant dense<0.000000e+00> : vector<16x8xf32>
    %80 = tpu.matmul %78, %79, %cst_44 {dimension_numbers = #tpu.dot_dimension_numbers<[1], [0], [0], [1], [0, 0, 1, 1], [], []>} : vector<16x256xf32>, vector<256x8xf32>, vector<16x8xf32> -> vector<16x8xf32>
    %cst_45 = arith.constant dense<0xFF800000> : vector<16xf32>
    %81 = vector.multi_reduction <maximumf>, %80, %cst_45 [1] : vector<16x8xf32> to vector<16xf32>
    %82 = vector.shape_cast %81 : vector<16xf32> to vector<16x1xf32>
    %83 = vector.broadcast %82 : vector<16x1xf32> to vector<16x8xf32>
    %84 = arith.subf %80, %83 : vector<16x8xf32>
    %85 = math.exp %84 : vector<16x8xf32>
    %cst_46 = arith.constant dense<0.000000e+00> : vector<16xf32>
    %86 = vector.multi_reduction <add>, %85, %cst_46 [1] : vector<16x8xf32> to vector<16xf32>
    %87 = vector.shape_cast %86 : vector<16xf32> to vector<16x1xf32>
    %88 = tpu.reciprocal %87 {approx = true} : vector<16x1xf32> -> vector<16x1xf32>
    %89 = vector.broadcast %88 : vector<16x1xf32> to vector<16x8xf32>
    %90 = arith.mulf %85, %89 : vector<16x8xf32>
    %c320_47 = arith.constant 320 : index
    %c0_48 = arith.constant 0 : index
    %91 = vector.load %arg3[%c320_47, %c0_48] : memref<329x256xf32, #tpu.memory_space<vmem>>, vector<8x256xf32>
    %cst_49 = arith.constant dense<0.000000e+00> : vector<16x256xf32>
    %92 = tpu.matmul %90, %91, %cst_49 {dimension_numbers = #tpu.dot_dimension_numbers<[1], [0], [0], [1], [0, 0, 1, 1], [], []>} : vector<16x8xf32>, vector<8x256xf32>, vector<16x256xf32> -> vector<16x256xf32>
    %93 = arith.mulf %92, %71 : vector<16x256xf32>
    %c0_50 = arith.constant 0 : index
    %c0_51 = arith.constant 0 : index
    %94 = vector.load %arg4[%c0_50, %c0_51] : memref<256x32xf32, #tpu.memory_space<vmem>>, vector<256x32xf32>
    %cst_52 = arith.constant dense<0.000000e+00> : vector<16x32xf32>
    %95 = tpu.matmul %93, %94, %cst_52 {dimension_numbers = #tpu.dot_dimension_numbers<[1], [0], [0], [1], [0, 0, 1, 1], [], []>} : vector<16x256xf32>, vector<256x32xf32>, vector<16x32xf32> -> vector<16x32xf32>
    %c0_53 = arith.constant 0 : index
    %c0_54 = arith.constant 0 : index
    %96 = vector.load %arg5[%c0_53, %c0_54] : memref<65x128xf32, #tpu.memory_space<vmem>>, vector<32x128xf32>
    %cst_55 = arith.constant dense<0.000000e+00> : vector<16x128xf32>
    %97 = tpu.matmul %70, %96, %cst_55 {dimension_numbers = #tpu.dot_dimension_numbers<[1], [0], [0], [1], [0, 0, 1, 1], [], []>} : vector<16x32xf32>, vector<32x128xf32>, vector<16x128xf32> -> vector<16x128xf32>
    %c32_56 = arith.constant 32 : index
    %c0_57 = arith.constant 0 : index
    %98 = vector.load %arg5[%c32_56, %c0_57] : memref<65x128xf32, #tpu.memory_space<vmem>>, vector<32x128xf32>
    %cst_58 = arith.constant dense<0.000000e+00> : vector<16x128xf32>
    %99 = tpu.matmul %95, %98, %cst_58 {dimension_numbers = #tpu.dot_dimension_numbers<[1], [0], [0], [1], [0, 0, 1, 1], [], []>} : vector<16x32xf32>, vector<32x128xf32>, vector<16x128xf32> -> vector<16x128xf32>
    %100 = arith.addf %97, %99 : vector<16x128xf32>
    %101 = arith.index_cast %c1_i32 : i32 to index
    %c0_59 = arith.constant 0 : index
    %c0_60 = arith.constant 0 : index
    %102 = vector.load %arg2[%101, %c0_59, %c0_60] : memref<8x16x128xf32, #tpu.memory_space<vmem>>, vector<1x16x128xf32>
    %103 = vector.shape_cast %102 : vector<1x16x128xf32> to vector<16x128xf32>
    %104 = arith.addf %100, %103 : vector<16x128xf32>
    %c64_61 = arith.constant 64 : index
    %c0_62 = arith.constant 0 : index
    %105 = vector.load %arg5[%c64_61, %c0_62] : memref<65x128xf32, #tpu.memory_space<vmem>>, vector<1x128xf32>
    %106 = vector.broadcast %105 : vector<1x128xf32> to vector<16x128xf32>
    %107 = arith.addf %104, %106 : vector<16x128xf32>
    %108 = vector.extract_strided_slice %107 {offsets = [0, 0], sizes = [16, 32], strides = [1, 1]} : vector<16x128xf32> to vector<16x32xf32>
    %109 = arith.negf %108 : vector<16x32xf32>
    %110 = math.exp %109 : vector<16x32xf32>
    %cst_63 = arith.constant 1.000000e+00 : f32
    %111 = vector.broadcast %cst_63 : f32 to vector<16x32xf32>
    %112 = arith.addf %111, %110 : vector<16x32xf32>
    %113 = arith.divf %111, %112 : vector<16x32xf32>
    %114 = vector.extract_strided_slice %107 {offsets = [0, 32], sizes = [16, 32], strides = [1, 1]} : vector<16x128xf32> to vector<16x32xf32>
    %115 = arith.negf %114 : vector<16x32xf32>
    %116 = math.exp %115 : vector<16x32xf32>
    %cst_64 = arith.constant 1.000000e+00 : f32
    %117 = vector.broadcast %cst_64 : f32 to vector<16x32xf32>
    %118 = arith.addf %117, %116 : vector<16x32xf32>
    %119 = arith.divf %117, %118 : vector<16x32xf32>
    %120 = vector.extract_strided_slice %107 {offsets = [0, 64], sizes = [16, 32], strides = [1, 1]} : vector<16x128xf32> to vector<16x32xf32>
    %121 = math.tanh %120 : vector<16x32xf32>
    %122 = vector.extract_strided_slice %107 {offsets = [0, 96], sizes = [16, 32], strides = [1, 1]} : vector<16x128xf32> to vector<16x32xf32>
    %123 = arith.negf %122 : vector<16x32xf32>
    %124 = math.exp %123 : vector<16x32xf32>
    %cst_65 = arith.constant 1.000000e+00 : f32
    %125 = vector.broadcast %cst_65 : f32 to vector<16x32xf32>
    %126 = arith.addf %125, %124 : vector<16x32xf32>
    %127 = arith.divf %125, %126 : vector<16x32xf32>
    %128 = arith.mulf %119, %68 : vector<16x32xf32>
    %129 = arith.mulf %113, %121 : vector<16x32xf32>
    %130 = arith.addf %128, %129 : vector<16x32xf32>
    %131 = math.tanh %130 : vector<16x32xf32>
    %132 = arith.mulf %127, %131 : vector<16x32xf32>
    %c2_i32 = arith.constant 2 : i32
    %c0_66 = arith.constant 0 : index
    %c0_67 = arith.constant 0 : index
    %133 = vector.load %arg1[%c0_66, %c0_67] : memref<16x256xf32, #tpu.memory_space<vmem>>, vector<16x256xf32>
    %c256_68 = arith.constant 256 : index
    %c0_69 = arith.constant 0 : index
    %134 = vector.load %arg3[%c256_68, %c0_69] : memref<329x256xf32, #tpu.memory_space<vmem>>, vector<32x256xf32>
    %cst_70 = arith.constant dense<0.000000e+00> : vector<16x256xf32>
    %135 = tpu.matmul %132, %134, %cst_70 {dimension_numbers = #tpu.dot_dimension_numbers<[1], [0], [0], [1], [0, 0, 1, 1], [], []>} : vector<16x32xf32>, vector<32x256xf32>, vector<16x256xf32> -> vector<16x256xf32>
    %c288_71 = arith.constant 288 : index
    %c0_72 = arith.constant 0 : index
    %136 = vector.load %arg3[%c288_71, %c0_72] : memref<329x256xf32, #tpu.memory_space<vmem>>, vector<32x256xf32>
    %cst_73 = arith.constant dense<0.000000e+00> : vector<16x256xf32>
    %137 = tpu.matmul %130, %136, %cst_73 {dimension_numbers = #tpu.dot_dimension_numbers<[1], [0], [0], [1], [0, 0, 1, 1], [], []>} : vector<16x32xf32>, vector<32x256xf32>, vector<16x256xf32> -> vector<16x256xf32>
    %138 = arith.addf %135, %137 : vector<16x256xf32>
    %139 = arith.addf %5, %138 : vector<16x256xf32>
    %140 = math.tanh %139 : vector<16x256xf32>
    %c0_74 = arith.constant 0 : index
    %c0_75 = arith.constant 0 : index
    %141 = vector.load %arg6[%c0_74, %c0_75] : memref<321x8xf32, #tpu.memory_space<vmem>>, vector<256x8xf32>
    %cst_76 = arith.constant dense<0.000000e+00> : vector<16x8xf32>
    %142 = tpu.matmul %140, %141, %cst_76 {dimension_numbers = #tpu.dot_dimension_numbers<[1], [0], [0], [1], [0, 0, 1, 1], [], []>} : vector<16x256xf32>, vector<256x8xf32>, vector<16x8xf32> -> vector<16x8xf32>
    %cst_77 = arith.constant dense<0xFF800000> : vector<16xf32>
    %143 = vector.multi_reduction <maximumf>, %142, %cst_77 [1] : vector<16x8xf32> to vector<16xf32>
    %144 = vector.shape_cast %143 : vector<16xf32> to vector<16x1xf32>
    %145 = vector.broadcast %144 : vector<16x1xf32> to vector<16x8xf32>
    %146 = arith.subf %142, %145 : vector<16x8xf32>
    %147 = math.exp %146 : vector<16x8xf32>
    %cst_78 = arith.constant dense<0.000000e+00> : vector<16xf32>
    %148 = vector.multi_reduction <add>, %147, %cst_78 [1] : vector<16x8xf32> to vector<16xf32>
    %149 = vector.shape_cast %148 : vector<16xf32> to vector<16x1xf32>
    %150 = tpu.reciprocal %149 {approx = true} : vector<16x1xf32> -> vector<16x1xf32>
    %151 = vector.broadcast %150 : vector<16x1xf32> to vector<16x8xf32>
    %152 = arith.mulf %147, %151 : vector<16x8xf32>
    %c320_79 = arith.constant 320 : index
    %c0_80 = arith.constant 0 : index
    %153 = vector.load %arg3[%c320_79, %c0_80] : memref<329x256xf32, #tpu.memory_space<vmem>>, vector<8x256xf32>
    %cst_81 = arith.constant dense<0.000000e+00> : vector<16x256xf32>
    %154 = tpu.matmul %152, %153, %cst_81 {dimension_numbers = #tpu.dot_dimension_numbers<[1], [0], [0], [1], [0, 0, 1, 1], [], []>} : vector<16x8xf32>, vector<8x256xf32>, vector<16x256xf32> -> vector<16x256xf32>
    %155 = arith.mulf %154, %133 : vector<16x256xf32>
    %c0_82 = arith.constant 0 : index
    %c0_83 = arith.constant 0 : index
    %156 = vector.load %arg4[%c0_82, %c0_83] : memref<256x32xf32, #tpu.memory_space<vmem>>, vector<256x32xf32>
    %cst_84 = arith.constant dense<0.000000e+00> : vector<16x32xf32>
    %157 = tpu.matmul %155, %156, %cst_84 {dimension_numbers = #tpu.dot_dimension_numbers<[1], [0], [0], [1], [0, 0, 1, 1], [], []>} : vector<16x256xf32>, vector<256x32xf32>, vector<16x32xf32> -> vector<16x32xf32>
    %c0_85 = arith.constant 0 : index
    %c0_86 = arith.constant 0 : index
    %158 = vector.load %arg5[%c0_85, %c0_86] : memref<65x128xf32, #tpu.memory_space<vmem>>, vector<32x128xf32>
    %cst_87 = arith.constant dense<0.000000e+00> : vector<16x128xf32>
    %159 = tpu.matmul %132, %158, %cst_87 {dimension_numbers = #tpu.dot_dimension_numbers<[1], [0], [0], [1], [0, 0, 1, 1], [], []>} : vector<16x32xf32>, vector<32x128xf32>, vector<16x128xf32> -> vector<16x128xf32>
    %c32_88 = arith.constant 32 : index
    %c0_89 = arith.constant 0 : index
    %160 = vector.load %arg5[%c32_88, %c0_89] : memref<65x128xf32, #tpu.memory_space<vmem>>, vector<32x128xf32>
    %cst_90 = arith.constant dense<0.000000e+00> : vector<16x128xf32>
    %161 = tpu.matmul %157, %160, %cst_90 {dimension_numbers = #tpu.dot_dimension_numbers<[1], [0], [0], [1], [0, 0, 1, 1], [], []>} : vector<16x32xf32>, vector<32x128xf32>, vector<16x128xf32> -> vector<16x128xf32>
    %162 = arith.addf %159, %161 : vector<16x128xf32>
    %163 = arith.index_cast %c2_i32 : i32 to index
    %c0_91 = arith.constant 0 : index
    %c0_92 = arith.constant 0 : index
    %164 = vector.load %arg2[%163, %c0_91, %c0_92] : memref<8x16x128xf32, #tpu.memory_space<vmem>>, vector<1x16x128xf32>
    %165 = vector.shape_cast %164 : vector<1x16x128xf32> to vector<16x128xf32>
    %166 = arith.addf %162, %165 : vector<16x128xf32>
    %c64_93 = arith.constant 64 : index
    %c0_94 = arith.constant 0 : index
    %167 = vector.load %arg5[%c64_93, %c0_94] : memref<65x128xf32, #tpu.memory_space<vmem>>, vector<1x128xf32>
    %168 = vector.broadcast %167 : vector<1x128xf32> to vector<16x128xf32>
    %169 = arith.addf %166, %168 : vector<16x128xf32>
    %170 = vector.extract_strided_slice %169 {offsets = [0, 0], sizes = [16, 32], strides = [1, 1]} : vector<16x128xf32> to vector<16x32xf32>
    %171 = arith.negf %170 : vector<16x32xf32>
    %172 = math.exp %171 : vector<16x32xf32>
    %cst_95 = arith.constant 1.000000e+00 : f32
    %173 = vector.broadcast %cst_95 : f32 to vector<16x32xf32>
    %174 = arith.addf %173, %172 : vector<16x32xf32>
    %175 = arith.divf %173, %174 : vector<16x32xf32>
    %176 = vector.extract_strided_slice %169 {offsets = [0, 32], sizes = [16, 32], strides = [1, 1]} : vector<16x128xf32> to vector<16x32xf32>
    %177 = arith.negf %176 : vector<16x32xf32>
    %178 = math.exp %177 : vector<16x32xf32>
    %cst_96 = arith.constant 1.000000e+00 : f32
    %179 = vector.broadcast %cst_96 : f32 to vector<16x32xf32>
    %180 = arith.addf %179, %178 : vector<16x32xf32>
    %181 = arith.divf %179, %180 : vector<16x32xf32>
    %182 = vector.extract_strided_slice %169 {offsets = [0, 64], sizes = [16, 32], strides = [1, 1]} : vector<16x128xf32> to vector<16x32xf32>
    %183 = math.tanh %182 : vector<16x32xf32>
    %184 = vector.extract_strided_slice %169 {offsets = [0, 96], sizes = [16, 32], strides = [1, 1]} : vector<16x128xf32> to vector<16x32xf32>
    %185 = arith.negf %184 : vector<16x32xf32>
    %186 = math.exp %185 : vector<16x32xf32>
    %cst_97 = arith.constant 1.000000e+00 : f32
    %187 = vector.broadcast %cst_97 : f32 to vector<16x32xf32>
    %188 = arith.addf %187, %186 : vector<16x32xf32>
    %189 = arith.divf %187, %188 : vector<16x32xf32>
    %190 = arith.mulf %181, %130 : vector<16x32xf32>
    %191 = arith.mulf %175, %183 : vector<16x32xf32>
    %192 = arith.addf %190, %191 : vector<16x32xf32>
    %193 = math.tanh %192 : vector<16x32xf32>
    %194 = arith.mulf %189, %193 : vector<16x32xf32>
    %c3_i32 = arith.constant 3 : i32
    %c0_98 = arith.constant 0 : index
    %c0_99 = arith.constant 0 : index
    %195 = vector.load %arg1[%c0_98, %c0_99] : memref<16x256xf32, #tpu.memory_space<vmem>>, vector<16x256xf32>
    %c256_100 = arith.constant 256 : index
    %c0_101 = arith.constant 0 : index
    %196 = vector.load %arg3[%c256_100, %c0_101] : memref<329x256xf32, #tpu.memory_space<vmem>>, vector<32x256xf32>
    %cst_102 = arith.constant dense<0.000000e+00> : vector<16x256xf32>
    %197 = tpu.matmul %194, %196, %cst_102 {dimension_numbers = #tpu.dot_dimension_numbers<[1], [0], [0], [1], [0, 0, 1, 1], [], []>} : vector<16x32xf32>, vector<32x256xf32>, vector<16x256xf32> -> vector<16x256xf32>
    %c288_103 = arith.constant 288 : index
    %c0_104 = arith.constant 0 : index
    %198 = vector.load %arg3[%c288_103, %c0_104] : memref<329x256xf32, #tpu.memory_space<vmem>>, vector<32x256xf32>
    %cst_105 = arith.constant dense<0.000000e+00> : vector<16x256xf32>
    %199 = tpu.matmul %192, %198, %cst_105 {dimension_numbers = #tpu.dot_dimension_numbers<[1], [0], [0], [1], [0, 0, 1, 1], [], []>} : vector<16x32xf32>, vector<32x256xf32>, vector<16x256xf32> -> vector<16x256xf32>
    %200 = arith.addf %197, %199 : vector<16x256xf32>
    %201 = arith.addf %5, %200 : vector<16x256xf32>
    %202 = math.tanh %201 : vector<16x256xf32>
    %c0_106 = arith.constant 0 : index
    %c0_107 = arith.constant 0 : index
    %203 = vector.load %arg6[%c0_106, %c0_107] : memref<321x8xf32, #tpu.memory_space<vmem>>, vector<256x8xf32>
    %cst_108 = arith.constant dense<0.000000e+00> : vector<16x8xf32>
    %204 = tpu.matmul %202, %203, %cst_108 {dimension_numbers = #tpu.dot_dimension_numbers<[1], [0], [0], [1], [0, 0, 1, 1], [], []>} : vector<16x256xf32>, vector<256x8xf32>, vector<16x8xf32> -> vector<16x8xf32>
    %cst_109 = arith.constant dense<0xFF800000> : vector<16xf32>
    %205 = vector.multi_reduction <maximumf>, %204, %cst_109 [1] : vector<16x8xf32> to vector<16xf32>
    %206 = vector.shape_cast %205 : vector<16xf32> to vector<16x1xf32>
    %207 = vector.broadcast %206 : vector<16x1xf32> to vector<16x8xf32>
    %208 = arith.subf %204, %207 : vector<16x8xf32>
    %209 = math.exp %208 : vector<16x8xf32>
    %cst_110 = arith.constant dense<0.000000e+00> : vector<16xf32>
    %210 = vector.multi_reduction <add>, %209, %cst_110 [1] : vector<16x8xf32> to vector<16xf32>
    %211 = vector.shape_cast %210 : vector<16xf32> to vector<16x1xf32>
    %212 = tpu.reciprocal %211 {approx = true} : vector<16x1xf32> -> vector<16x1xf32>
    %213 = vector.broadcast %212 : vector<16x1xf32> to vector<16x8xf32>
    %214 = arith.mulf %209, %213 : vector<16x8xf32>
    %c320_111 = arith.constant 320 : index
    %c0_112 = arith.constant 0 : index
    %215 = vector.load %arg3[%c320_111, %c0_112] : memref<329x256xf32, #tpu.memory_space<vmem>>, vector<8x256xf32>
    %cst_113 = arith.constant dense<0.000000e+00> : vector<16x256xf32>
    %216 = tpu.matmul %214, %215, %cst_113 {dimension_numbers = #tpu.dot_dimension_numbers<[1], [0], [0], [1], [0, 0, 1, 1], [], []>} : vector<16x8xf32>, vector<8x256xf32>, vector<16x256xf32> -> vector<16x256xf32>
    %217 = arith.mulf %216, %195 : vector<16x256xf32>
    %c0_114 = arith.constant 0 : index
    %c0_115 = arith.constant 0 : index
    %218 = vector.load %arg4[%c0_114, %c0_115] : memref<256x32xf32, #tpu.memory_space<vmem>>, vector<256x32xf32>
    %cst_116 = arith.constant dense<0.000000e+00> : vector<16x32xf32>
    %219 = tpu.matmul %217, %218, %cst_116 {dimension_numbers = #tpu.dot_dimension_numbers<[1], [0], [0], [1], [0, 0, 1, 1], [], []>} : vector<16x256xf32>, vector<256x32xf32>, vector<16x32xf32> -> vector<16x32xf32>
    %c0_117 = arith.constant 0 : index
    %c0_118 = arith.constant 0 : index
    %220 = vector.load %arg5[%c0_117, %c0_118] : memref<65x128xf32, #tpu.memory_space<vmem>>, vector<32x128xf32>
    %cst_119 = arith.constant dense<0.000000e+00> : vector<16x128xf32>
    %221 = tpu.matmul %194, %220, %cst_119 {dimension_numbers = #tpu.dot_dimension_numbers<[1], [0], [0], [1], [0, 0, 1, 1], [], []>} : vector<16x32xf32>, vector<32x128xf32>, vector<16x128xf32> -> vector<16x128xf32>
    %c32_120 = arith.constant 32 : index
    %c0_121 = arith.constant 0 : index
    %222 = vector.load %arg5[%c32_120, %c0_121] : memref<65x128xf32, #tpu.memory_space<vmem>>, vector<32x128xf32>
    %cst_122 = arith.constant dense<0.000000e+00> : vector<16x128xf32>
    %223 = tpu.matmul %219, %222, %cst_122 {dimension_numbers = #tpu.dot_dimension_numbers<[1], [0], [0], [1], [0, 0, 1, 1], [], []>} : vector<16x32xf32>, vector<32x128xf32>, vector<16x128xf32> -> vector<16x128xf32>
    %224 = arith.addf %221, %223 : vector<16x128xf32>
    %225 = arith.index_cast %c3_i32 : i32 to index
    %c0_123 = arith.constant 0 : index
    %c0_124 = arith.constant 0 : index
    %226 = vector.load %arg2[%225, %c0_123, %c0_124] : memref<8x16x128xf32, #tpu.memory_space<vmem>>, vector<1x16x128xf32>
    %227 = vector.shape_cast %226 : vector<1x16x128xf32> to vector<16x128xf32>
    %228 = arith.addf %224, %227 : vector<16x128xf32>
    %c64_125 = arith.constant 64 : index
    %c0_126 = arith.constant 0 : index
    %229 = vector.load %arg5[%c64_125, %c0_126] : memref<65x128xf32, #tpu.memory_space<vmem>>, vector<1x128xf32>
    %230 = vector.broadcast %229 : vector<1x128xf32> to vector<16x128xf32>
    %231 = arith.addf %228, %230 : vector<16x128xf32>
    %232 = vector.extract_strided_slice %231 {offsets = [0, 0], sizes = [16, 32], strides = [1, 1]} : vector<16x128xf32> to vector<16x32xf32>
    %233 = arith.negf %232 : vector<16x32xf32>
    %234 = math.exp %233 : vector<16x32xf32>
    %cst_127 = arith.constant 1.000000e+00 : f32
    %235 = vector.broadcast %cst_127 : f32 to vector<16x32xf32>
    %236 = arith.addf %235, %234 : vector<16x32xf32>
    %237 = arith.divf %235, %236 : vector<16x32xf32>
    %238 = vector.extract_strided_slice %231 {offsets = [0, 32], sizes = [16, 32], strides = [1, 1]} : vector<16x128xf32> to vector<16x32xf32>
    %239 = arith.negf %238 : vector<16x32xf32>
    %240 = math.exp %239 : vector<16x32xf32>
    %cst_128 = arith.constant 1.000000e+00 : f32
    %241 = vector.broadcast %cst_128 : f32 to vector<16x32xf32>
    %242 = arith.addf %241, %240 : vector<16x32xf32>
    %243 = arith.divf %241, %242 : vector<16x32xf32>
    %244 = vector.extract_strided_slice %231 {offsets = [0, 64], sizes = [16, 32], strides = [1, 1]} : vector<16x128xf32> to vector<16x32xf32>
    %245 = math.tanh %244 : vector<16x32xf32>
    %246 = vector.extract_strided_slice %231 {offsets = [0, 96], sizes = [16, 32], strides = [1, 1]} : vector<16x128xf32> to vector<16x32xf32>
    %247 = arith.negf %246 : vector<16x32xf32>
    %248 = math.exp %247 : vector<16x32xf32>
    %cst_129 = arith.constant 1.000000e+00 : f32
    %249 = vector.broadcast %cst_129 : f32 to vector<16x32xf32>
    %250 = arith.addf %249, %248 : vector<16x32xf32>
    %251 = arith.divf %249, %250 : vector<16x32xf32>
    %252 = arith.mulf %243, %192 : vector<16x32xf32>
    %253 = arith.mulf %237, %245 : vector<16x32xf32>
    %254 = arith.addf %252, %253 : vector<16x32xf32>
    %255 = math.tanh %254 : vector<16x32xf32>
    %256 = arith.mulf %251, %255 : vector<16x32xf32>
    %c4_i32 = arith.constant 4 : i32
    %c0_130 = arith.constant 0 : index
    %c0_131 = arith.constant 0 : index
    %257 = vector.load %arg1[%c0_130, %c0_131] : memref<16x256xf32, #tpu.memory_space<vmem>>, vector<16x256xf32>
    %c256_132 = arith.constant 256 : index
    %c0_133 = arith.constant 0 : index
    %258 = vector.load %arg3[%c256_132, %c0_133] : memref<329x256xf32, #tpu.memory_space<vmem>>, vector<32x256xf32>
    %cst_134 = arith.constant dense<0.000000e+00> : vector<16x256xf32>
    %259 = tpu.matmul %256, %258, %cst_134 {dimension_numbers = #tpu.dot_dimension_numbers<[1], [0], [0], [1], [0, 0, 1, 1], [], []>} : vector<16x32xf32>, vector<32x256xf32>, vector<16x256xf32> -> vector<16x256xf32>
    %c288_135 = arith.constant 288 : index
    %c0_136 = arith.constant 0 : index
    %260 = vector.load %arg3[%c288_135, %c0_136] : memref<329x256xf32, #tpu.memory_space<vmem>>, vector<32x256xf32>
    %cst_137 = arith.constant dense<0.000000e+00> : vector<16x256xf32>
    %261 = tpu.matmul %254, %260, %cst_137 {dimension_numbers = #tpu.dot_dimension_numbers<[1], [0], [0], [1], [0, 0, 1, 1], [], []>} : vector<16x32xf32>, vector<32x256xf32>, vector<16x256xf32> -> vector<16x256xf32>
    %262 = arith.addf %259, %261 : vector<16x256xf32>
    %263 = arith.addf %5, %262 : vector<16x256xf32>
    %264 = math.tanh %263 : vector<16x256xf32>
    %c0_138 = arith.constant 0 : index
    %c0_139 = arith.constant 0 : index
    %265 = vector.load %arg6[%c0_138, %c0_139] : memref<321x8xf32, #tpu.memory_space<vmem>>, vector<256x8xf32>
    %cst_140 = arith.constant dense<0.000000e+00> : vector<16x8xf32>
    %266 = tpu.matmul %264, %265, %cst_140 {dimension_numbers = #tpu.dot_dimension_numbers<[1], [0], [0], [1], [0, 0, 1, 1], [], []>} : vector<16x256xf32>, vector<256x8xf32>, vector<16x8xf32> -> vector<16x8xf32>
    %cst_141 = arith.constant dense<0xFF800000> : vector<16xf32>
    %267 = vector.multi_reduction <maximumf>, %266, %cst_141 [1] : vector<16x8xf32> to vector<16xf32>
    %268 = vector.shape_cast %267 : vector<16xf32> to vector<16x1xf32>
    %269 = vector.broadcast %268 : vector<16x1xf32> to vector<16x8xf32>
    %270 = arith.subf %266, %269 : vector<16x8xf32>
    %271 = math.exp %270 : vector<16x8xf32>
    %cst_142 = arith.constant dense<0.000000e+00> : vector<16xf32>
    %272 = vector.multi_reduction <add>, %271, %cst_142 [1] : vector<16x8xf32> to vector<16xf32>
    %273 = vector.shape_cast %272 : vector<16xf32> to vector<16x1xf32>
    %274 = tpu.reciprocal %273 {approx = true} : vector<16x1xf32> -> vector<16x1xf32>
    %275 = vector.broadcast %274 : vector<16x1xf32> to vector<16x8xf32>
    %276 = arith.mulf %271, %275 : vector<16x8xf32>
    %c320_143 = arith.constant 320 : index
    %c0_144 = arith.constant 0 : index
    %277 = vector.load %arg3[%c320_143, %c0_144] : memref<329x256xf32, #tpu.memory_space<vmem>>, vector<8x256xf32>
    %cst_145 = arith.constant dense<0.000000e+00> : vector<16x256xf32>
    %278 = tpu.matmul %276, %277, %cst_145 {dimension_numbers = #tpu.dot_dimension_numbers<[1], [0], [0], [1], [0, 0, 1, 1], [], []>} : vector<16x8xf32>, vector<8x256xf32>, vector<16x256xf32> -> vector<16x256xf32>
    %279 = arith.mulf %278, %257 : vector<16x256xf32>
    %c0_146 = arith.constant 0 : index
    %c0_147 = arith.constant 0 : index
    %280 = vector.load %arg4[%c0_146, %c0_147] : memref<256x32xf32, #tpu.memory_space<vmem>>, vector<256x32xf32>
    %cst_148 = arith.constant dense<0.000000e+00> : vector<16x32xf32>
    %281 = tpu.matmul %279, %280, %cst_148 {dimension_numbers = #tpu.dot_dimension_numbers<[1], [0], [0], [1], [0, 0, 1, 1], [], []>} : vector<16x256xf32>, vector<256x32xf32>, vector<16x32xf32> -> vector<16x32xf32>
    %c0_149 = arith.constant 0 : index
    %c0_150 = arith.constant 0 : index
    %282 = vector.load %arg5[%c0_149, %c0_150] : memref<65x128xf32, #tpu.memory_space<vmem>>, vector<32x128xf32>
    %cst_151 = arith.constant dense<0.000000e+00> : vector<16x128xf32>
    %283 = tpu.matmul %256, %282, %cst_151 {dimension_numbers = #tpu.dot_dimension_numbers<[1], [0], [0], [1], [0, 0, 1, 1], [], []>} : vector<16x32xf32>, vector<32x128xf32>, vector<16x128xf32> -> vector<16x128xf32>
    %c32_152 = arith.constant 32 : index
    %c0_153 = arith.constant 0 : index
    %284 = vector.load %arg5[%c32_152, %c0_153] : memref<65x128xf32, #tpu.memory_space<vmem>>, vector<32x128xf32>
    %cst_154 = arith.constant dense<0.000000e+00> : vector<16x128xf32>
    %285 = tpu.matmul %281, %284, %cst_154 {dimension_numbers = #tpu.dot_dimension_numbers<[1], [0], [0], [1], [0, 0, 1, 1], [], []>} : vector<16x32xf32>, vector<32x128xf32>, vector<16x128xf32> -> vector<16x128xf32>
    %286 = arith.addf %283, %285 : vector<16x128xf32>
    %287 = arith.index_cast %c4_i32 : i32 to index
    %c0_155 = arith.constant 0 : index
    %c0_156 = arith.constant 0 : index
    %288 = vector.load %arg2[%287, %c0_155, %c0_156] : memref<8x16x128xf32, #tpu.memory_space<vmem>>, vector<1x16x128xf32>
    %289 = vector.shape_cast %288 : vector<1x16x128xf32> to vector<16x128xf32>
    %290 = arith.addf %286, %289 : vector<16x128xf32>
    %c64_157 = arith.constant 64 : index
    %c0_158 = arith.constant 0 : index
    %291 = vector.load %arg5[%c64_157, %c0_158] : memref<65x128xf32, #tpu.memory_space<vmem>>, vector<1x128xf32>
    %292 = vector.broadcast %291 : vector<1x128xf32> to vector<16x128xf32>
    %293 = arith.addf %290, %292 : vector<16x128xf32>
    %294 = vector.extract_strided_slice %293 {offsets = [0, 0], sizes = [16, 32], strides = [1, 1]} : vector<16x128xf32> to vector<16x32xf32>
    %295 = arith.negf %294 : vector<16x32xf32>
    %296 = math.exp %295 : vector<16x32xf32>
    %cst_159 = arith.constant 1.000000e+00 : f32
    %297 = vector.broadcast %cst_159 : f32 to vector<16x32xf32>
    %298 = arith.addf %297, %296 : vector<16x32xf32>
    %299 = arith.divf %297, %298 : vector<16x32xf32>
    %300 = vector.extract_strided_slice %293 {offsets = [0, 32], sizes = [16, 32], strides = [1, 1]} : vector<16x128xf32> to vector<16x32xf32>
    %301 = arith.negf %300 : vector<16x32xf32>
    %302 = math.exp %301 : vector<16x32xf32>
    %cst_160 = arith.constant 1.000000e+00 : f32
    %303 = vector.broadcast %cst_160 : f32 to vector<16x32xf32>
    %304 = arith.addf %303, %302 : vector<16x32xf32>
    %305 = arith.divf %303, %304 : vector<16x32xf32>
    %306 = vector.extract_strided_slice %293 {offsets = [0, 64], sizes = [16, 32], strides = [1, 1]} : vector<16x128xf32> to vector<16x32xf32>
    %307 = math.tanh %306 : vector<16x32xf32>
    %308 = vector.extract_strided_slice %293 {offsets = [0, 96], sizes = [16, 32], strides = [1, 1]} : vector<16x128xf32> to vector<16x32xf32>
    %309 = arith.negf %308 : vector<16x32xf32>
    %310 = math.exp %309 : vector<16x32xf32>
    %cst_161 = arith.constant 1.000000e+00 : f32
    %311 = vector.broadcast %cst_161 : f32 to vector<16x32xf32>
    %312 = arith.addf %311, %310 : vector<16x32xf32>
    %313 = arith.divf %311, %312 : vector<16x32xf32>
    %314 = arith.mulf %305, %254 : vector<16x32xf32>
    %315 = arith.mulf %299, %307 : vector<16x32xf32>
    %316 = arith.addf %314, %315 : vector<16x32xf32>
    %317 = math.tanh %316 : vector<16x32xf32>
    %318 = arith.mulf %313, %317 : vector<16x32xf32>
    %c5_i32 = arith.constant 5 : i32
    %c0_162 = arith.constant 0 : index
    %c0_163 = arith.constant 0 : index
    %319 = vector.load %arg1[%c0_162, %c0_163] : memref<16x256xf32, #tpu.memory_space<vmem>>, vector<16x256xf32>
    %c256_164 = arith.constant 256 : index
    %c0_165 = arith.constant 0 : index
    %320 = vector.load %arg3[%c256_164, %c0_165] : memref<329x256xf32, #tpu.memory_space<vmem>>, vector<32x256xf32>
    %cst_166 = arith.constant dense<0.000000e+00> : vector<16x256xf32>
    %321 = tpu.matmul %318, %320, %cst_166 {dimension_numbers = #tpu.dot_dimension_numbers<[1], [0], [0], [1], [0, 0, 1, 1], [], []>} : vector<16x32xf32>, vector<32x256xf32>, vector<16x256xf32> -> vector<16x256xf32>
    %c288_167 = arith.constant 288 : index
    %c0_168 = arith.constant 0 : index
    %322 = vector.load %arg3[%c288_167, %c0_168] : memref<329x256xf32, #tpu.memory_space<vmem>>, vector<32x256xf32>
    %cst_169 = arith.constant dense<0.000000e+00> : vector<16x256xf32>
    %323 = tpu.matmul %316, %322, %cst_169 {dimension_numbers = #tpu.dot_dimension_numbers<[1], [0], [0], [1], [0, 0, 1, 1], [], []>} : vector<16x32xf32>, vector<32x256xf32>, vector<16x256xf32> -> vector<16x256xf32>
    %324 = arith.addf %321, %323 : vector<16x256xf32>
    %325 = arith.addf %5, %324 : vector<16x256xf32>
    %326 = math.tanh %325 : vector<16x256xf32>
    %c0_170 = arith.constant 0 : index
    %c0_171 = arith.constant 0 : index
    %327 = vector.load %arg6[%c0_170, %c0_171] : memref<321x8xf32, #tpu.memory_space<vmem>>, vector<256x8xf32>
    %cst_172 = arith.constant dense<0.000000e+00> : vector<16x8xf32>
    %328 = tpu.matmul %326, %327, %cst_172 {dimension_numbers = #tpu.dot_dimension_numbers<[1], [0], [0], [1], [0, 0, 1, 1], [], []>} : vector<16x256xf32>, vector<256x8xf32>, vector<16x8xf32> -> vector<16x8xf32>
    %cst_173 = arith.constant dense<0xFF800000> : vector<16xf32>
    %329 = vector.multi_reduction <maximumf>, %328, %cst_173 [1] : vector<16x8xf32> to vector<16xf32>
    %330 = vector.shape_cast %329 : vector<16xf32> to vector<16x1xf32>
    %331 = vector.broadcast %330 : vector<16x1xf32> to vector<16x8xf32>
    %332 = arith.subf %328, %331 : vector<16x8xf32>
    %333 = math.exp %332 : vector<16x8xf32>
    %cst_174 = arith.constant dense<0.000000e+00> : vector<16xf32>
    %334 = vector.multi_reduction <add>, %333, %cst_174 [1] : vector<16x8xf32> to vector<16xf32>
    %335 = vector.shape_cast %334 : vector<16xf32> to vector<16x1xf32>
    %336 = tpu.reciprocal %335 {approx = true} : vector<16x1xf32> -> vector<16x1xf32>
    %337 = vector.broadcast %336 : vector<16x1xf32> to vector<16x8xf32>
    %338 = arith.mulf %333, %337 : vector<16x8xf32>
    %c320_175 = arith.constant 320 : index
    %c0_176 = arith.constant 0 : index
    %339 = vector.load %arg3[%c320_175, %c0_176] : memref<329x256xf32, #tpu.memory_space<vmem>>, vector<8x256xf32>
    %cst_177 = arith.constant dense<0.000000e+00> : vector<16x256xf32>
    %340 = tpu.matmul %338, %339, %cst_177 {dimension_numbers = #tpu.dot_dimension_numbers<[1], [0], [0], [1], [0, 0, 1, 1], [], []>} : vector<16x8xf32>, vector<8x256xf32>, vector<16x256xf32> -> vector<16x256xf32>
    %341 = arith.mulf %340, %319 : vector<16x256xf32>
    %c0_178 = arith.constant 0 : index
    %c0_179 = arith.constant 0 : index
    %342 = vector.load %arg4[%c0_178, %c0_179] : memref<256x32xf32, #tpu.memory_space<vmem>>, vector<256x32xf32>
    %cst_180 = arith.constant dense<0.000000e+00> : vector<16x32xf32>
    %343 = tpu.matmul %341, %342, %cst_180 {dimension_numbers = #tpu.dot_dimension_numbers<[1], [0], [0], [1], [0, 0, 1, 1], [], []>} : vector<16x256xf32>, vector<256x32xf32>, vector<16x32xf32> -> vector<16x32xf32>
    %c0_181 = arith.constant 0 : index
    %c0_182 = arith.constant 0 : index
    %344 = vector.load %arg5[%c0_181, %c0_182] : memref<65x128xf32, #tpu.memory_space<vmem>>, vector<32x128xf32>
    %cst_183 = arith.constant dense<0.000000e+00> : vector<16x128xf32>
    %345 = tpu.matmul %318, %344, %cst_183 {dimension_numbers = #tpu.dot_dimension_numbers<[1], [0], [0], [1], [0, 0, 1, 1], [], []>} : vector<16x32xf32>, vector<32x128xf32>, vector<16x128xf32> -> vector<16x128xf32>
    %c32_184 = arith.constant 32 : index
    %c0_185 = arith.constant 0 : index
    %346 = vector.load %arg5[%c32_184, %c0_185] : memref<65x128xf32, #tpu.memory_space<vmem>>, vector<32x128xf32>
    %cst_186 = arith.constant dense<0.000000e+00> : vector<16x128xf32>
    %347 = tpu.matmul %343, %346, %cst_186 {dimension_numbers = #tpu.dot_dimension_numbers<[1], [0], [0], [1], [0, 0, 1, 1], [], []>} : vector<16x32xf32>, vector<32x128xf32>, vector<16x128xf32> -> vector<16x128xf32>
    %348 = arith.addf %345, %347 : vector<16x128xf32>
    %349 = arith.index_cast %c5_i32 : i32 to index
    %c0_187 = arith.constant 0 : index
    %c0_188 = arith.constant 0 : index
    %350 = vector.load %arg2[%349, %c0_187, %c0_188] : memref<8x16x128xf32, #tpu.memory_space<vmem>>, vector<1x16x128xf32>
    %351 = vector.shape_cast %350 : vector<1x16x128xf32> to vector<16x128xf32>
    %352 = arith.addf %348, %351 : vector<16x128xf32>
    %c64_189 = arith.constant 64 : index
    %c0_190 = arith.constant 0 : index
    %353 = vector.load %arg5[%c64_189, %c0_190] : memref<65x128xf32, #tpu.memory_space<vmem>>, vector<1x128xf32>
    %354 = vector.broadcast %353 : vector<1x128xf32> to vector<16x128xf32>
    %355 = arith.addf %352, %354 : vector<16x128xf32>
    %356 = vector.extract_strided_slice %355 {offsets = [0, 0], sizes = [16, 32], strides = [1, 1]} : vector<16x128xf32> to vector<16x32xf32>
    %357 = arith.negf %356 : vector<16x32xf32>
    %358 = math.exp %357 : vector<16x32xf32>
    %cst_191 = arith.constant 1.000000e+00 : f32
    %359 = vector.broadcast %cst_191 : f32 to vector<16x32xf32>
    %360 = arith.addf %359, %358 : vector<16x32xf32>
    %361 = arith.divf %359, %360 : vector<16x32xf32>
    %362 = vector.extract_strided_slice %355 {offsets = [0, 32], sizes = [16, 32], strides = [1, 1]} : vector<16x128xf32> to vector<16x32xf32>
    %363 = arith.negf %362 : vector<16x32xf32>
    %364 = math.exp %363 : vector<16x32xf32>
    %cst_192 = arith.constant 1.000000e+00 : f32
    %365 = vector.broadcast %cst_192 : f32 to vector<16x32xf32>
    %366 = arith.addf %365, %364 : vector<16x32xf32>
    %367 = arith.divf %365, %366 : vector<16x32xf32>
    %368 = vector.extract_strided_slice %355 {offsets = [0, 64], sizes = [16, 32], strides = [1, 1]} : vector<16x128xf32> to vector<16x32xf32>
    %369 = math.tanh %368 : vector<16x32xf32>
    %370 = vector.extract_strided_slice %355 {offsets = [0, 96], sizes = [16, 32], strides = [1, 1]} : vector<16x128xf32> to vector<16x32xf32>
    %371 = arith.negf %370 : vector<16x32xf32>
    %372 = math.exp %371 : vector<16x32xf32>
    %cst_193 = arith.constant 1.000000e+00 : f32
    %373 = vector.broadcast %cst_193 : f32 to vector<16x32xf32>
    %374 = arith.addf %373, %372 : vector<16x32xf32>
    %375 = arith.divf %373, %374 : vector<16x32xf32>
    %376 = arith.mulf %367, %316 : vector<16x32xf32>
    %377 = arith.mulf %361, %369 : vector<16x32xf32>
    %378 = arith.addf %376, %377 : vector<16x32xf32>
    %379 = math.tanh %378 : vector<16x32xf32>
    %380 = arith.mulf %375, %379 : vector<16x32xf32>
    %c6_i32 = arith.constant 6 : i32
    %c0_194 = arith.constant 0 : index
    %c0_195 = arith.constant 0 : index
    %381 = vector.load %arg1[%c0_194, %c0_195] : memref<16x256xf32, #tpu.memory_space<vmem>>, vector<16x256xf32>
    %c256_196 = arith.constant 256 : index
    %c0_197 = arith.constant 0 : index
    %382 = vector.load %arg3[%c256_196, %c0_197] : memref<329x256xf32, #tpu.memory_space<vmem>>, vector<32x256xf32>
    %cst_198 = arith.constant dense<0.000000e+00> : vector<16x256xf32>
    %383 = tpu.matmul %380, %382, %cst_198 {dimension_numbers = #tpu.dot_dimension_numbers<[1], [0], [0], [1], [0, 0, 1, 1], [], []>} : vector<16x32xf32>, vector<32x256xf32>, vector<16x256xf32> -> vector<16x256xf32>
    %c288_199 = arith.constant 288 : index
    %c0_200 = arith.constant 0 : index
    %384 = vector.load %arg3[%c288_199, %c0_200] : memref<329x256xf32, #tpu.memory_space<vmem>>, vector<32x256xf32>
    %cst_201 = arith.constant dense<0.000000e+00> : vector<16x256xf32>
    %385 = tpu.matmul %378, %384, %cst_201 {dimension_numbers = #tpu.dot_dimension_numbers<[1], [0], [0], [1], [0, 0, 1, 1], [], []>} : vector<16x32xf32>, vector<32x256xf32>, vector<16x256xf32> -> vector<16x256xf32>
    %386 = arith.addf %383, %385 : vector<16x256xf32>
    %387 = arith.addf %5, %386 : vector<16x256xf32>
    %388 = math.tanh %387 : vector<16x256xf32>
    %c0_202 = arith.constant 0 : index
    %c0_203 = arith.constant 0 : index
    %389 = vector.load %arg6[%c0_202, %c0_203] : memref<321x8xf32, #tpu.memory_space<vmem>>, vector<256x8xf32>
    %cst_204 = arith.constant dense<0.000000e+00> : vector<16x8xf32>
    %390 = tpu.matmul %388, %389, %cst_204 {dimension_numbers = #tpu.dot_dimension_numbers<[1], [0], [0], [1], [0, 0, 1, 1], [], []>} : vector<16x256xf32>, vector<256x8xf32>, vector<16x8xf32> -> vector<16x8xf32>
    %cst_205 = arith.constant dense<0xFF800000> : vector<16xf32>
    %391 = vector.multi_reduction <maximumf>, %390, %cst_205 [1] : vector<16x8xf32> to vector<16xf32>
    %392 = vector.shape_cast %391 : vector<16xf32> to vector<16x1xf32>
    %393 = vector.broadcast %392 : vector<16x1xf32> to vector<16x8xf32>
    %394 = arith.subf %390, %393 : vector<16x8xf32>
    %395 = math.exp %394 : vector<16x8xf32>
    %cst_206 = arith.constant dense<0.000000e+00> : vector<16xf32>
    %396 = vector.multi_reduction <add>, %395, %cst_206 [1] : vector<16x8xf32> to vector<16xf32>
    %397 = vector.shape_cast %396 : vector<16xf32> to vector<16x1xf32>
    %398 = tpu.reciprocal %397 {approx = true} : vector<16x1xf32> -> vector<16x1xf32>
    %399 = vector.broadcast %398 : vector<16x1xf32> to vector<16x8xf32>
    %400 = arith.mulf %395, %399 : vector<16x8xf32>
    %c320_207 = arith.constant 320 : index
    %c0_208 = arith.constant 0 : index
    %401 = vector.load %arg3[%c320_207, %c0_208] : memref<329x256xf32, #tpu.memory_space<vmem>>, vector<8x256xf32>
    %cst_209 = arith.constant dense<0.000000e+00> : vector<16x256xf32>
    %402 = tpu.matmul %400, %401, %cst_209 {dimension_numbers = #tpu.dot_dimension_numbers<[1], [0], [0], [1], [0, 0, 1, 1], [], []>} : vector<16x8xf32>, vector<8x256xf32>, vector<16x256xf32> -> vector<16x256xf32>
    %403 = arith.mulf %402, %381 : vector<16x256xf32>
    %c0_210 = arith.constant 0 : index
    %c0_211 = arith.constant 0 : index
    %404 = vector.load %arg4[%c0_210, %c0_211] : memref<256x32xf32, #tpu.memory_space<vmem>>, vector<256x32xf32>
    %cst_212 = arith.constant dense<0.000000e+00> : vector<16x32xf32>
    %405 = tpu.matmul %403, %404, %cst_212 {dimension_numbers = #tpu.dot_dimension_numbers<[1], [0], [0], [1], [0, 0, 1, 1], [], []>} : vector<16x256xf32>, vector<256x32xf32>, vector<16x32xf32> -> vector<16x32xf32>
    %c0_213 = arith.constant 0 : index
    %c0_214 = arith.constant 0 : index
    %406 = vector.load %arg5[%c0_213, %c0_214] : memref<65x128xf32, #tpu.memory_space<vmem>>, vector<32x128xf32>
    %cst_215 = arith.constant dense<0.000000e+00> : vector<16x128xf32>
    %407 = tpu.matmul %380, %406, %cst_215 {dimension_numbers = #tpu.dot_dimension_numbers<[1], [0], [0], [1], [0, 0, 1, 1], [], []>} : vector<16x32xf32>, vector<32x128xf32>, vector<16x128xf32> -> vector<16x128xf32>
    %c32_216 = arith.constant 32 : index
    %c0_217 = arith.constant 0 : index
    %408 = vector.load %arg5[%c32_216, %c0_217] : memref<65x128xf32, #tpu.memory_space<vmem>>, vector<32x128xf32>
    %cst_218 = arith.constant dense<0.000000e+00> : vector<16x128xf32>
    %409 = tpu.matmul %405, %408, %cst_218 {dimension_numbers = #tpu.dot_dimension_numbers<[1], [0], [0], [1], [0, 0, 1, 1], [], []>} : vector<16x32xf32>, vector<32x128xf32>, vector<16x128xf32> -> vector<16x128xf32>
    %410 = arith.addf %407, %409 : vector<16x128xf32>
    %411 = arith.index_cast %c6_i32 : i32 to index
    %c0_219 = arith.constant 0 : index
    %c0_220 = arith.constant 0 : index
    %412 = vector.load %arg2[%411, %c0_219, %c0_220] : memref<8x16x128xf32, #tpu.memory_space<vmem>>, vector<1x16x128xf32>
    %413 = vector.shape_cast %412 : vector<1x16x128xf32> to vector<16x128xf32>
    %414 = arith.addf %410, %413 : vector<16x128xf32>
    %c64_221 = arith.constant 64 : index
    %c0_222 = arith.constant 0 : index
    %415 = vector.load %arg5[%c64_221, %c0_222] : memref<65x128xf32, #tpu.memory_space<vmem>>, vector<1x128xf32>
    %416 = vector.broadcast %415 : vector<1x128xf32> to vector<16x128xf32>
    %417 = arith.addf %414, %416 : vector<16x128xf32>
    %418 = vector.extract_strided_slice %417 {offsets = [0, 0], sizes = [16, 32], strides = [1, 1]} : vector<16x128xf32> to vector<16x32xf32>
    %419 = arith.negf %418 : vector<16x32xf32>
    %420 = math.exp %419 : vector<16x32xf32>
    %cst_223 = arith.constant 1.000000e+00 : f32
    %421 = vector.broadcast %cst_223 : f32 to vector<16x32xf32>
    %422 = arith.addf %421, %420 : vector<16x32xf32>
    %423 = arith.divf %421, %422 : vector<16x32xf32>
    %424 = vector.extract_strided_slice %417 {offsets = [0, 32], sizes = [16, 32], strides = [1, 1]} : vector<16x128xf32> to vector<16x32xf32>
    %425 = arith.negf %424 : vector<16x32xf32>
    %426 = math.exp %425 : vector<16x32xf32>
    %cst_224 = arith.constant 1.000000e+00 : f32
    %427 = vector.broadcast %cst_224 : f32 to vector<16x32xf32>
    %428 = arith.addf %427, %426 : vector<16x32xf32>
    %429 = arith.divf %427, %428 : vector<16x32xf32>
    %430 = vector.extract_strided_slice %417 {offsets = [0, 64], sizes = [16, 32], strides = [1, 1]} : vector<16x128xf32> to vector<16x32xf32>
    %431 = math.tanh %430 : vector<16x32xf32>
    %432 = vector.extract_strided_slice %417 {offsets = [0, 96], sizes = [16, 32], strides = [1, 1]} : vector<16x128xf32> to vector<16x32xf32>
    %433 = arith.negf %432 : vector<16x32xf32>
    %434 = math.exp %433 : vector<16x32xf32>
    %cst_225 = arith.constant 1.000000e+00 : f32
    %435 = vector.broadcast %cst_225 : f32 to vector<16x32xf32>
    %436 = arith.addf %435, %434 : vector<16x32xf32>
    %437 = arith.divf %435, %436 : vector<16x32xf32>
    %438 = arith.mulf %429, %378 : vector<16x32xf32>
    %439 = arith.mulf %423, %431 : vector<16x32xf32>
    %440 = arith.addf %438, %439 : vector<16x32xf32>
    %441 = math.tanh %440 : vector<16x32xf32>
    %442 = arith.mulf %437, %441 : vector<16x32xf32>
    %c7_i32 = arith.constant 7 : i32
    %c0_226 = arith.constant 0 : index
    %c0_227 = arith.constant 0 : index
    %443 = vector.load %arg1[%c0_226, %c0_227] : memref<16x256xf32, #tpu.memory_space<vmem>>, vector<16x256xf32>
    %c256_228 = arith.constant 256 : index
    %c0_229 = arith.constant 0 : index
    %444 = vector.load %arg3[%c256_228, %c0_229] : memref<329x256xf32, #tpu.memory_space<vmem>>, vector<32x256xf32>
    %cst_230 = arith.constant dense<0.000000e+00> : vector<16x256xf32>
    %445 = tpu.matmul %442, %444, %cst_230 {dimension_numbers = #tpu.dot_dimension_numbers<[1], [0], [0], [1], [0, 0, 1, 1], [], []>} : vector<16x32xf32>, vector<32x256xf32>, vector<16x256xf32> -> vector<16x256xf32>
    %c288_231 = arith.constant 288 : index
    %c0_232 = arith.constant 0 : index
    %446 = vector.load %arg3[%c288_231, %c0_232] : memref<329x256xf32, #tpu.memory_space<vmem>>, vector<32x256xf32>
    %cst_233 = arith.constant dense<0.000000e+00> : vector<16x256xf32>
    %447 = tpu.matmul %440, %446, %cst_233 {dimension_numbers = #tpu.dot_dimension_numbers<[1], [0], [0], [1], [0, 0, 1, 1], [], []>} : vector<16x32xf32>, vector<32x256xf32>, vector<16x256xf32> -> vector<16x256xf32>
    %448 = arith.addf %445, %447 : vector<16x256xf32>
    %449 = arith.addf %5, %448 : vector<16x256xf32>
    %450 = math.tanh %449 : vector<16x256xf32>
    %c0_234 = arith.constant 0 : index
    %c0_235 = arith.constant 0 : index
    %451 = vector.load %arg6[%c0_234, %c0_235] : memref<321x8xf32, #tpu.memory_space<vmem>>, vector<256x8xf32>
    %cst_236 = arith.constant dense<0.000000e+00> : vector<16x8xf32>
    %452 = tpu.matmul %450, %451, %cst_236 {dimension_numbers = #tpu.dot_dimension_numbers<[1], [0], [0], [1], [0, 0, 1, 1], [], []>} : vector<16x256xf32>, vector<256x8xf32>, vector<16x8xf32> -> vector<16x8xf32>
    %cst_237 = arith.constant dense<0xFF800000> : vector<16xf32>
    %453 = vector.multi_reduction <maximumf>, %452, %cst_237 [1] : vector<16x8xf32> to vector<16xf32>
    %454 = vector.shape_cast %453 : vector<16xf32> to vector<16x1xf32>
    %455 = vector.broadcast %454 : vector<16x1xf32> to vector<16x8xf32>
    %456 = arith.subf %452, %455 : vector<16x8xf32>
    %457 = math.exp %456 : vector<16x8xf32>
    %cst_238 = arith.constant dense<0.000000e+00> : vector<16xf32>
    %458 = vector.multi_reduction <add>, %457, %cst_238 [1] : vector<16x8xf32> to vector<16xf32>
    %459 = vector.shape_cast %458 : vector<16xf32> to vector<16x1xf32>
    %460 = tpu.reciprocal %459 {approx = true} : vector<16x1xf32> -> vector<16x1xf32>
    %461 = vector.broadcast %460 : vector<16x1xf32> to vector<16x8xf32>
    %462 = arith.mulf %457, %461 : vector<16x8xf32>
    %c320_239 = arith.constant 320 : index
    %c0_240 = arith.constant 0 : index
    %463 = vector.load %arg3[%c320_239, %c0_240] : memref<329x256xf32, #tpu.memory_space<vmem>>, vector<8x256xf32>
    %cst_241 = arith.constant dense<0.000000e+00> : vector<16x256xf32>
    %464 = tpu.matmul %462, %463, %cst_241 {dimension_numbers = #tpu.dot_dimension_numbers<[1], [0], [0], [1], [0, 0, 1, 1], [], []>} : vector<16x8xf32>, vector<8x256xf32>, vector<16x256xf32> -> vector<16x256xf32>
    %465 = arith.mulf %464, %443 : vector<16x256xf32>
    %c0_242 = arith.constant 0 : index
    %c0_243 = arith.constant 0 : index
    %466 = vector.load %arg4[%c0_242, %c0_243] : memref<256x32xf32, #tpu.memory_space<vmem>>, vector<256x32xf32>
    %cst_244 = arith.constant dense<0.000000e+00> : vector<16x32xf32>
    %467 = tpu.matmul %465, %466, %cst_244 {dimension_numbers = #tpu.dot_dimension_numbers<[1], [0], [0], [1], [0, 0, 1, 1], [], []>} : vector<16x256xf32>, vector<256x32xf32>, vector<16x32xf32> -> vector<16x32xf32>
    %c0_245 = arith.constant 0 : index
    %c0_246 = arith.constant 0 : index
    %468 = vector.load %arg5[%c0_245, %c0_246] : memref<65x128xf32, #tpu.memory_space<vmem>>, vector<32x128xf32>
    %cst_247 = arith.constant dense<0.000000e+00> : vector<16x128xf32>
    %469 = tpu.matmul %442, %468, %cst_247 {dimension_numbers = #tpu.dot_dimension_numbers<[1], [0], [0], [1], [0, 0, 1, 1], [], []>} : vector<16x32xf32>, vector<32x128xf32>, vector<16x128xf32> -> vector<16x128xf32>
    %c32_248 = arith.constant 32 : index
    %c0_249 = arith.constant 0 : index
    %470 = vector.load %arg5[%c32_248, %c0_249] : memref<65x128xf32, #tpu.memory_space<vmem>>, vector<32x128xf32>
    %cst_250 = arith.constant dense<0.000000e+00> : vector<16x128xf32>
    %471 = tpu.matmul %467, %470, %cst_250 {dimension_numbers = #tpu.dot_dimension_numbers<[1], [0], [0], [1], [0, 0, 1, 1], [], []>} : vector<16x32xf32>, vector<32x128xf32>, vector<16x128xf32> -> vector<16x128xf32>
    %472 = arith.addf %469, %471 : vector<16x128xf32>
    %473 = arith.index_cast %c7_i32 : i32 to index
    %c0_251 = arith.constant 0 : index
    %c0_252 = arith.constant 0 : index
    %474 = vector.load %arg2[%473, %c0_251, %c0_252] : memref<8x16x128xf32, #tpu.memory_space<vmem>>, vector<1x16x128xf32>
    %475 = vector.shape_cast %474 : vector<1x16x128xf32> to vector<16x128xf32>
    %476 = arith.addf %472, %475 : vector<16x128xf32>
    %c64_253 = arith.constant 64 : index
    %c0_254 = arith.constant 0 : index
    %477 = vector.load %arg5[%c64_253, %c0_254] : memref<65x128xf32, #tpu.memory_space<vmem>>, vector<1x128xf32>
    %478 = vector.broadcast %477 : vector<1x128xf32> to vector<16x128xf32>
    %479 = arith.addf %476, %478 : vector<16x128xf32>
    %480 = vector.extract_strided_slice %479 {offsets = [0, 0], sizes = [16, 32], strides = [1, 1]} : vector<16x128xf32> to vector<16x32xf32>
    %481 = arith.negf %480 : vector<16x32xf32>
    %482 = math.exp %481 : vector<16x32xf32>
    %cst_255 = arith.constant 1.000000e+00 : f32
    %483 = vector.broadcast %cst_255 : f32 to vector<16x32xf32>
    %484 = arith.addf %483, %482 : vector<16x32xf32>
    %485 = arith.divf %483, %484 : vector<16x32xf32>
    %486 = vector.extract_strided_slice %479 {offsets = [0, 32], sizes = [16, 32], strides = [1, 1]} : vector<16x128xf32> to vector<16x32xf32>
    %487 = arith.negf %486 : vector<16x32xf32>
    %488 = math.exp %487 : vector<16x32xf32>
    %cst_256 = arith.constant 1.000000e+00 : f32
    %489 = vector.broadcast %cst_256 : f32 to vector<16x32xf32>
    %490 = arith.addf %489, %488 : vector<16x32xf32>
    %491 = arith.divf %489, %490 : vector<16x32xf32>
    %492 = vector.extract_strided_slice %479 {offsets = [0, 64], sizes = [16, 32], strides = [1, 1]} : vector<16x128xf32> to vector<16x32xf32>
    %493 = math.tanh %492 : vector<16x32xf32>
    %494 = vector.extract_strided_slice %479 {offsets = [0, 96], sizes = [16, 32], strides = [1, 1]} : vector<16x128xf32> to vector<16x32xf32>
    %495 = arith.negf %494 : vector<16x32xf32>
    %496 = math.exp %495 : vector<16x32xf32>
    %cst_257 = arith.constant 1.000000e+00 : f32
    %497 = vector.broadcast %cst_257 : f32 to vector<16x32xf32>
    %498 = arith.addf %497, %496 : vector<16x32xf32>
    %499 = arith.divf %497, %498 : vector<16x32xf32>
    %500 = arith.mulf %491, %440 : vector<16x32xf32>
    %501 = arith.mulf %485, %493 : vector<16x32xf32>
    %502 = arith.addf %500, %501 : vector<16x32xf32>
    %503 = math.tanh %502 : vector<16x32xf32>
    %504 = arith.mulf %499, %503 : vector<16x32xf32>
    %c8_i32 = arith.constant 8 : i32
    %c256_258 = arith.constant 256 : index
    %c0_259 = arith.constant 0 : index
    %505 = vector.load %arg6[%c256_258, %c0_259] : memref<321x8xf32, #tpu.memory_space<vmem>>, vector<32x8xf32>
    %cst_260 = arith.constant dense<0.000000e+00> : vector<16x8xf32>
    %506 = tpu.matmul %504, %505, %cst_260 {dimension_numbers = #tpu.dot_dimension_numbers<[1], [0], [0], [1], [0, 0, 1, 1], [], []>} : vector<16x32xf32>, vector<32x8xf32>, vector<16x8xf32> -> vector<16x8xf32>
    %c288_261 = arith.constant 288 : index
    %c0_262 = arith.constant 0 : index
    %507 = vector.load %arg6[%c288_261, %c0_262] : memref<321x8xf32, #tpu.memory_space<vmem>>, vector<32x8xf32>
    %cst_263 = arith.constant dense<0.000000e+00> : vector<16x8xf32>
    %508 = tpu.matmul %467, %507, %cst_263 {dimension_numbers = #tpu.dot_dimension_numbers<[1], [0], [0], [1], [0, 0, 1, 1], [], []>} : vector<16x32xf32>, vector<32x8xf32>, vector<16x8xf32> -> vector<16x8xf32>
    %509 = arith.addf %506, %508 : vector<16x8xf32>
    %c320_264 = arith.constant 320 : index
    %c0_265 = arith.constant 0 : index
    %510 = vector.load %arg6[%c320_264, %c0_265] : memref<321x8xf32, #tpu.memory_space<vmem>>, vector<1x8xf32>
    %511 = vector.broadcast %510 : vector<1x8xf32> to vector<16x8xf32>
    %512 = arith.addf %509, %511 : vector<16x8xf32>
    %c0_266 = arith.constant 0 : index
    %c0_267 = arith.constant 0 : index
    %513 = vector.load %arg7[%c0_266, %c0_267] : memref<16x8xf32, #tpu.memory_space<vmem>>, vector<16x8xf32>
    tpu.vector_store %arg7[%c0_266, %c0_267], %512 {strides = array<i32>} : memref<16x8xf32, #tpu.memory_space<vmem>>, vector<16x8xf32>,
    return
  }
  func.func @transform_0(%arg0: i32) -> (i32, i32) {
    %c0_i32 = arith.constant 0 : i32
    %c0_i32_0 = arith.constant 0 : i32
    return %arg0, %c0_i32 : i32, i32
  }
  func.func @transform_1(%arg0: i32) -> (i32, i32, i32) {
    %c0_i32 = arith.constant 0 : i32
    %c0_i32_0 = arith.constant 0 : i32
    %c0_i32_1 = arith.constant 0 : i32
    return %c0_i32, %arg0, %c0_i32_0 : i32, i32, i32
  }
  func.func @transform_2(%arg0: i32) -> (i32, i32) {
    %c0_i32 = arith.constant 0 : i32
    %c0_i32_0 = arith.constant 0 : i32
    %c0_i32_1 = arith.constant 0 : i32
    return %c0_i32, %c0_i32_0 : i32, i32
  }
  func.func @transform_3(%arg0: i32) -> (i32, i32) {
    %c0_i32 = arith.constant 0 : i32
    %c0_i32_0 = arith.constant 0 : i32
    %c0_i32_1 = arith.constant 0 : i32
    return %c0_i32, %c0_i32_0 : i32, i32
  }
  func.func @transform_4(%arg0: i32) -> (i32, i32) {
    %c0_i32 = arith.constant 0 : i32
    %c0_i32_0 = arith.constant 0 : i32
    %c0_i32_1 = arith.constant 0 : i32
    return %c0_i32, %c0_i32_0 : i32, i32
  }
  func.func @transform_5(%arg0: i32) -> (i32, i32) {
    %c0_i32 = arith.constant 0 : i32
    %c0_i32_0 = arith.constant 0 : i32
    %c0_i32_1 = arith.constant 0 : i32
    return %c0_i32, %c0_i32_0 : i32, i32
  }
  func.func @transform_6(%arg0: i32) -> (i32, i32) {
    %c0_i32 = arith.constant 0 : i32
    %c0_i32_0 = arith.constant 0 : i32
    return %arg0, %c0_i32 : i32, i32
  }
}

</mosaic_0001>

<bundles_post_ra>
// kernel: tpu_custom_call.1
= control target key start
LH: loop header
LB: loop body
LE: loop exit
PB: predicated region body
PF: predicated region fallthrough
CT: control target
= control target key end

     0   :  { %11 = vsyncpa [#allocation3], 0  ;;  %s9524_s0 = inlined_call_operand.hbm [shape: f32[16,256], index: 0, kind: input, shape index: {}]   ;;  %s9525_s1 = inlined_call_operand.hbm [shape: f32[8,16,128], index: 1, kind: input, shape index: {}]   ;;  %s9526_s2 = inlined_call_operand.vmem [shape: f32[329,256], index: 2, kind: input, shape index: {}]   ;;  %s9527_s3 = inlined_call_operand.vmem [shape: f32[256,32], index: 3, kind: input, shape index: {}]   ;;  %s9528_s4 = inlined_call_operand.hbm [shape: f32[65,128], index: 4, kind: input, shape index: {}]   ;;  %s9529_s5 = inlined_call_operand.vmem [shape: f32[321,8], index: 5, kind: input, shape index: {}]   ;;  %s9530_s6 = inlined_call_operand.vmem [shape: f32[16,8], index: 6, kind: output, shape index: {}]  }
   0x1   :  { %12 = vsyncpa [#allocation5], 0  ;;  %s7960_s21 = smov [#allocation4]   ;;  %s7890_s25 = scalar_lea.hbm %s9525_s1, 2048 }
   0x2   :  { %s30_s22 = sshll.u32 %s7960_s21, 4  ;;  %p7891_p0 = scmp.ne.s32.totalorder %s9525_s1, %s7890_s25  ;;  %s31_s22 = int_to_ptr.vmem [resolvable:$true] %s30_s22 }
   0x3   :  { %p7894_p1 = scmp.lt.u32.totalorder %s7890_s25, %s9525_s1 }
   0x5   :  { %p7896_p2 = pnand %p7894_p1, %p7891_p0 }
   0x7   :  { %7899 = shalt.err (!%p7896_p2)
}
   0x8   :  { %s7900_s30 = scalar_lea.vmem %s31_s22, 2048  ;;  %p7905_p4 = scmp.lt.s32.totalorder %s31_s22, %s31_s22 }
   0x9   :  { %p7901_p3 = scmp.ne.s32.totalorder %s31_s22, %s7900_s30  ;;  %p7906_p5 = scmp.lt.s32.totalorder %s7900_s30, %s7900_s30 }
   0xb   :  { %p7907_p6 = por %p7906_p5, %p7905_p4 }
   0xd   :  { %p7908_p7 = pnand %p7907_p6, %p7901_p3 }
   0xf   :  { %7911 = shalt.err (!%p7908_p7)
}
  0x10   :  { %s7961_s7 = smov 128   ;;  %s7962_s8 = smov 8  }
  0x11   :  { %36 = dma.hbm_to_vmem [thread:$0]  %s9525_s1, 2048, %s31_s22, [#allocation5], %s7961_s7, %s7961_s7, %s7962_s8  }
  0x12   :  { %s7963_s11 = smov [#allocation2]   ;;  %s7912_s15 = scalar_lea.hbm %s9524_s0, 512 }
  0x13   :  { %s18_s12 = sshll.u32 %s7963_s11, 4  ;;  %p7913_p8 = scmp.ne.s32.totalorder %s9524_s0, %s7912_s15  ;;  %s19_s12 = int_to_ptr.vmem [resolvable:$true] %s18_s12 }
  0x14   :  { %p7916_p9 = scmp.lt.u32.totalorder %s7912_s15, %s9524_s0 }
  0x16   :  { %p7918_p10 = pnand %p7916_p9, %p7913_p8 }
  0x18   :  { %7921 = shalt.err (!%p7918_p10)
}
  0x19   :  { %s7922_s20 = scalar_lea.vmem %s19_s12, 512  ;;  %p7927_p12 = scmp.lt.s32.totalorder %s19_s12, %s19_s12 }
  0x1a   :  { %p7923_p11 = scmp.ne.s32.totalorder %s19_s12, %s7922_s20  ;;  %p7928_p13 = scmp.lt.s32.totalorder %s7922_s20, %s7922_s20 }
  0x1c   :  { %p7929_p0 = por %p7928_p13, %p7927_p12 }
  0x1e   :  { %p7930_p1 = pnand %p7929_p0, %p7923_p11 }
  0x20   :  { %7933 = shalt.err (!%p7930_p1)
}
  0x21   :  { %s7964_s1 = smov 256   ;;  %s7965_s21 = smov 16  }
  0x22   :  { %24 = dma.hbm_to_vmem [thread:$0]  %s9524_s0, 512, %s19_s12, [#allocation3], %s7964_s1, %s7964_s1, %s7965_s21  }
  0x23   :  { %s7966_s24 = smov [#allocation6]   ;;  %s7934_s28 = scalar_lea.hbm %s9528_s4, 1152 }
  0x24   :  { %s46_s25 = sshll.u32 %s7966_s24, 4  ;;  %p7935_p2 = scmp.ne.s32.totalorder %s9528_s4, %s7934_s28  ;;  %s47_s25 = int_to_ptr.vmem [resolvable:$true] %s46_s25 }
  0x25   :  { %p7938_p3 = scmp.lt.u32.totalorder %s7934_s28, %s9528_s4 }
  0x27   :  { %p7940_p4 = pnand %p7938_p3, %p7935_p2 }
  0x29   :  { %7943 = shalt.err (!%p7940_p4)
}
  0x2a   :  { %s7944_s11 = scalar_lea.vmem %s47_s25, 1152  ;;  %p7949_p6 = scmp.lt.s32.totalorder %s47_s25, %s47_s25 }
  0x2b   :  { %p7945_p5 = scmp.ne.s32.totalorder %s47_s25, %s7944_s11  ;;  %p7950_p7 = scmp.lt.s32.totalorder %s7944_s11, %s7944_s11 }
  0x2d   :  { %p7951_p8 = por %p7950_p7, %p7949_p6 }
  0x2f   :  { %p7952_p9 = pnand %p7951_p8, %p7945_p5 }
  0x31   :  { %7955 = shalt.err (!%p7952_p9)
}
  0x32   :  { %52 = dma.hbm_to_vmem [thread:$0]  %s9528_s4, 1152, %s47_s25, [#allocation5], %s7961_s7, %s7961_s7, %s7962_s8  }
  0x33   :  { %7956 = dma.done.wait [#allocation3], 512  }
  0x34   :  { %7957 = vsyncadd [#allocation3], 4294966784 }
  0x35   :  { %7958 = dma.done.wait [#allocation5], 3200  }
  0x36   :  { %7959 = vsyncadd [#allocation5], 4294964096  ;;  %v9531_v0 = vmov 0.0   ;;  %v69_v1 = vld [vmem:[%s9526_s2 + $0x8] sm:$0xff]  ;;  %v71_v2 = vld [vmem:[%s9526_s2 + $0x18] sm:$0xff]  ;;  %vm511_vm0 = vcmask 64512  }
  0x37   :  { %306 = vmatprep.mubr.f32.mxu1 %v9531_v0  ;;  %v68_v3 = vld [vmem:[%s9526_s2] sm:$0xff]  ;;  %v6711_v4 = vpack.c.bf16 %v71_v2, %v69_v1  ;;  %v70_v5 = vld [vmem:[%s9526_s2 + $0x10] sm:$0xff]  ;;  %v73_v6 = vld [vmem:[%s9526_s2 + $0x28] sm:$0xff]  ;;  %vm238_vm1 = vcmask 261120   ;;  %s7969_s11 = smov 32   ;;  %s7970_s0 = smov 96  }
  0x38   :  { %v75_v7 = vld [vmem:[%s9526_s2 + $0x38] sm:$0xff]  ;;  %v6713_v8 = vpack.c.bf16 %v70_v5, %v68_v3  ;;  %v72_v10 = vld [vmem:[%s9526_s2 + $0x20] sm:$0xff]  ;;  %v74_v11 = vld [vmem:[%s9526_s2 + $0x30] sm:$0xff] }
  0x39   :  { %v6715_v9 = vpack.c.bf16 %v75_v7, %v73_v6  ;;  %v77_v12 = vld [vmem:[%s9526_s2 + $0x48] sm:$0xff]  ;;  %6712 = vmatprep.subr.bf16.mxu0 %v6711_v4  ;;  %v79_v13 = vld [vmem:[%s9526_s2 + $0x58] sm:$0xff]  ;;  %v6717_v14 = vpack.c.bf16 %v74_v11, %v72_v10  ;;  %v76_v16 = vld [vmem:[%s9526_s2 + $0x40] sm:$0xff] }
  0x3a   :  { %6714 = vmatpush1.bf16.msra.mxu0 %v6713_v8  ;;  %v6719_v15 = vpack.c.bf16 %v79_v13, %v77_v12  ;;  %v78_v17 = vld [vmem:[%s9526_s2 + $0x50] sm:$0xff]  ;;  %v81_v18 = vld [vmem:[%s9526_s2 + $0x68] sm:$0xff]  ;;  %v83_v19 = vld [vmem:[%s9526_s2 + $0x78] sm:$0xff] }
  0x3b   :  { %6716 = vmatprep.subr.bf16.mxu0 %v6715_v9  ;;  %v6721_v20 = vpack.c.bf16 %v78_v17, %v76_v16  ;;  %v6723_v21 = vpack.c.bf16 %v83_v19, %v81_v18  ;;  %v80_v22 = vld [vmem:[%s9526_s2 + $0x60] sm:$0xff]  ;;  %v82_v23 = vld [vmem:[%s9526_s2 + $0x70] sm:$0xff]  ;;  %v85_v24 = vld [vmem:[%s9526_s2 + $0x88] sm:$0xff] }
  0x3c   :  { %v87_v25 = vld [vmem:[%s9526_s2 + $0x98] sm:$0xff]  ;;  %v6725_v26 = vpack.c.bf16 %v82_v23, %v80_v22  ;;  %v84_v28 = vld [vmem:[%s9526_s2 + $0x80] sm:$0xff]  ;;  %v86_v29 = vld [vmem:[%s9526_s2 + $0x90] sm:$0xff] }
  0x3d   :  { %v6727_v27 = vpack.c.bf16 %v87_v25, %v85_v24  ;;  %v89_v30 = vld [vmem:[%s9526_s2 + $0xa8] sm:$0xff]  ;;  %v91_v31 = vld [vmem:[%s9526_s2 + $0xb8] sm:$0xff]  ;;  %v230_v34 = vld [vmem:[%s9526_s2 + $0x240] sm:$0xff]  ;;  %v6729_v36 = vpack.c.bf16 %v86_v29, %v84_v28 }
  0x3e   :  { %6718 = vmatpush1.bf16.msra.mxu0 %v6717_v14  ;;  %v231_v32 = vld [vmem:[%s9526_s2 + $0x248] sm:$0xff]  ;;  %v233_v33 = vld [vmem:[%s9526_s2 + $0x258] sm:$0xff]  ;;  %v232_v35 = vld [vmem:[%s9526_s2 + $0x250] sm:$0xff]  ;;  %v6731_v41 = vpack.c.bf16 %v91_v31, %v89_v30 }
  0x3f   :  { %6720 = vmatprep.subr.bf16.mxu0 %v6719_v15  ;;  %v88_v37 = vld [vmem:[%s9526_s2 + $0xa0] sm:$0xff]  ;;  %v90_v38 = vld [vmem:[%s9526_s2 + $0xb0] sm:$0xff]  ;;  %v8133_v39 = vpack.c.bf16 %v233_v33, %v231_v32  ;;  %v8135_v40 = vpack.c.bf16 %v232_v35, %v230_v34  ;;  %v93_v42 = vld [vmem:[%s9526_s2 + $0xc8] sm:$0xff] }
  0x40   :  { %v235_v43 = vld [vmem:[%s9526_s2 + $0x268] sm:$0xff]  ;;  %v237_v44 = vld [vmem:[%s9526_s2 + $0x278] sm:$0xff]  ;;  %v234_v47 = vld [vmem:[%s9526_s2 + $0x260] sm:$0xff]  ;;  %v6733_v50 = vpack.c.bf16 %v90_v38, %v88_v37 }
  0x41   :  { %v95_v45 = vld [vmem:[%s9526_s2 + $0xd8] sm:$0xff]  ;;  %6776 = vmatprep.subr.bf16.mxu1 %v8133_v39  ;;  %v8150_v46 = vpack.c.bf16 %v237_v44, %v235_v43  ;;  %v236_v48 = vld [vmem:[%s9526_s2 + $0x270] sm:$0xff]  ;;  %v223_v51 = vld [vmem:[%s9526_s2 + $0x208] sm:$0xff] }
  0x42   :  { %6722 = vmatpush1.bf16.msra.mxu0 %v6721_v20  ;;  %6778 = vmatpush1.bf16.msra.mxu1 %v8135_v40  ;;  %v8159_v49 = vpack.c.bf16 %v236_v48, %v234_v47  ;;  %v225_v52 = vld [vmem:[%s9526_s2 + $0x218] sm:$0xff]  ;;  %v222_v53 = vld [vmem:[%s9526_s2 + $0x200] sm:$0xff]  ;;  %v6735_v54 = vpack.c.bf16 %v95_v45, %v93_v42  ;;  %v94_v56 = vld [vmem:[%s9526_s2 + $0xd0] sm:$0xff] }
  0x43   :  { %6724 = vmatprep.subr.bf16.mxu0 %v6723_v21  ;;  %6780 = vmatprep.subr.bf16.mxu1 %v8150_v46  ;;  %v92_v55 = vld [vmem:[%s9526_s2 + $0xc0] sm:$0xff]  ;;  %v8177_v57 = vpack.c.bf16 %v225_v52, %v223_v51  ;;  %v224_v58 = vld [vmem:[%s9526_s2 + $0x210] sm:$0xff]  ;;  %v97_v59 = vld [vmem:[%s9526_s2 + $0xe8] sm:$0xff] }
  0x44   :  { %9585 = vst [vmem:[#allocation9_spill] sm:$0xff] %v8159_v49  ;;  %v99_v60 = vld [vmem:[%s9526_s2 + $0xf8] sm:$0xff]  ;;  %v227_v61 = vld [vmem:[%s9526_s2 + $0x228] sm:$0xff]  ;;  %v8192_v62 = vpack.c.bf16 %v224_v58, %v222_v53  ;;  %v6737_v1 = vpack.c.bf16 %v94_v56, %v92_v55  ;;  %v226_v3 = vld [vmem:[%s9526_s2 + $0x220] sm:$0xff] }
  0x45   :  { %9586 = vst [vmem:[#allocation10_spill] sm:$0xff] %v8177_v57  ;;  %v229_v63 = vld [vmem:[%s9526_s2 + $0x238] sm:$0xff]  ;;  %v228_v4 = vld [vmem:[%s9526_s2 + $0x230] sm:$0xff]  ;;  %v6739_v5 = vpack.c.bf16 %v99_v60, %v97_v59  ;;  %v96_v6 = vld [vmem:[%s9526_s2 + $0xe0] sm:$0xff] }
  0x46   :  { %6726 = vmatpush1.bf16.msra.mxu0 %v6725_v26  ;;  %6782 = vmatpush1.bf16.msra.mxu1 %v8159_v49  ;;  %v8198_v2 = vpack.c.bf16 %v229_v63, %v227_v61  ;;  %v98_v7 = vld [vmem:[%s9526_s2 + $0xf0] sm:$0xff]  ;;  %v101_v8 = vld [vmem:[%s9526_s2 + $0x108] sm:$0xff]  ;;  %v103_v9 = vld [vmem:[%s9526_s2 + $0x118] sm:$0xff]  ;;  %v8229_v13 = vpack.c.bf16 %v228_v4, %v226_v3 }
  0x47   :  { %6728 = vmatprep.subr.bf16.mxu0 %v6727_v27  ;;  %6784 = vmatprep.subr.bf16.mxu1 %v8177_v57  ;;  %v8219_v10 = vld [vmem:[#allocation2 + $0x8] sm:$0xff]  ;;  %v100_v11 = vld [vmem:[%s9526_s2 + $0x100] sm:$0xff]  ;;  %v102_v12 = vld [vmem:[%s9526_s2 + $0x110] sm:$0xff]  ;;  %v6741_v14 = vpack.c.bf16 %v98_v7, %v96_v6  ;;  %v6743_v18 = vpack.c.bf16 %v103_v9, %v101_v8 }
  0x48   :  { %9587 = vst [vmem:[#allocation11_spill] sm:$0xff] %v8198_v2  ;;  %9588 = vst [vmem:[#allocation12_spill] sm:$0xff] %v8229_v13  ;;  %v420_v15 = vld [vmem:[%s9529_s5 + $0x80] sm:$0xff]  ;;  %v421_v16 = vld [vmem:[%s9529_s5 + $0x88] sm:$0xff]  ;;  %209 = vmatprep.mubr.f32.mxu0 %v8219_v10  ;;  %v6745_v26 = vpack.c.bf16 %v102_v12, %v100_v11 }
  0x49   :  { %307 = vmatmul.mubr.f32.vlgmr.msra.gmra.mrb[0].mxu1 %v9531_v0  ;;  %v404_v17 = vld [vmem:[%s9529_s5] sm:$0xff]  ;;  %v8242_v19 = vpack.c.bf16 %v421_v16, %v420_v15  ;;  %v405_v20 = vld [vmem:[%s9529_s5 + $0x8] sm:$0xff]  ;;  %v422_v21 = vld [vmem:[%s9529_s5 + $0x90] sm:$0xff] }
  0x4a   :  { %6730 = vmatpush1.bf16.msra.mxu0 %v6729_v36  ;;  %6786 = vmatpush1.bf16.msra.mxu1 %v8192_v62  ;;  %v423_v22 = vld [vmem:[%s9529_s5 + $0x98] sm:$0xff]  ;;  %v105_v23 = vld [vmem:[%s9526_s2 + $0x128] sm:$0xff]  ;;  %v8262_v25 = vpack.c.bf16 %v405_v20, %v404_v17  ;;  %v406_v28 = vld [vmem:[%s9529_s5 + $0x10] sm:$0xff] }
  0x4b   :  { %6732 = vmatprep.subr.bf16.mxu0 %v6731_v41  ;;  %312 = vmatprep.mubr.f32.mxu1 %v9531_v0  ;;  %v107_v24 = vld [vmem:[%s9526_s2 + $0x138] sm:$0xff]  ;;  %v8265_v27 = vpack.c.bf16 %v423_v22, %v422_v21  ;;  %v104_v31 = vld [vmem:[%s9526_s2 + $0x120] sm:$0xff]  ;;  %v106_v32 = vld [vmem:[%s9526_s2 + $0x130] sm:$0xff] }
  0x4c   :  { %6788 = vmatprep.subr.bf16.mxu1 %v8198_v2  ;;  %v407_v29 = vld [vmem:[%s9529_s5 + $0x18] sm:$0xff]  ;;  %v6747_v30 = vpack.c.bf16 %v107_v24, %v105_v23  ;;  %v109_v33 = vld [vmem:[%s9526_s2 + $0x148] sm:$0xff]  ;;  %v6749_v36 = vpack.c.bf16 %v106_v32, %v104_v31  ;;  %v108_v38 = vld [vmem:[%s9526_s2 + $0x140] sm:$0xff] }
  0x4d   :  { %313 = vmatmul.mubr.f32.gmra.mrb[2].mxu1 %v9531_v0  ;;  %v111_v34 = vld [vmem:[%s9526_s2 + $0x158] sm:$0xff]  ;;  %v8288_v35 = vpack.c.bf16 %v407_v29, %v406_v28  ;;  %v110_v41 = vld [vmem:[%s9526_s2 + $0x150] sm:$0xff]  ;;  %v113_v42 = vld [vmem:[%s9526_s2 + $0x168] sm:$0xff] }
  0x4e   :  { %6734 = vmatpush1.bf16.msra.mxu0 %v6733_v50  ;;  %6790 = vmatpush1.bf16.msra.mxu1 %v8229_v13  ;;  %v6751_v37 = vpack.c.bf16 %v111_v34, %v109_v33  ;;  %v115_v43 = vld [vmem:[%s9526_s2 + $0x178] sm:$0xff]  ;;  %v6753_v44 = vpack.c.bf16 %v110_v41, %v108_v38  ;;  %v112_v47 = vld [vmem:[%s9526_s2 + $0x160] sm:$0xff]  ;;  %v114_v48 = vld [vmem:[%s9526_s2 + $0x170] sm:$0xff] }
  0x4f   :  { %6736 = vmatprep.subr.bf16.mxu0 %v6735_v54  ;;  %383 = vmatprep.mubr.f32.mxu1 %v9531_v0  ;;  %v6755_v45 = vpack.c.bf16 %v115_v43, %v113_v42  ;;  %v117_v50 = vld [vmem:[%s9526_s2 + $0x188] sm:$0xff]  ;;  %v119_v51 = vld [vmem:[%s9526_s2 + $0x198] sm:$0xff]  ;;  %v6757_v52 = vpack.c.bf16 %v114_v48, %v112_v47  ;;  %v116_v54 = vld [vmem:[%s9526_s2 + $0x180] sm:$0xff] }
  0x50   :  { %6792 = vmatprep.subr.bf16.mxu1 %v8242_v19  ;;  %v6759_v53 = vpack.c.bf16 %v119_v51, %v117_v50  ;;  %v118_v55 = vld [vmem:[%s9526_s2 + $0x190] sm:$0xff]  ;;  %v121_v56 = vld [vmem:[%s9526_s2 + $0x1a8] sm:$0xff]  ;;  %v123_v58 = vld [vmem:[%s9526_s2 + $0x1b8] sm:$0xff] }
  0x51   :  { %384 = vmatmul.mubr.f32.vlgmr.msra.gmra.mrb[0].mxu1 %v9531_v0  ;;  %v6761_v59 = vpack.c.bf16 %v118_v55, %v116_v54  ;;  %v6763_v60 = vpack.c.bf16 %v123_v58, %v121_v56  ;;  %v120_v61 = vld [vmem:[%s9526_s2 + $0x1a0] sm:$0xff]  ;;  %v122_v63 = vld [vmem:[%s9526_s2 + $0x1b0] sm:$0xff]  ;;  %v127_v3 = vld [vmem:[%s9526_s2 + $0x1d8] sm:$0xff] }
  0x52   :  { %6738 = vmatpush1.bf16.msra.mxu0 %v6737_v1  ;;  %389 = vmatprep.mubr.f32.mxu1 %v9531_v0  ;;  %v125_v1 = vld [vmem:[%s9526_s2 + $0x1c8] sm:$0xff]  ;;  %v6765_v4 = vpack.c.bf16 %v122_v63, %v120_v61  ;;  %v124_v6 = vld [vmem:[%s9526_s2 + $0x1c0] sm:$0xff]  ;;  %v126_v7 = vld [vmem:[%s9526_s2 + $0x1d0] sm:$0xff] }
  0x53   :  { %6740 = vmatprep.subr.bf16.mxu0 %v6739_v5  ;;  %6794 = vmatpush3.bf16.msra.mxu1 %v8262_v25  ;;  %v6767_v5 = vpack.c.bf16 %v127_v3, %v125_v1  ;;  %v129_v8 = vld [vmem:[%s9526_s2 + $0x1e8] sm:$0xff]  ;;  %v131_v9 = vld [vmem:[%s9526_s2 + $0x1f8] sm:$0xff]  ;;  %v6769_v11 = vpack.c.bf16 %v126_v7, %v124_v6  ;;  %v130_v15 = vld [vmem:[%s9526_s2 + $0x1f0] sm:$0xff] }
  0x54   :  { %6796 = vmatprep.subr.bf16.mxu1 %v8265_v27  ;;  %v6771_v12 = vpack.c.bf16 %v131_v9, %v129_v8  ;;  %v8359_v17 = vld [vmem:[#allocation2] sm:$0xff]  ;;  %v8365_v20 = vld [vmem:[#allocation2 + $0x10] sm:$0xff]  ;;  %v425_v22 = vld [vmem:[%s9529_s5 + $0xa8] sm:$0xff]  ;;  %v135_v8 = vlaneseq }
  0x55   :  { %390 = vmatmul.mubr.f32.gmra.mrb[2].mxu1 %v9531_v0  ;;  %v424_v21 = vld [vmem:[%s9529_s5 + $0xa0] sm:$0xff]  ;;  %v426_v29 = vld [vmem:[%s9529_s5 + $0xb0] sm:$0xff]  ;;  %v411_v33 = vld [vmem:[%s9529_s5 + $0x38] sm:$0xff] }
  0x56   :  { %6742 = vmatpush1.bf16.msra.mxu0 %v6741_v14  ;;  %v128_v14 = vld [vmem:[%s9526_s2 + $0x1e0] sm:$0xff]  ;;  %v8377_v24 = vpack.c.bf16 %v425_v22, %v424_v21  ;;  %v410_v31 = vld [vmem:[%s9529_s5 + $0x30] sm:$0xff]  ;;  %v413_v42 = vld [vmem:[%s9529_s5 + $0x48] sm:$0xff]  ;;  %v136_v9 = vshrl.u32 %v135_v8, 7 }
  0x57   :  { %6744 = vmatprep.subr.bf16.mxu0 %v6743_v18  ;;  %6798 = vmatpush3.bf16.msra.mxu1 %v8288_v35  ;;  %v6773_v16 = vpack.c.bf16 %v130_v15, %v128_v14  ;;  %v8361_v18 = vld [vmem:[#allocation2 + $0x18] sm:$0xff]  ;;  %v408_v23 = vld [vmem:[%s9529_s5 + $0x20] sm:$0xff]  ;;  %v8400_v34 = vpack.c.bf16 %v411_v33, %v410_v31  ;;  %v414_v48 = vld [vmem:[%s9529_s5 + $0x50] sm:$0xff] }
  0x58   :  { %6800 = vmatprep.subr.bf16.mxu1 %v8377_v24  ;;  %v412_v41 = vld [vmem:[%s9529_s5 + $0x40] sm:$0xff]  ;;  %v415_v50 = vld [vmem:[%s9529_s5 + $0x58] sm:$0xff]  ;;  %v417_v56 = vld [vmem:[%s9529_s5 + $0x68] sm:$0xff]  ;;  %v141_v14 = vsub.s32 1, %v136_v9 }
  0x59   :  { %v8418_v43 = vpack.c.bf16 %v413_v42, %v412_v41  ;;  %v8436_v51 = vpack.c.bf16 %v415_v50, %v414_v48  ;;  %v416_v54 = vld [vmem:[%s9529_s5 + $0x60] sm:$0xff]  ;;  %v434_v58 = vld [vmem:[%s9529_s5 + $0xf0] sm:$0xff]  ;;  %v419_v1 = vld [vmem:[%s9529_s5 + $0x78] sm:$0xff] }
  0x5a   :  { %6746 = vmatpush1.bf16.msra.mxu0 %v6745_v26  ;;  %v409_v26 = vld [vmem:[%s9529_s5 + $0x28] sm:$0xff]  ;;  %v418_v63 = vld [vmem:[%s9529_s5 + $0x70] sm:$0xff] }
  0x5b   :  { %6748 = vmatprep.subr.bf16.mxu0 %v6747_v30  ;;  %v8382_v28 = vpack.c.bf16 %v409_v26, %v408_v23  ;;  %v427_v30 = vld [vmem:[%s9529_s5 + $0xb8] sm:$0xff]  ;;  %9590 = vst [vmem:[#allocation14_spill] sm:$0xff] %v8436_v51  ;;  %v8472_v3 = vpack.c.bf16 %v419_v1, %v418_v63 }
  0x5c   :  { %v8395_v32 = vpack.c.bf16 %v427_v30, %v426_v29 }
  0x5d   :  { %6802 = vmatpush3.bf16.msra.mxu1 %v8382_v28  ;;  %9594 = vst [vmem:[#allocation18_spill] sm:$0xff] %v8472_v3 }
  0x5e   :  { %6750 = vmatpush1.bf16.msra.mxu0 %v6749_v36  ;;  %6804 = vmatprep.subr.bf16.mxu1 %v8395_v32  ;;  %v428_v36 = vld [vmem:[%s9529_s5 + $0xc0] sm:$0xff] }
  0x5f   :  { %6752 = vmatprep.subr.bf16.mxu0 %v6751_v37  ;;  %v429_v37 = vld [vmem:[%s9529_s5 + $0xc8] sm:$0xff] }
  0x60   :  { %v8410_v38 = vpack.c.bf16 %v429_v37, %v428_v36 }
  0x61   :  { %6806 = vmatpush3.bf16.msra.mxu1 %v8400_v34 }
  0x62   :  { %6754 = vmatpush1.bf16.msra.mxu0 %v6753_v44  ;;  %6808 = vmatprep.subr.bf16.mxu1 %v8410_v38  ;;  %v430_v44 = vld [vmem:[%s9529_s5 + $0xd0] sm:$0xff] }
  0x63   :  { %6756 = vmatprep.subr.bf16.mxu0 %v6755_v45  ;;  %v431_v45 = vld [vmem:[%s9529_s5 + $0xd8] sm:$0xff] }
  0x64   :  { %v8428_v47 = vpack.c.bf16 %v431_v45, %v430_v44 }
  0x65   :  { %6810 = vmatpush3.bf16.msra.mxu1 %v8418_v43 }
  0x66   :  { %6758 = vmatpush1.bf16.msra.mxu0 %v6757_v52  ;;  %9589 = vst [vmem:[#allocation13_spill] sm:$0xff] %v8428_v47  ;;  %6812 = vmatprep.subr.bf16.mxu1 %v8428_v47  ;;  %v432_v52 = vld [vmem:[%s9529_s5 + $0xe0] sm:$0xff] }
  0x67   :  { %6760 = vmatprep.subr.bf16.mxu0 %v6759_v53  ;;  %v433_v53 = vld [vmem:[%s9529_s5 + $0xe8] sm:$0xff] }
  0x68   :  { %v8449_v55 = vpack.c.bf16 %v433_v53, %v432_v52 }
  0x69   :  { %6814 = vmatpush3.bf16.msra.mxu1 %v8436_v51 }
  0x6a   :  { %6762 = vmatpush1.bf16.msra.mxu0 %v6761_v59  ;;  %9591 = vst [vmem:[#allocation15_spill] sm:$0xff] %v8449_v55  ;;  %v435_v59 = vld [vmem:[%s9529_s5 + $0xf8] sm:$0xff]  ;;  %6816 = vmatprep.subr.bf16.mxu1 %v8449_v55 }
  0x6b   :  { %6764 = vmatprep.subr.bf16.mxu0 %v6763_v60  ;;  %v8460_v60 = vpack.c.bf16 %v417_v56, %v416_v54  ;;  %v8462_v61 = vpack.c.bf16 %v435_v59, %v434_v58 }
  0x6d   :  { %9592 = vst [vmem:[#allocation16_spill] sm:$0xff] %v8460_v60  ;;  %9593 = vst [vmem:[#allocation17_spill] sm:$0xff] %v8462_v61  ;;  %6818 = vmatpush3.bf16.msra.mxu1 %v8460_v60 }
  0x6e   :  { %6766 = vmatpush1.bf16.msra.mxu0 %v6765_v4  ;;  %6820 = vmatprep.subr.bf16.mxu1 %v8462_v61 }
  0x6f   :  { %6768 = vmatprep.subr.bf16.mxu0 %v6767_v5 }
  0x71   :  { %6822 = vmatpush3.bf16.msra.mxu1 %v8472_v3 }
  0x72   :  { %6770 = vmatpush1.bf16.msra.mxu0 %v6769_v11  ;;  %v137_v11 = vsub.s32 0, %v136_v9 }
  0x73   :  { %6772 = vmatprep.subr.bf16.mxu0 %v6771_v12  ;;  %v5700_v12 = vld [vmem:[%s9526_s2 + $0x290] ss:$8 sm:$0x3] }
  0x74   :  { %v138_v15 = vrot.slane %v5700_v12, %v137_v11 }
  0x76   :  { %6774 = vmatpush1.bf16.msra.mxu0 %v6773_v16  ;;  %v142_v16 = vrot.slane %v5700_v12, %v141_v14 }
  0x79   :  { %210 = vmatmul.mubr.f32.vlgmr.msra.gmra.mrb[0].mxu0 %v8359_v17 }
  0x7a   :  { %215 = vmatprep.mubr.f32.mxu0 %v8361_v18 }
  0x7d   :  { %216 = vmatmul.mubr.f32.gmra.mrb[2].mxu0 %v8365_v20 }
 0x124   :  { %v385_v4 = vpop.f32.mrb[0].mxu1 }
 0x125   :  { %v387_v5 = vpop.f32.mrb[1].mxu1 }
 0x128   :  { %v391_v6 = vpop.f32.mrb[2].mxu1 }
 0x129   :  { %v393_v7 = vpop.f32.mrb[3].mxu1 }
 0x14c   :  { %v211_v21 = vpop.f32.mrb[0].mxu0 }
 0x14d   :  { %v8479_v22 = vadd.f32 %v211_v21, %v138_v15  ;;  %v213_v23 = vpop.f32.mrb[1].mxu0  ;;  %v8505_v21 = vld [vmem:[%s9526_s2 + $0x280] sm:$0xff] }
 0x14e   :  { %v8481_v26 = vadd.f32 %v213_v23, %v142_v16  ;;  %v639_v23 = vld [vmem:[%s9527_s3 + $0x80] sm:$0xff] }
 0x14f   :  { %9595 = vst [vmem:[#allocation19_spill] sm:$0xff] %v8479_v22  ;;  %v396_v29 = vadd.f32 %v385_v4, %v8479_v22 }
 0x150   :  { %9596 = vst [vmem:[#allocation20_spill] sm:$0xff] %v8481_v26  ;;  %v217_v30 = vpop.f32.mrb[2].mxu0  ;;  %v397_v31 = vadd.f32 %v387_v5, %v8481_v26 }
 0x151   :  { %v8485_v33 = vadd.f32 %v217_v30, %v138_v15  ;;  %v219_v36 = vpop.f32.mrb[3].mxu0 }
 0x152   :  { %v8487_v37 = vadd.f32 %v219_v36, %v142_v16  ;;  %7620 = vtanh.f32 %v397_v31  ;;  %v8499_v16 = vld [vmem:[%s9526_s2 + $0x288] sm:$0xff] }
 0x153   :  { %9597 = vst [vmem:[#allocation21_spill] sm:$0xff] %v8485_v33  ;;  %7622 = vtanh.f32 %v396_v29  ;;  %v398_v41 = vadd.f32 %v391_v6, %v8485_v33  ;;  %542 = vmatprep.subr.mxu1 %v8499_v16  ;;  %v640_v29 = vld [vmem:[%s9527_s3 + $0x88] sm:$0xff] }
 0x154   :  { %9598 = vst [vmem:[#allocation22_spill] sm:$0xff] %v8487_v37  ;;  %v399_v42 = vadd.f32 %v393_v7, %v8487_v37  ;;  %v8514_v30 = vpack.c.bf16 %v640_v29, %v639_v23  ;;  %v647_v23 = vld [vmem:[%s9527_s3 + $0xc0] sm:$0xff]  ;;  %v648_v29 = vld [vmem:[%s9527_s3 + $0xc8] sm:$0xff] }
 0x156   :  { %7624 = vtanh.f32 %v399_v42  ;;  %9599 = vst [vmem:[#allocation23_spill] sm:$0xff] %v8514_v30  ;;  %v624_v42 = vld [vmem:[%s9527_s3 + $0x8] sm:$0xff] }
 0x157   :  { %7626 = vtanh.f32 %v398_v41  ;;  %v623_v41 = vld [vmem:[%s9527_s3] sm:$0xff] }
 0x15c   :  { %v7621_v44 = vpop.eup %7620 }
 0x15d   :  { %v7623_v45 = vpop.eup %7622  ;;  %500 = vmatprep.mubr.f32.mxu1 %v7621_v44  ;;  %v641_v44 = vld [vmem:[%s9527_s3 + $0x90] sm:$0xff] }
 0x15e   :  { %501 = vmatmul.mubr.f32.vlgmr.msra.gmra.mrb[4].mxu1 %v7623_v45  ;;  %v642_v45 = vld [vmem:[%s9527_s3 + $0x98] sm:$0xff] }
 0x15f   :  { %543 = vmatpush1.msra.mxu1 %v8505_v21 }
 0x160   :  { %v7625_v48 = vpop.eup %7624  ;;  %6824 = vmatprep.subr.bf16.mxu1 %v8514_v30 }
 0x161   :  { %v7627_v50 = vpop.eup %7626  ;;  %505 = vmatprep.mubr.f32.mxu1 %v7625_v48 }
 0x162   :  { %506 = vmatmul.mubr.f32.gmra.mrb[6].mxu1 %v7627_v50  ;;  %v8529_v50 = vpack.c.bf16 %v624_v42, %v623_v41  ;;  %v631_v41 = vld [vmem:[%s9527_s3 + $0x40] sm:$0xff]  ;;  %v632_v42 = vld [vmem:[%s9527_s3 + $0x48] sm:$0xff] }
 0x163   :  { %606 = vmatprep.mubr.f32.mxu1 %v9531_v0 }
 0x231   :  { %v5829_v52 = vpop.f32.mrb[4].mxu1 }
 0x232   :  { %v5830_v53 = vpop.f32.mrb[5].mxu1 }
 0x233   :  { %v5831_v54 = vadd.f32 %v5830_v53, %v5829_v52  ;;  %v8531_v53 = vpack.c.bf16 %v642_v45, %v641_v44  ;;  %v649_v44 = vld [vmem:[%s9527_s3 + $0xd0] sm:$0xff]  ;;  %v650_v45 = vld [vmem:[%s9527_s3 + $0xd8] sm:$0xff] }
 0x235   :  { %v5832_v56 = vpop.f32.mrb[6].mxu1  ;;  %v512_v58 = vsel %vm511_vm0, %v5831_v54, -inf }
 0x236   :  { %v5833_v59 = vpop.f32.mrb[7].mxu1  ;;  %513 = vmax.xlane.f32.xlu0 %v512_v58  ;;  %v643_v58 = vld [vmem:[%s9527_s3 + $0xa0] sm:$0xff] }
 0x237   :  { %v5834_v63 = vadd.f32 %v5833_v59, %v5832_v56  ;;  %v626_v56 = vld [vmem:[%s9527_s3 + $0x18] sm:$0xff]  ;;  %v644_v59 = vld [vmem:[%s9527_s3 + $0xa8] sm:$0xff] }
 0x239   :  { %v515_v1 = vsel %vm511_vm0, %v5834_v63, -inf }
 0x23a   :  { %516 = vmax.xlane.f32.xlu0 %v515_v1 }
 0x2c3   :  { %v514_v4 = vpop.xlane.xlu0 %513 }
 0x2c4   :  { %v518_v5 = vsub.f32 %v5831_v54, %v514_v4  ;;  %v625_v54 = vld [vmem:[%s9527_s3 + $0x10] sm:$0xff] }
 0x2c5   :  { %v8548_v1 = vpack.c.bf16 %v626_v56, %v625_v54  ;;  %v633_v54 = vld [vmem:[%s9527_s3 + $0x50] sm:$0xff]  ;;  %v634_v56 = vld [vmem:[%s9527_s3 + $0x58] sm:$0xff] }
 0x2c6   :  { %v520_v6 = vmul.f32 1.442695, %v518_v5  ;;  %v8551_v5 = vpack.c.bf16 %v644_v59, %v643_v58  ;;  %v651_v58 = vld [vmem:[%s9527_s3 + $0xe0] sm:$0xff]  ;;  %v652_v59 = vld [vmem:[%s9527_s3 + $0xe8] sm:$0xff] }
 0x2c7   :  { %v517_v7 = vpop.xlane.xlu0 %516 }
 0x2c8   :  { %7628 = vpow2.f32 %v520_v6  ;;  %v519_v8 = vsub.f32 %v5834_v63, %v517_v7  ;;  %v627_v6 = vld [vmem:[%s9527_s3 + $0x20] sm:$0xff]  ;;  %v628_v7 = vld [vmem:[%s9527_s3 + $0x28] sm:$0xff] }
 0x2ca   :  { %v522_v9 = vmul.f32 1.442695, %v519_v8  ;;  %v645_v8 = vld [vmem:[%s9527_s3 + $0xb0] sm:$0xff] }
 0x2cc   :  { %7630 = vpow2.f32 %v522_v9  ;;  %v646_v9 = vld [vmem:[%s9527_s3 + $0xb8] sm:$0xff] }
 0x2d2   :  { %v7629_v11 = vpop.eup %7628 }
 0x2d3   :  { %v524_v12 = vsel %vm511_vm0, %v7629_v11, 0.0 }
 0x2d4   :  { %525 = vadd.xlane.f32.xlu1 %v524_v12  ;;  %v8570_v12 = vpack.c.bf16 %v646_v9, %v645_v8  ;;  %v653_v9 = vld [vmem:[%s9527_s3 + $0xf0] sm:$0xff] }
 0x2d6   :  { %v7631_v14 = vpop.eup %7630 }
 0x2d7   :  { %v527_v15 = vsel %vm511_vm0, %v7631_v14, 0.0 }
 0x2d8   :  { %528 = vadd.xlane.f32.xlu1 %v527_v15  ;;  %v630_v15 = vld [vmem:[%s9527_s3 + $0x38] sm:$0xff] }
 0x361   :  { %v526_v31 = vpop.xlane.xlu1 %525 }
 0x362   :  { %7632 = vrcp.f32 %v526_v31 }
 0x365   :  { %v529_v36 = vpop.xlane.xlu1 %528 }
 0x366   :  { %7634 = vrcp.f32 %v529_v36  ;;  %v8588_v36 = vpack.c.bf16 %v648_v29, %v647_v23  ;;  %v637_v23 = vld [vmem:[%s9527_s3 + $0x70] sm:$0xff]  ;;  %v638_v29 = vld [vmem:[%s9527_s3 + $0x78] sm:$0xff] }
 0x36c   :  { %v7633_v48 = vpop.eup %7632 }
 0x36d   :  { %v532_v52 = vmul.f32 %v7633_v48, %v7629_v11  ;;  %v8567_v11 = vpack.c.bf16 %v628_v7, %v627_v6  ;;  %v8603_v48 = vpack.c.bf16 %v632_v42, %v631_v41  ;;  %v635_v6 = vld [vmem:[%s9527_s3 + $0x60] sm:$0xff]  ;;  %v636_v7 = vld [vmem:[%s9527_s3 + $0x68] sm:$0xff]  ;;  %v8651_v41 = vpack.c.bf16 %v638_v29, %v637_v23  ;;  %v736_v23 = vld [vmem:[#allocation6 + $0x30] sm:$0xff] }
 0x36e   :  { %v8633_v8 = vpack.c.bf16 %v636_v7, %v635_v6  ;;  %v734_v42 = vld [vmem:[#allocation6 + $0x20] sm:$0xff]  ;;  %v737_v29 = vld [vmem:[#allocation6 + $0x38] sm:$0xff] }
 0x36f   :  { %5701 = vmatmul.mubr.msk.f32.vlgmr.msra.gmra.mrb[8].mxu1 %vm511_vm0, %v532_v52  ;;  %v8606_v52 = vpack.c.bf16 %v650_v45, %v649_v44  ;;  %v735_v44 = vld [vmem:[#allocation6 + $0x28] sm:$0xff] }
 0x370   :  { %v7635_v63 = vpop.eup %7634  ;;  %612 = vmatprep.mubr.f32.mxu1 %v9531_v0  ;;  %6826 = vmatpush3.bf16.msra.mxu1 %v8529_v50  ;;  %v8656_v45 = vpack.c.bf16 %v735_v44, %v734_v42  ;;  %v8680_v42 = vpack.c.bf16 %v737_v29, %v736_v23  ;;  %v730_v44 = vld [vmem:[#allocation6] sm:$0xff] }
 0x371   :  { %v533_v4 = vmul.f32 %v7635_v63, %v7631_v14  ;;  %6828 = vmatprep.subr.bf16.mxu1 %v8531_v53  ;;  %v629_v14 = vld [vmem:[%s9527_s3 + $0x30] sm:$0xff]  ;;  %v8621_v63 = vpack.c.bf16 %v634_v56, %v633_v54 }
 0x372   :  { %v8585_v31 = vpack.c.bf16 %v630_v15, %v629_v14  ;;  %v654_v14 = vld [vmem:[%s9527_s3 + $0xf8] sm:$0xff]  ;;  %9600 = vst [vmem:[#allocation24_spill] sm:$0xff] %v8656_v45  ;;  %6856 = vmatprep.subr.bf16.mxu0 %v8656_v45  ;;  %9601 = vst [vmem:[#allocation25_spill] sm:$0xff] %v8680_v42  ;;  %s7968_s3 = smov 64  }
 0x373   :  { %5702 = vmatmul.mubr.msk.f32.gmra.mrb[10].mxu1 %vm511_vm0, %v533_v4  ;;  %v8624_v4 = vpack.c.bf16 %v652_v59, %v651_v58  ;;  %v8643_v15 = vpack.c.bf16 %v654_v14, %v653_v9  ;;  %6858 = vmatpush3.bf16.msra.mxu0 %v8656_v45 }
 0x374   :  { %6830 = vmatpush3.bf16.msra.mxu1 %v8548_v1  ;;  %6860 = vmatprep.subr.bf16.mxu0 %v8680_v42 }
 0x375   :  { %6832 = vmatprep.subr.bf16.mxu1 %v8551_v5 }
 0x377   :  { %6862 = vmatpush3.bf16.msra.mxu0 %v8680_v42 }
 0x378   :  { %6834 = vmatpush3.bf16.msra.mxu1 %v8567_v11 }
 0x379   :  { %6836 = vmatprep.subr.bf16.mxu1 %v8570_v12 }
 0x37c   :  { %6838 = vmatpush3.bf16.msra.mxu1 %v8585_v31 }
 0x37d   :  { %6840 = vmatprep.subr.bf16.mxu1 %v8588_v36 }
 0x380   :  { %6842 = vmatpush3.bf16.msra.mxu1 %v8603_v48 }
 0x381   :  { %6844 = vmatprep.subr.bf16.mxu1 %v8606_v52 }
 0x384   :  { %6846 = vmatpush3.bf16.msra.mxu1 %v8621_v63 }
 0x385   :  { %6848 = vmatprep.subr.bf16.mxu1 %v8624_v4 }
 0x388   :  { %6850 = vmatpush3.bf16.msra.mxu1 %v8633_v8 }
 0x389   :  { %6852 = vmatprep.subr.bf16.mxu1 %v8643_v15 }
 0x38c   :  { %6854 = vmatpush3.bf16.msra.mxu1 %v8651_v41 }
 0x38d   :  { %6888 = vmatprep.subr.bf16.mxu1 %v8242_v19 }
 0x442   :  { %v608_v54 = vpop.f32.mrb[8].mxu1 }
 0x443   :  { %v610_v56 = vpop.f32.mrb[9].mxu1  ;;  %v619_v59 = vmul.f32 %v608_v54, %v8359_v17  ;;  %v731_v54 = vld [vmem:[#allocation6 + $0x8] sm:$0xff] }
 0x444   :  { %v620_v58 = vmul.f32 %v610_v56, %v8219_v10  ;;  %v8684_v56 = vpack.c.bf16 %v731_v54, %v730_v44  ;;  %v9602_v44 = vmov 0.0   ;;  %v895_v54 = vld [vmem:[#allocation4 + $0x8] sm:$0xff] }
 0x446   :  { %v614_v6 = vpop.f32.mrb[10].mxu1  ;;  %719 = vmatprep.mubr.f32.mxu1 %v620_v58  ;;  %6864 = vmatprep.subr.bf16.mxu0 %v8684_v56 }
 0x447   :  { %v616_v7 = vpop.f32.mrb[11].mxu1  ;;  %720 = vmatmul.mubr.f32.vlgmr.msra.gmra.mrb[12].mxu1 %v619_v59  ;;  %v621_v14 = vmul.f32 %v614_v6, %v8365_v20 }
 0x448   :  { %v622_v9 = vmul.f32 %v616_v7, %v8361_v18  ;;  %6890 = vmatpush3.bf16.msra.mxu1 %v8262_v25  ;;  %v732_v7 = vld [vmem:[#allocation6 + $0x10] sm:$0xff] }
 0x449   :  { %6892 = vmatprep.subr.bf16.mxu1 %v8265_v27 }
 0x44a   :  { %724 = vmatprep.mubr.f32.mxu1 %v622_v9  ;;  %v733_v9 = vld [vmem:[#allocation6 + $0x18] sm:$0xff] }
 0x44b   :  { %725 = vmatmul.mubr.f32.gmra.mrb[14].mxu1 %v621_v14  ;;  %v8688_v0 = vpack.c.bf16 %v733_v9, %v732_v7 }
 0x44c   :  { %6894 = vmatpush3.bf16.msra.mxu1 %v8288_v35 }
 0x44d   :  { %6896 = vmatprep.subr.bf16.mxu1 %v8377_v24 }
 0x450   :  { %6898 = vmatpush3.bf16.msra.mxu1 %v8382_v28 }
 0x451   :  { %6900 = vmatprep.subr.bf16.mxu1 %v8395_v32 }
 0x454   :  { %6902 = vmatpush3.bf16.msra.mxu1 %v8400_v34 }
 0x455   :  { %6904 = vmatprep.subr.bf16.mxu1 %v8410_v38 }
 0x458   :  { %6906 = vmatpush3.bf16.msra.mxu1 %v8418_v43 }
 0x459   :  { %6908 = vmatprep.subr.bf16.mxu1 %v8428_v47 }
 0x45c   :  { %6910 = vmatpush3.bf16.msra.mxu1 %v8436_v51 }
 0x45d   :  { %6912 = vmatprep.subr.bf16.mxu1 %v8449_v55 }
 0x460   :  { %6914 = vmatpush3.bf16.msra.mxu1 %v8460_v60 }
 0x461   :  { %6916 = vmatprep.subr.bf16.mxu1 %v8462_v61 }
 0x464   :  { %6918 = vmatpush3.bf16.msra.mxu1 %v8472_v3 }
 0x465   :  { %6952 = vmatprep.subr.bf16.mxu1 %v8656_v45 }
 0x51a   :  { %v5867_v58 = vpop.f32.mrb[12].mxu1 }
 0x51b   :  { %v5868_v59 = vpop.f32.mrb[13].mxu1 }
 0x51c   :  { %v5869_v6 = vadd.f32 %v5868_v59, %v5867_v58  ;;  %v894_v58 = vld [vmem:[#allocation4] sm:$0xff] }
 0x51e   :  { %v5870_v14 = vpop.f32.mrb[14].mxu1  ;;  %6521 = vmatprep.mubr.msk.f32.mxu0 %vm238_vm1, %v5869_v6  ;;  %v8702_v6 = vld [vmem:[#allocation6 + $0x40] ss:$0 sm:$0xff] }
 0x51f   :  { %v5871_v23 = vpop.f32.mrb[15].mxu1  ;;  %9603 = vst [vmem:[#allocation26_spill] sm:$0xff] %v8702_v6 }
 0x520   :  { %v5872_v29 = vadd.f32 %v5871_v23, %v5870_v14 }
 0x522   :  { %6522 = vmatmul.mubr.msk.f32.vlgmr.msra.gmra.mrb[4].mxu0 %vm238_vm1, %v5872_v29 }
 0x523   :  { %6866 = vmatpush3.bf16.msra.mxu0 %v8684_v56  ;;  %6532 = vmatprep.mubr.f32.mxu0 %v9602_v44 }
 0x524   :  { %6868 = vmatprep.subr.bf16.mxu0 %v8688_v0 }
 0x527   :  { %6870 = vmatpush3.bf16.msra.mxu0 %v8688_v0 }
 0x528   :  { %6872 = vmatprep.subr.bf16.mxu0 %v8133_v39 }
 0x52a   :  { %6533 = vmatmul.mubr.f32.vlgmr.msra.gmra.mrb[4].mxu0 %v9602_v44 }
 0x52b   :  { %6874 = vmatpush1.bf16.msra.mxu0 %v8135_v40  ;;  %1027 = vmatprep.mubr.f32.mxu0 %v9602_v44 }
 0x52c   :  { %6876 = vmatprep.subr.bf16.mxu0 %v8150_v46 }
 0x52f   :  { %6878 = vmatpush1.bf16.msra.mxu0 %v8159_v49 }
 0x530   :  { %6880 = vmatprep.subr.bf16.mxu0 %v8177_v57 }
 0x5fd   :  { %v6534_v59 = vpop.f32.mrb[4].mxu0 }
 0x5fe   :  { %v897_v7 = vadd.f32 %v6534_v59, %v895_v54  ;;  %v885_v9 = vpop.f32.mrb[5].mxu0 }
 0x5ff   :  { %v896_v14 = vadd.f32 %v894_v58, %v885_v9 }
 0x600   :  { %v904_v23 = vadd.f32 %v8702_v6, %v897_v7 }
 0x601   :  { %v903_v29 = vadd.f32 %v8702_v6, %v896_v14 }
 0x602   :  { %7636 = vtanh.f32 %v904_v23  ;;  %v5707_v55 = vmul.f32 -1.442695, %v904_v23 }
 0x603   :  { %7638 = vtanh.f32 %v903_v29  ;;  %v5706_v60 = vmul.f32 -1.442695, %v903_v29 }
 0x605   :  { %7640 = vpow2.f32 %v5706_v60 }
 0x606   :  { %7642 = vpow2.f32 %v5707_v55 }
 0x60c   :  { %v7637_v3 = vpop.eup %7636 }
 0x60d   :  { %v7639_v61 = vpop.eup %7638  ;;  %925 = vrot.lane.b32.xlu1 %v7637_v3, %s7968_s3 }
 0x60e   :  { %923 = vrot.lane.b32.xlu0 %v7639_v61, %s7968_s3 }
 0x60f   :  { %v7641_v54 = vpop.eup %7640 }
 0x610   :  { %v911_v59 = vadd.f32 1.0, %v7641_v54  ;;  %v7643_v58 = vpop.eup %7642 }
 0x611   :  { %v912_v9 = vadd.f32 1.0, %v7643_v58 }
 0x612   :  { %7644 = vrcp.f32 %v911_v59 }
 0x613   :  { %7646 = vrcp.f32 %v912_v9 }
 0x61c   :  { %v7645_v7 = vpop.eup %7644 }
 0x61d   :  { %v7647_v3 = vpop.eup %7646  ;;  %v919_v61 = vmul.f32 0.0, %v7645_v7 }
 0x61e   :  { %v920_v23 = vmul.f32 0.0, %v7647_v3 }
 0x67f   :  { %v926_v51 = vpop.permute.xlu1 %925 }
 0x680   :  { %v924_v14 = vpop.permute.xlu0 %923  ;;  %v930_v47 = vmul.f32 %v7647_v3, %v926_v51 }
 0x681   :  { %v929_v6 = vmul.f32 %v7645_v7, %v924_v14 }
 0x683   :  { %933 = vrot.lane.b32.xlu1 %v929_v6, %s7969_s11 }
 0x687   :  { %935 = vrot.lane.b32.xlu1 %v930_v47, %s7969_s11 }
 0x6f5   :  { %v934_v60 = vpop.permute.xlu1 %933 }
 0x6f6   :  { %v8710_v55 = vadd.f32 %v934_v60, %v919_v61 }
 0x6f8   :  { %7648 = vtanh.f32 %v8710_v55 }
 0x6f9   :  { %v936_v29 = vpop.permute.xlu1 %935 }
 0x6fa   :  { %v8713_v54 = vadd.f32 %v936_v29, %v920_v23 }
 0x6fc   :  { %7650 = vtanh.f32 %v8713_v54 }
 0x702   :  { %v7649_v59 = vpop.eup %7648 }
 0x703   :  { %945 = vrot.lane.b32.xlu0 %v7649_v59, %s7968_s3 }
 0x706   :  { %v7651_v6 = vpop.eup %7650 }
 0x707   :  { %947 = vrot.lane.b32.xlu1 %v7651_v6, %s7968_s3  ;;  %955 = vrot.lane.b32.xlu0 %v8710_v55, %s7970_s0 }
 0x70b   :  { %957 = vrot.lane.b32.xlu1 %v8713_v54, %s7970_s0 }
 0x775   :  { %v946_v47 = vpop.permute.xlu0 %945 }
 0x776   :  { %v951_v51 = vmul.f32 %v7645_v7, %v946_v47 }
 0x778   :  { %1042 = vrot.lane.b32.xlu0 %v951_v51, %s7969_s11 }
 0x779   :  { %v948_v58 = vpop.permute.xlu1 %947  ;;  %v956_v9 = vpop.permute.xlu0 %955 }
 0x77a   :  { %v952_v14 = vmul.f32 %v7647_v3, %v948_v58  ;;  %5708 = vmatmul.mubr.msk.f32.vlgmr.msra.gmra.mrb[6].mxu0 %vm238_vm1, %v956_v9 }
 0x77b   :  { %1033 = vmatprep.mubr.f32.mxu0 %v9602_v44  ;;  %6882 = vmatpush1.bf16.msra.mxu0 %v8192_v62 }
 0x77c   :  { %1044 = vrot.lane.b32.xlu1 %v952_v14, %s7969_s11  ;;  %6884 = vmatprep.subr.bf16.mxu0 %v8198_v2 }
 0x77d   :  { %v958_v61 = vpop.permute.xlu1 %957 }
 0x77e   :  { %5709 = vmatmul.mubr.msk.f32.gmra.mrb[8].mxu0 %vm238_vm1, %v958_v61 }
 0x77f   :  { %6886 = vmatpush1.bf16.msra.mxu0 %v8229_v13  ;;  %1114 = vmatprep.mubr.f32.mxu0 %v9602_v44 }
 0x780   :  { %1238 = vmatprep.subr.mxu0 %v8499_v16 }
 0x7ea   :  { %v8732_v7 = vpop.permute.xlu0 %1042 }
 0x7eb   :  { %5710 = vmatmul.mubr.msk.f32.vlgmr.msra.gmra.mrb[6].mxu0 %vm238_vm1, %v8732_v7 }
 0x7ec   :  { %1120 = vmatprep.mubr.f32.mxu0 %v9602_v44  ;;  %1239 = vmatpush1.msra.mxu0 %v8505_v21 }
 0x7ed   :  { %6920 = vmatprep.subr.bf16.mxu0 %v8514_v30 }
 0x7ee   :  { %v8739_v3 = vpop.permute.xlu1 %1044 }
 0x7ef   :  { %5711 = vmatmul.mubr.msk.f32.gmra.mrb[8].mxu0 %vm238_vm1, %v8739_v3 }
 0x7f0   :  { %1302 = vmatprep.mubr.f32.mxu0 %v9602_v44 }
 0x8be   :  { %v1116_v60 = vpop.f32.mrb[6].mxu0 }
 0x8bf   :  { %v1127_v23 = vadd.f32 %v1116_v60, %v8479_v22  ;;  %v1118_v29 = vpop.f32.mrb[7].mxu0 }
 0x8c0   :  { %v1128_v59 = vadd.f32 %v1118_v29, %v8481_v26 }
 0x8c2   :  { %7652 = vtanh.f32 %v1128_v59  ;;  %v1122_v6 = vpop.f32.mrb[8].mxu0 }
 0x8c3   :  { %7654 = vtanh.f32 %v1127_v23  ;;  %v1129_v47 = vadd.f32 %v1122_v6, %v8485_v33  ;;  %v1124_v51 = vpop.f32.mrb[9].mxu0 }
 0x8c4   :  { %v1130_v58 = vadd.f32 %v1124_v51, %v8487_v37 }
 0x8c6   :  { %7656 = vtanh.f32 %v1130_v58 }
 0x8c7   :  { %7658 = vtanh.f32 %v1129_v47 }
 0x8cc   :  { %v7653_v9 = vpop.eup %7652 }
 0x8cd   :  { %v7655_v14 = vpop.eup %7654  ;;  %1199 = vmatprep.mubr.f32.mxu1 %v7653_v9 }
 0x8ce   :  { %1200 = vmatmul.mubr.f32.vlgmr.msra.gmra.mrb[16].mxu1 %v7655_v14 }
 0x8cf   :  { %6954 = vmatpush3.bf16.msra.mxu1 %v8656_v45 }
 0x8d0   :  { %v7657_v61 = vpop.eup %7656  ;;  %6956 = vmatprep.subr.bf16.mxu1 %v8680_v42 }
 0x8d1   :  { %v7659_v60 = vpop.eup %7658  ;;  %1204 = vmatprep.mubr.f32.mxu1 %v7657_v61 }
 0x8d2   :  { %1205 = vmatmul.mubr.f32.gmra.mrb[18].mxu1 %v7659_v60 }
 0x8d3   :  { %6958 = vmatpush3.bf16.msra.mxu1 %v8680_v42 }
 0x8d4   :  { %6960 = vmatprep.subr.bf16.mxu1 %v8684_v56 }
 0x9a1   :  { %v5917_v23 = vpop.f32.mrb[16].mxu1 }
 0x9a2   :  { %v5918_v29 = vpop.f32.mrb[17].mxu1 }
 0x9a3   :  { %v5919_v59 = vadd.f32 %v5918_v29, %v5917_v23 }
 0x9a5   :  { %v5920_v6 = vpop.f32.mrb[18].mxu1  ;;  %v1210_v47 = vsel %vm511_vm0, %v5919_v59, -inf }
 0x9a6   :  { %1211 = vmax.xlane.f32.xlu0 %v1210_v47  ;;  %v5921_v51 = vpop.f32.mrb[19].mxu1 }
 0x9a7   :  { %v5922_v58 = vadd.f32 %v5921_v51, %v5920_v6 }
 0x9a9   :  { %v1213_v9 = vsel %vm511_vm0, %v5922_v58, -inf }
 0x9aa   :  { %1214 = vmax.xlane.f32.xlu1 %v1213_v9 }
 0xa33   :  { %v1212_v14 = vpop.xlane.xlu0 %1211 }
 0xa34   :  { %v1216_v37 = vsub.f32 %v5919_v59, %v1212_v14 }
 0xa36   :  { %v1218_v61 = vmul.f32 1.442695, %v1216_v37 }
 0xa37   :  { %v1215_v60 = vpop.xlane.xlu1 %1214 }
 0xa38   :  { %7660 = vpow2.f32 %v1218_v61  ;;  %v1217_v42 = vsub.f32 %v5922_v58, %v1215_v60 }
 0xa3a   :  { %v1220_v33 = vmul.f32 1.442695, %v1217_v42 }
 0xa3c   :  { %7662 = vpow2.f32 %v1220_v33 }
 0xa42   :  { %v7661_v26 = vpop.eup %7660 }
 0xa43   :  { %v1222_v23 = vsel %vm511_vm0, %v7661_v26, 0.0 }
 0xa44   :  { %1223 = vadd.xlane.f32.xlu0 %v1222_v23 }
 0xa46   :  { %v7663_v29 = vpop.eup %7662 }
 0xa47   :  { %v1225_v47 = vsel %vm511_vm0, %v7663_v29, 0.0 }
 0xa48   :  { %1226 = vadd.xlane.f32.xlu0 %v1225_v47 }
 0xad1   :  { %v1224_v6 = vpop.xlane.xlu0 %1223 }
 0xad2   :  { %7664 = vrcp.f32 %v1224_v6 }
 0xad5   :  { %v1227_v51 = vpop.xlane.xlu0 %1226 }
 0xad6   :  { %7666 = vrcp.f32 %v1227_v51 }
 0xadc   :  { %v7665_v9 = vpop.eup %7664 }
 0xadd   :  { %v1230_v59 = vmul.f32 %v7665_v9, %v7661_v26  ;;  %v9607_v9 = vld [vmem:[#allocation16_spill] sm:$0xff] }
 0xadf   :  { %5712 = vmatmul.mubr.msk.f32.vlgmr.msra.gmra.mrb[10].mxu0 %vm511_vm0, %v1230_v59  ;;  %v9608_v59 = vld [vmem:[#allocation17_spill] sm:$0xff] }
 0xae0   :  { %v7667_v37 = vpop.eup %7666  ;;  %1308 = vmatprep.mubr.f32.mxu0 %v9602_v44  ;;  %6922 = vmatpush3.bf16.msra.mxu0 %v8529_v50 }
 0xae1   :  { %v1231_v33 = vmul.f32 %v7667_v37, %v7663_v29  ;;  %6924 = vmatprep.subr.bf16.mxu0 %v8531_v53  ;;  %v9609_v37 = vld [vmem:[#allocation18_spill] sm:$0xff] }
 0xae3   :  { %5713 = vmatmul.mubr.msk.f32.gmra.mrb[12].mxu0 %vm511_vm0, %v1231_v33  ;;  %v1552_v33 = vld [vmem:[#allocation4 + $0x18] sm:$0xff] }
 0xae4   :  { %6926 = vmatpush3.bf16.msra.mxu0 %v8548_v1 }
 0xae5   :  { %6928 = vmatprep.subr.bf16.mxu0 %v8551_v5 }
 0xae8   :  { %6930 = vmatpush3.bf16.msra.mxu0 %v8567_v11 }
 0xae9   :  { %6932 = vmatprep.subr.bf16.mxu0 %v8570_v12 }
 0xaec   :  { %6934 = vmatpush3.bf16.msra.mxu0 %v8585_v31 }
 0xaed   :  { %6936 = vmatprep.subr.bf16.mxu0 %v8588_v36 }
 0xaf0   :  { %6938 = vmatpush3.bf16.msra.mxu0 %v8603_v48 }
 0xaf1   :  { %6940 = vmatprep.subr.bf16.mxu0 %v8606_v52 }
 0xaf4   :  { %6942 = vmatpush3.bf16.msra.mxu0 %v8621_v63 }
 0xaf5   :  { %6944 = vmatprep.subr.bf16.mxu0 %v8624_v4 }
 0xaf8   :  { %6946 = vmatpush3.bf16.msra.mxu0 %v8633_v8 }
 0xaf9   :  { %6948 = vmatprep.subr.bf16.mxu0 %v8643_v15 }
 0xafc   :  { %6950 = vmatpush3.bf16.msra.mxu0 %v8651_v41 }
 0xafd   :  { %6968 = vmatprep.subr.bf16.mxu0 %v8133_v39 }
 0xbb2   :  { %v1304_v26 = vpop.f32.mrb[10].mxu0 }
 0xbb3   :  { %v1306_v42 = vpop.f32.mrb[11].mxu0  ;;  %v1315_v14 = vmul.f32 %v1304_v26, %v8359_v17  ;;  %v1551_v26 = vld [vmem:[#allocation4 + $0x10] sm:$0xff] }
 0xbb4   :  { %v1316_v58 = vmul.f32 %v1306_v42, %v8219_v10 }
 0xbb6   :  { %v1310_v61 = vpop.f32.mrb[12].mxu0  ;;  %1383 = vmatprep.mubr.f32.mxu0 %v1316_v58 }
 0xbb7   :  { %v1312_v60 = vpop.f32.mrb[13].mxu0  ;;  %1384 = vmatmul.mubr.f32.vlgmr.msra.gmra.mrb[14].mxu0 %v1315_v14  ;;  %v1317_v29 = vmul.f32 %v1310_v61, %v8365_v20  ;;  %v9604_v20 = vld [vmem:[#allocation13_spill] sm:$0xff] }
 0xbb8   :  { %v1318_v23 = vmul.f32 %v1312_v60, %v8361_v18  ;;  %6970 = vmatpush1.bf16.msra.mxu0 %v8135_v40  ;;  %v9610_v60 = vld [vmem:[#allocation26_spill] sm:$0xff] }
 0xbb9   :  { %6972 = vmatprep.subr.bf16.mxu0 %v8150_v46 }
 0xbba   :  { %1388 = vmatprep.mubr.f32.mxu0 %v1318_v23 }
 0xbbb   :  { %1389 = vmatmul.mubr.f32.gmra.mrb[16].mxu0 %v1317_v29 }
 0xbbc   :  { %6974 = vmatpush1.bf16.msra.mxu0 %v8159_v49  ;;  %1679 = vmatprep.mubr.f32.mxu0 %v9602_v44 }
 0xbbd   :  { %6976 = vmatprep.subr.bf16.mxu0 %v8177_v57 }
 0xc8a   :  { %v5955_v10 = vpop.f32.mrb[14].mxu0 }
 0xc8b   :  { %v5956_v17 = vpop.f32.mrb[15].mxu0 }
 0xc8c   :  { %v5957_v47 = vadd.f32 %v5956_v17, %v5955_v10 }
 0xc8e   :  { %v5958_v6 = vpop.f32.mrb[16].mxu0  ;;  %6543 = vmatprep.mubr.msk.f32.mxu1 %vm238_vm1, %v5957_v47 }
 0xc8f   :  { %v5959_v18 = vpop.f32.mrb[17].mxu0 }
 0xc90   :  { %v5960_v51 = vadd.f32 %v5959_v18, %v5958_v6 }
 0xc92   :  { %6544 = vmatmul.mubr.msk.f32.vlgmr.msra.gmra.mrb[20].mxu1 %vm238_vm1, %v5960_v51 }
 0xc93   :  { %6962 = vmatpush3.bf16.msra.mxu1 %v8684_v56  ;;  %6554 = vmatprep.mubr.msk.f32.mxu1 %vm238_vm1, %v8732_v7  ;;  %v9605_v7 = vld [vmem:[#allocation14_spill] sm:$0xff] }
 0xc94   :  { %6964 = vmatprep.subr.bf16.mxu1 %v8688_v0 }
 0xc97   :  { %6966 = vmatpush3.bf16.msra.mxu1 %v8688_v0 }
 0xc98   :  { %6984 = vmatprep.subr.bf16.mxu1 %v8242_v19 }
 0xc9a   :  { %6555 = vmatmul.mubr.msk.f32.vlgmr.msra.gmra.mrb[20].mxu1 %vm238_vm1, %v8739_v3  ;;  %v9606_v3 = vld [vmem:[#allocation15_spill] sm:$0xff] }
 0xc9b   :  { %6986 = vmatpush3.bf16.msra.mxu1 %v8262_v25 }
 0xc9c   :  { %6988 = vmatprep.subr.bf16.mxu1 %v8265_v27 }
 0xc9f   :  { %6990 = vmatpush3.bf16.msra.mxu1 %v8288_v35 }
 0xca0   :  { %6992 = vmatprep.subr.bf16.mxu1 %v8377_v24 }
 0xca3   :  { %6994 = vmatpush3.bf16.msra.mxu1 %v8382_v28 }
 0xca4   :  { %6996 = vmatprep.subr.bf16.mxu1 %v8395_v32 }
 0xca7   :  { %6998 = vmatpush3.bf16.msra.mxu1 %v8400_v34 }
 0xca8   :  { %7000 = vmatprep.subr.bf16.mxu1 %v8410_v38 }
 0xcab   :  { %7002 = vmatpush3.bf16.msra.mxu1 %v8418_v43 }
 0xcac   :  { %7004 = vmatprep.subr.bf16.mxu1 %v9604_v20 }
 0xcaf   :  { %7006 = vmatpush3.bf16.msra.mxu1 %v9605_v7 }
 0xcb0   :  { %7008 = vmatprep.subr.bf16.mxu1 %v9606_v3 }
 0xcb3   :  { %7010 = vmatpush3.bf16.msra.mxu1 %v9607_v9 }
 0xcb4   :  { %7012 = vmatprep.subr.bf16.mxu1 %v9608_v59 }
 0xcb7   :  { %7014 = vmatpush3.bf16.msra.mxu1 %v9609_v37 }
 0xcb8   :  { %7048 = vmatprep.subr.bf16.mxu1 %v8656_v45 }
 0xd6d   :  { %v6556_v42 = vpop.f32.mrb[20].mxu1 }
 0xd6e   :  { %v1554_v58 = vadd.f32 %v6556_v42, %v1552_v33  ;;  %v1541_v14 = vpop.f32.mrb[21].mxu1 }
 0xd6f   :  { %v1553_v61 = vadd.f32 %v1551_v26, %v1541_v14 }
 0xd70   :  { %v1556_v23 = vadd.f32 %v9610_v60, %v1554_v58 }
 0xd71   :  { %v1555_v29 = vadd.f32 %v9610_v60, %v1553_v61 }
 0xd72   :  { %7668 = vtanh.f32 %v1556_v23  ;;  %v5719_v6 = vmul.f32 -1.442695, %v1556_v23 }
 0xd73   :  { %7670 = vtanh.f32 %v1555_v29  ;;  %v5718_v47 = vmul.f32 -1.442695, %v1555_v29 }
 0xd75   :  { %7672 = vpow2.f32 %v5718_v47 }
 0xd76   :  { %7674 = vpow2.f32 %v5719_v6 }
 0xd7c   :  { %v7669_v10 = vpop.eup %7668 }
 0xd7d   :  { %v7671_v17 = vpop.eup %7670  ;;  %1577 = vrot.lane.b32.xlu1 %v7669_v10, %s7968_s3 }
 0xd7e   :  { %1575 = vrot.lane.b32.xlu0 %v7671_v17, %s7968_s3 }
 0xd7f   :  { %v7673_v18 = vpop.eup %7672 }
 0xd80   :  { %v1563_v51 = vadd.f32 1.0, %v7673_v18  ;;  %v7675_v33 = vpop.eup %7674 }
 0xd81   :  { %v1564_v26 = vadd.f32 1.0, %v7675_v33 }
 0xd82   :  { %7676 = vrcp.f32 %v1563_v51 }
 0xd83   :  { %7678 = vrcp.f32 %v1564_v26 }
 0xd8c   :  { %v7677_v42 = vpop.eup %7676 }
 0xd8d   :  { %v7679_v60 = vpop.eup %7678  ;;  %v1571_v23 = vmul.f32 %v7677_v42, %v8710_v55 }
 0xd8e   :  { %v1572_v47 = vmul.f32 %v7679_v60, %v8713_v54 }
 0xdef   :  { %v1578_v61 = vpop.permute.xlu1 %1577 }
 0xdf0   :  { %v1576_v58 = vpop.permute.xlu0 %1575  ;;  %v1582_v10 = vmul.f32 %v7679_v60, %v1578_v61 }
 0xdf1   :  { %v1581_v14 = vmul.f32 %v7677_v42, %v1576_v58 }
 0xdf3   :  { %1585 = vrot.lane.b32.xlu1 %v1581_v14, %s7969_s11 }
 0xdf7   :  { %1587 = vrot.lane.b32.xlu1 %v1582_v10, %s7969_s11 }
 0xe65   :  { %v1586_v29 = vpop.permute.xlu1 %1585 }
 0xe66   :  { %v8817_v17 = vadd.f32 %v1586_v29, %v1571_v23  ;;  %v9611_v29 = vld [vmem:[#allocation20_spill] sm:$0xff] }
 0xe68   :  { %7680 = vtanh.f32 %v8817_v17 }
 0xe69   :  { %v1588_v6 = vpop.permute.xlu1 %1587 }
 0xe6a   :  { %v8821_v18 = vadd.f32 %v1588_v6, %v1572_v47 }
 0xe6c   :  { %7682 = vtanh.f32 %v8821_v18 }
 0xe72   :  { %v7681_v51 = vpop.eup %7680 }
 0xe73   :  { %1597 = vrot.lane.b32.xlu0 %v7681_v51, %s7968_s3  ;;  %v9612_v51 = vld [vmem:[#allocation21_spill] sm:$0xff] }
 0xe76   :  { %v7683_v33 = vpop.eup %7682 }
 0xe77   :  { %1599 = vrot.lane.b32.xlu1 %v7683_v33, %s7968_s3  ;;  %1607 = vrot.lane.b32.xlu0 %v8817_v17, %s7970_s0 }
 0xe7b   :  { %1609 = vrot.lane.b32.xlu1 %v8821_v18, %s7970_s0 }
 0xee5   :  { %v1598_v55 = vpop.permute.xlu0 %1597 }
 0xee6   :  { %v1603_v26 = vmul.f32 %v7677_v42, %v1598_v55  ;;  %v9613_v55 = vld [vmem:[#allocation22_spill] sm:$0xff] }
 0xee8   :  { %1694 = vrot.lane.b32.xlu0 %v1603_v26, %s7969_s11 }
 0xee9   :  { %v1600_v54 = vpop.permute.xlu1 %1599  ;;  %v1608_v58 = vpop.permute.xlu0 %1607 }
 0xeea   :  { %v1604_v14 = vmul.f32 %v7679_v60, %v1600_v54  ;;  %5720 = vmatmul.mubr.msk.f32.vlgmr.msra.gmra.mrb[18].mxu0 %vm238_vm1, %v1608_v58 }
 0xeeb   :  { %1685 = vmatprep.mubr.f32.mxu0 %v9602_v44  ;;  %6978 = vmatpush1.bf16.msra.mxu0 %v8192_v62 }
 0xeec   :  { %1696 = vrot.lane.b32.xlu1 %v1604_v14, %s7969_s11  ;;  %6980 = vmatprep.subr.bf16.mxu0 %v8198_v2 }
 0xeed   :  { %v1610_v61 = vpop.permute.xlu1 %1609 }
 0xeee   :  { %5721 = vmatmul.mubr.msk.f32.gmra.mrb[20].mxu0 %vm238_vm1, %v1610_v61  ;;  %v9614_v61 = vld [vmem:[#allocation25_spill] sm:$0xff] }
 0xeef   :  { %6982 = vmatpush1.bf16.msra.mxu0 %v8229_v13  ;;  %1766 = vmatprep.mubr.f32.mxu0 %v9602_v44 }
 0xef0   :  { %1890 = vmatprep.subr.mxu0 %v8499_v16 }
 0xf5a   :  { %v8840_v60 = vpop.permute.xlu0 %1694 }
 0xf5b   :  { %5722 = vmatmul.mubr.msk.f32.vlgmr.msra.gmra.mrb[18].mxu0 %vm238_vm1, %v8840_v60 }
 0xf5c   :  { %1772 = vmatprep.mubr.f32.mxu0 %v9602_v44  ;;  %1891 = vmatpush1.msra.mxu0 %v8505_v21 }
 0xf5d   :  { %7016 = vmatprep.subr.bf16.mxu0 %v8514_v30 }
 0xf5e   :  { %v8847_v42 = vpop.permute.xlu1 %1696 }
 0xf5f   :  { %5723 = vmatmul.mubr.msk.f32.gmra.mrb[20].mxu0 %vm238_vm1, %v8847_v42 }
 0xf60   :  { %1954 = vmatprep.mubr.f32.mxu0 %v9602_v44 }
0x102e   :  { %v1768_v10 = vpop.f32.mrb[18].mxu0 }
0x102f   :  { %v1779_v16 = vadd.f32 %v1768_v10, %v8479_v22  ;;  %v1770_v23 = vpop.f32.mrb[19].mxu0 }
0x1030   :  { %v1780_v47 = vadd.f32 %v1770_v23, %v9611_v29 }
0x1032   :  { %7684 = vtanh.f32 %v1780_v47  ;;  %v1774_v6 = vpop.f32.mrb[20].mxu0 }
0x1033   :  { %7686 = vtanh.f32 %v1779_v16  ;;  %v1781_v21 = vadd.f32 %v1774_v6, %v9612_v51  ;;  %v1776_v33 = vpop.f32.mrb[21].mxu0 }
0x1034   :  { %v1782_v26 = vadd.f32 %v1776_v33, %v9613_v55 }
0x1036   :  { %7688 = vtanh.f32 %v1782_v26 }
0x1037   :  { %7690 = vtanh.f32 %v1781_v21 }
0x103c   :  { %v7685_v54 = vpop.eup %7684 }
0x103d   :  { %v7687_v58 = vpop.eup %7686  ;;  %1851 = vmatprep.mubr.f32.mxu1 %v7685_v54 }
0x103e   :  { %1852 = vmatmul.mubr.f32.vlgmr.msra.gmra.mrb[22].mxu1 %v7687_v58 }
0x103f   :  { %7050 = vmatpush3.bf16.msra.mxu1 %v8656_v45 }
0x1040   :  { %v7689_v14 = vpop.eup %7688  ;;  %7052 = vmatprep.subr.bf16.mxu1 %v9614_v61 }
0x1041   :  { %v7691_v10 = vpop.eup %7690  ;;  %1856 = vmatprep.mubr.f32.mxu1 %v7689_v14 }
0x1042   :  { %1857 = vmatmul.mubr.f32.gmra.mrb[24].mxu1 %v7691_v10 }
0x1043   :  { %7054 = vmatpush3.bf16.msra.mxu1 %v9614_v61 }
0x1044   :  { %7056 = vmatprep.subr.bf16.mxu1 %v8684_v56 }
0x1111   :  { %v6005_v16 = vpop.f32.mrb[22].mxu1 }
0x1112   :  { %v6006_v23 = vpop.f32.mrb[23].mxu1 }
0x1113   :  { %v6007_v47 = vadd.f32 %v6006_v23, %v6005_v16 }
0x1115   :  { %v6008_v6 = vpop.f32.mrb[24].mxu1  ;;  %v1862_v21 = vsel %vm511_vm0, %v6007_v47, -inf }
0x1116   :  { %1863 = vmax.xlane.f32.xlu0 %v1862_v21  ;;  %v6009_v33 = vpop.f32.mrb[25].mxu1 }
0x1117   :  { %v6010_v26 = vadd.f32 %v6009_v33, %v6008_v6 }
0x1119   :  { %v1865_v54 = vsel %vm511_vm0, %v6010_v26, -inf }
0x111a   :  { %1866 = vmax.xlane.f32.xlu1 %v1865_v54 }
0x11a3   :  { %v1864_v58 = vpop.xlane.xlu0 %1863 }
0x11a4   :  { %v1868_v55 = vsub.f32 %v6007_v47, %v1864_v58 }
0x11a6   :  { %v1870_v14 = vmul.f32 1.442695, %v1868_v55 }
0x11a7   :  { %v1867_v10 = vpop.xlane.xlu1 %1866 }
0x11a8   :  { %7692 = vpow2.f32 %v1870_v14  ;;  %v1869_v61 = vsub.f32 %v6010_v26, %v1867_v10  ;;  %v8883_v26 = vld [vmem:[#allocation2 + $0x8] sm:$0xff]  ;;  %v8886_v14 = vld [vmem:[#allocation2] sm:$0xff] }
0x11aa   :  { %v1872_v51 = vmul.f32 1.442695, %v1869_v61 }
0x11ac   :  { %7694 = vpow2.f32 %v1872_v51 }
0x11b2   :  { %v7693_v29 = vpop.eup %7692 }
0x11b3   :  { %v1874_v16 = vsel %vm511_vm0, %v7693_v29, 0.0 }
0x11b4   :  { %1875 = vadd.xlane.f32.xlu0 %v1874_v16 }
0x11b6   :  { %v7695_v23 = vpop.eup %7694 }
0x11b7   :  { %v1877_v21 = vsel %vm511_vm0, %v7695_v23, 0.0 }
0x11b8   :  { %1878 = vadd.xlane.f32.xlu0 %v1877_v21  ;;  %v8889_v21 = vld [vmem:[#allocation2 + $0x18] sm:$0xff] }
0x1241   :  { %v1876_v6 = vpop.xlane.xlu0 %1875 }
0x1242   :  { %7696 = vrcp.f32 %v1876_v6 }
0x1245   :  { %v1879_v33 = vpop.xlane.xlu0 %1878 }
0x1246   :  { %7698 = vrcp.f32 %v1879_v33  ;;  %v8893_v33 = vld [vmem:[#allocation2 + $0x10] sm:$0xff] }
0x124c   :  { %v7697_v54 = vpop.eup %7696 }
0x124d   :  { %v1882_v47 = vmul.f32 %v7697_v54, %v7693_v29 }
0x124f   :  { %5724 = vmatmul.mubr.msk.f32.vlgmr.msra.gmra.mrb[22].mxu0 %vm511_vm0, %v1882_v47 }
0x1250   :  { %v7699_v55 = vpop.eup %7698  ;;  %1960 = vmatprep.mubr.f32.mxu0 %v9602_v44  ;;  %7018 = vmatpush3.bf16.msra.mxu0 %v8529_v50 }
0x1251   :  { %v1883_v51 = vmul.f32 %v7699_v55, %v7695_v23  ;;  %7020 = vmatprep.subr.bf16.mxu0 %v8531_v53 }
0x1253   :  { %5725 = vmatmul.mubr.msk.f32.gmra.mrb[24].mxu0 %vm511_vm0, %v1883_v51 }
0x1254   :  { %7022 = vmatpush3.bf16.msra.mxu0 %v8548_v1 }
0x1255   :  { %7024 = vmatprep.subr.bf16.mxu0 %v8551_v5 }
0x1258   :  { %7026 = vmatpush3.bf16.msra.mxu0 %v8567_v11 }
0x1259   :  { %7028 = vmatprep.subr.bf16.mxu0 %v8570_v12 }
0x125c   :  { %7030 = vmatpush3.bf16.msra.mxu0 %v8585_v31 }
0x125d   :  { %7032 = vmatprep.subr.bf16.mxu0 %v8588_v36 }
0x1260   :  { %7034 = vmatpush3.bf16.msra.mxu0 %v8603_v48 }
0x1261   :  { %7036 = vmatprep.subr.bf16.mxu0 %v8606_v52 }
0x1264   :  { %7038 = vmatpush3.bf16.msra.mxu0 %v8621_v63 }
0x1265   :  { %7040 = vmatprep.subr.bf16.mxu0 %v8624_v4 }
0x1268   :  { %7042 = vmatpush3.bf16.msra.mxu0 %v8633_v8 }
0x1269   :  { %7044 = vmatprep.subr.bf16.mxu0 %v8643_v15 }
0x126c   :  { %7046 = vmatpush3.bf16.msra.mxu0 %v8651_v41 }
0x126d   :  { %7080 = vmatprep.subr.bf16.mxu0 %v8242_v19 }
0x1322   :  { %v1956_v29 = vpop.f32.mrb[22].mxu0 }
0x1323   :  { %v1958_v61 = vpop.f32.mrb[23].mxu0  ;;  %v1967_v10 = vmul.f32 %v8886_v14, %v1956_v29 }
0x1324   :  { %v1968_v58 = vmul.f32 %v8883_v26, %v1958_v61 }
0x1326   :  { %v1962_v16 = vpop.f32.mrb[24].mxu0  ;;  %2035 = vmatprep.mubr.f32.mxu0 %v1968_v58 }
0x1327   :  { %v1964_v23 = vpop.f32.mrb[25].mxu0  ;;  %2036 = vmatmul.mubr.f32.vlgmr.msra.gmra.mrb[26].mxu0 %v1967_v10  ;;  %v1969_v54 = vmul.f32 %v8893_v33, %v1962_v16  ;;  %v2203_v10 = vld [vmem:[#allocation4 + $0x20] sm:$0xff] }
0x1328   :  { %v1970_v6 = vmul.f32 %v8889_v21, %v1964_v23  ;;  %7082 = vmatpush3.bf16.msra.mxu0 %v8262_v25 }
0x1329   :  { %7084 = vmatprep.subr.bf16.mxu0 %v8265_v27 }
0x132a   :  { %2040 = vmatprep.mubr.f32.mxu0 %v1970_v6 }
0x132b   :  { %2041 = vmatmul.mubr.f32.gmra.mrb[28].mxu0 %v1969_v54 }
0x132c   :  { %7086 = vmatpush3.bf16.msra.mxu0 %v8288_v35 }
0x132d   :  { %7088 = vmatprep.subr.bf16.mxu0 %v8377_v24 }
0x1330   :  { %7090 = vmatpush3.bf16.msra.mxu0 %v8382_v28 }
0x1331   :  { %7092 = vmatprep.subr.bf16.mxu0 %v8395_v32 }
0x1334   :  { %7094 = vmatpush3.bf16.msra.mxu0 %v8400_v34 }
0x1335   :  { %7096 = vmatprep.subr.bf16.mxu0 %v8410_v38 }
0x1338   :  { %7098 = vmatpush3.bf16.msra.mxu0 %v8418_v43 }
0x1339   :  { %7100 = vmatprep.subr.bf16.mxu0 %v9604_v20 }
0x133c   :  { %7102 = vmatpush3.bf16.msra.mxu0 %v9605_v7 }
0x133d   :  { %7104 = vmatprep.subr.bf16.mxu0 %v9606_v3 }
0x1340   :  { %7106 = vmatpush3.bf16.msra.mxu0 %v9607_v9 }
0x1341   :  { %7108 = vmatprep.subr.bf16.mxu0 %v9608_v59 }
0x1344   :  { %7110 = vmatpush3.bf16.msra.mxu0 %v9609_v37 }
0x1345   :  { %7144 = vmatprep.subr.bf16.mxu0 %v8656_v45 }
0x13fa   :  { %v6043_v47 = vpop.f32.mrb[26].mxu0 }
0x13fb   :  { %v6044_v55 = vpop.f32.mrb[27].mxu0 }
0x13fc   :  { %v6045_v51 = vadd.f32 %v6044_v55, %v6043_v47  ;;  %v9615_v47 = vld [vmem:[#allocation26_spill] sm:$0xff] }
0x13fe   :  { %v6046_v29 = vpop.f32.mrb[28].mxu0  ;;  %6565 = vmatprep.mubr.msk.f32.mxu1 %vm238_vm1, %v6045_v51 }
0x13ff   :  { %v6047_v61 = vpop.f32.mrb[29].mxu0 }
0x1400   :  { %v6048_v58 = vadd.f32 %v6047_v61, %v6046_v29 }
0x1402   :  { %6566 = vmatmul.mubr.msk.f32.vlgmr.msra.gmra.mrb[26].mxu1 %vm238_vm1, %v6048_v58 }
0x1403   :  { %7058 = vmatpush3.bf16.msra.mxu1 %v8684_v56  ;;  %6576 = vmatprep.mubr.msk.f32.mxu1 %vm238_vm1, %v8840_v60  ;;  %v2204_v60 = vld [vmem:[#allocation4 + $0x28] sm:$0xff] }
0x1404   :  { %7060 = vmatprep.subr.bf16.mxu1 %v8688_v0 }
0x1407   :  { %7062 = vmatpush3.bf16.msra.mxu1 %v8688_v0 }
0x1408   :  { %7064 = vmatprep.subr.bf16.mxu1 %v8133_v39 }
0x140a   :  { %6577 = vmatmul.mubr.msk.f32.vlgmr.msra.gmra.mrb[26].mxu1 %vm238_vm1, %v8847_v42 }
0x140b   :  { %7066 = vmatpush1.bf16.msra.mxu1 %v8135_v40  ;;  %2331 = vmatprep.mubr.f32.mxu1 %v9602_v44 }
0x140c   :  { %7068 = vmatprep.subr.bf16.mxu1 %v8150_v46 }
0x140f   :  { %7070 = vmatpush1.bf16.msra.mxu1 %v8159_v49 }
0x1410   :  { %7072 = vmatprep.subr.bf16.mxu1 %v8177_v57 }
0x14dd   :  { %v6578_v16 = vpop.f32.mrb[26].mxu1 }
0x14de   :  { %v2206_v23 = vadd.f32 %v6578_v16, %v2204_v60  ;;  %v2193_v6 = vpop.f32.mrb[27].mxu1 }
0x14df   :  { %v2205_v54 = vadd.f32 %v2203_v10, %v2193_v6 }
0x14e0   :  { %v2208_v55 = vadd.f32 %v9615_v47, %v2206_v23 }
0x14e1   :  { %v2207_v42 = vadd.f32 %v9615_v47, %v2205_v54 }
0x14e2   :  { %7700 = vtanh.f32 %v2208_v55  ;;  %v5731_v58 = vmul.f32 -1.442695, %v2208_v55 }
0x14e3   :  { %7702 = vtanh.f32 %v2207_v42  ;;  %v5730_v61 = vmul.f32 -1.442695, %v2207_v42 }
0x14e5   :  { %7704 = vpow2.f32 %v5730_v61 }
0x14e6   :  { %7706 = vpow2.f32 %v5731_v58 }
0x14ec   :  { %v7701_v51 = vpop.eup %7700 }
0x14ed   :  { %v7703_v29 = vpop.eup %7702  ;;  %2229 = vrot.lane.b32.xlu1 %v7701_v51, %s7968_s3 }
0x14ee   :  { %2227 = vrot.lane.b32.xlu0 %v7703_v29, %s7968_s3 }
0x14ef   :  { %v7705_v57 = vpop.eup %7704 }
0x14f0   :  { %v2215_v60 = vadd.f32 1.0, %v7705_v57  ;;  %v7707_v16 = vpop.eup %7706 }
0x14f1   :  { %v2216_v10 = vadd.f32 1.0, %v7707_v16 }
0x14f2   :  { %7708 = vrcp.f32 %v2215_v60 }
0x14f3   :  { %7710 = vrcp.f32 %v2216_v10 }
0x14fc   :  { %v7709_v23 = vpop.eup %7708 }
0x14fd   :  { %v7711_v49 = vpop.eup %7710  ;;  %v2223_v55 = vmul.f32 %v7709_v23, %v8817_v17 }
0x14fe   :  { %v2224_v57 = vmul.f32 %v7711_v49, %v8821_v18 }
0x155f   :  { %v2230_v47 = vpop.permute.xlu1 %2229 }
0x1560   :  { %v2228_v6 = vpop.permute.xlu0 %2227  ;;  %v2234_v51 = vmul.f32 %v7711_v49, %v2230_v47 }
0x1561   :  { %v2233_v54 = vmul.f32 %v7709_v23, %v2228_v6 }
0x1563   :  { %2237 = vrot.lane.b32.xlu1 %v2233_v54, %s7969_s11 }
0x1567   :  { %2239 = vrot.lane.b32.xlu1 %v2234_v51, %s7969_s11  ;;  %v8969_v51 = vld [vmem:[%s9526_s2 + $0x280] sm:$0xff] }
0x1568   :  { %9617 = vst [vmem:[#allocation14_spill] sm:$0xff] %v8969_v51 }
0x15d5   :  { %v2238_v42 = vpop.permute.xlu1 %2237 }
0x15d6   :  { %v8933_v29 = vadd.f32 %v2238_v42, %v2223_v55 }
0x15d8   :  { %7712 = vtanh.f32 %v8933_v29 }
0x15d9   :  { %v2240_v61 = vpop.permute.xlu1 %2239 }
0x15da   :  { %v8937_v58 = vadd.f32 %v2240_v61, %v2224_v57 }
0x15dc   :  { %7714 = vtanh.f32 %v8937_v58 }
0x15e2   :  { %v7713_v60 = vpop.eup %7712 }
0x15e3   :  { %2249 = vrot.lane.b32.xlu0 %v7713_v60, %s7968_s3  ;;  %v9618_v60 = vld [vmem:[#allocation20_spill] sm:$0xff] }
0x15e6   :  { %v7715_v16 = vpop.eup %7714 }
0x15e7   :  { %2251 = vrot.lane.b32.xlu1 %v7715_v16, %s7968_s3  ;;  %2259 = vrot.lane.b32.xlu0 %v8933_v29, %s7970_s0 }
0x15eb   :  { %2261 = vrot.lane.b32.xlu1 %v8937_v58, %s7970_s0 }
0x1655   :  { %v2250_v17 = vpop.permute.xlu0 %2249 }
0x1656   :  { %v2255_v10 = vmul.f32 %v7709_v23, %v2250_v17 }
0x1658   :  { %2346 = vrot.lane.b32.xlu0 %v2255_v10, %s7969_s11  ;;  %v9619_v10 = vld [vmem:[#allocation21_spill] sm:$0xff] }
0x1659   :  { %v2252_v18 = vpop.permute.xlu1 %2251  ;;  %v2260_v6 = vpop.permute.xlu0 %2259 }
0x165a   :  { %v2256_v54 = vmul.f32 %v7711_v49, %v2252_v18  ;;  %5732 = vmatmul.mubr.msk.f32.vlgmr.msra.gmra.mrb[28].mxu1 %vm238_vm1, %v2260_v6  ;;  %v8958_v49 = vld [vmem:[%s9526_s2 + $0x288] sm:$0xff] }
0x165b   :  { %2337 = vmatprep.mubr.f32.mxu1 %v9602_v44  ;;  %7074 = vmatpush1.bf16.msra.mxu1 %v8192_v62  ;;  %9616 = vst [vmem:[#allocation13_spill] sm:$0xff] %v8958_v49 }
0x165c   :  { %2348 = vrot.lane.b32.xlu1 %v2256_v54, %s7969_s11  ;;  %7076 = vmatprep.subr.bf16.mxu1 %v8198_v2  ;;  %v9620_v54 = vld [vmem:[#allocation22_spill] sm:$0xff] }
0x165d   :  { %v2262_v47 = vpop.permute.xlu1 %2261 }
0x165e   :  { %5733 = vmatmul.mubr.msk.f32.gmra.mrb[30].mxu1 %vm238_vm1, %v2262_v47 }
0x165f   :  { %7078 = vmatpush1.bf16.msra.mxu1 %v8229_v13  ;;  %2418 = vmatprep.mubr.f32.mxu1 %v9602_v44 }
0x1660   :  { %2542 = vmatprep.subr.mxu1 %v8958_v49 }
0x16ca   :  { %v8961_v23 = vpop.permute.xlu0 %2346 }
0x16cb   :  { %5734 = vmatmul.mubr.msk.f32.vlgmr.msra.gmra.mrb[28].mxu1 %vm238_vm1, %v8961_v23 }
0x16cc   :  { %2424 = vmatprep.mubr.f32.mxu1 %v9602_v44  ;;  %2543 = vmatpush1.msra.mxu1 %v8969_v51 }
0x16cd   :  { %7112 = vmatprep.subr.bf16.mxu1 %v8514_v30 }
0x16ce   :  { %v8973_v55 = vpop.permute.xlu1 %2348 }
0x16cf   :  { %5735 = vmatmul.mubr.msk.f32.gmra.mrb[30].mxu1 %vm238_vm1, %v8973_v55 }
0x16d0   :  { %2606 = vmatprep.mubr.f32.mxu1 %v9602_v44 }
0x179e   :  { %v2420_v42 = vpop.f32.mrb[28].mxu1 }
0x179f   :  { %v2431_v57 = vadd.f32 %v2420_v42, %v8479_v22  ;;  %v2422_v61 = vpop.f32.mrb[29].mxu1  ;;  %v9621_v22 = vld [vmem:[#allocation25_spill] sm:$0xff] }
0x17a0   :  { %v2432_v16 = vadd.f32 %v2422_v61, %v9618_v60 }
0x17a2   :  { %7716 = vtanh.f32 %v2432_v16  ;;  %v2426_v17 = vpop.f32.mrb[30].mxu1 }
0x17a3   :  { %7718 = vtanh.f32 %v2431_v57  ;;  %v2433_v18 = vadd.f32 %v2426_v17, %v9619_v10  ;;  %v2428_v6 = vpop.f32.mrb[31].mxu1 }
0x17a4   :  { %v2434_v47 = vadd.f32 %v2428_v6, %v9620_v54 }
0x17a6   :  { %7720 = vtanh.f32 %v2434_v47 }
0x17a7   :  { %7722 = vtanh.f32 %v2433_v18 }
0x17ac   :  { %v7717_v30 = vpop.eup %7716 }
0x17ad   :  { %v7719_v51 = vpop.eup %7718  ;;  %2503 = vmatprep.mubr.f32.mxu0 %v7717_v30 }
0x17ae   :  { %2504 = vmatmul.mubr.f32.vlgmr.msra.gmra.mrb[30].mxu0 %v7719_v51 }
0x17af   :  { %7146 = vmatpush3.bf16.msra.mxu0 %v8656_v45 }
0x17b0   :  { %v7721_v42 = vpop.eup %7720  ;;  %7148 = vmatprep.subr.bf16.mxu0 %v9621_v22 }
0x17b1   :  { %v7723_v61 = vpop.eup %7722  ;;  %2508 = vmatprep.mubr.f32.mxu0 %v7721_v42 }
0x17b2   :  { %2509 = vmatmul.mubr.f32.gmra.mrb[32].mxu0 %v7723_v61 }
0x17b3   :  { %7150 = vmatpush3.bf16.msra.mxu0 %v9621_v22 }
0x17b4   :  { %7152 = vmatprep.subr.bf16.mxu0 %v8684_v56 }
0x1881   :  { %v6093_v57 = vpop.f32.mrb[30].mxu0 }
0x1882   :  { %v6094_v16 = vpop.f32.mrb[31].mxu0 }
0x1883   :  { %v6095_v17 = vadd.f32 %v6094_v16, %v6093_v57 }
0x1885   :  { %v6096_v18 = vpop.f32.mrb[32].mxu0  ;;  %v2514_v6 = vsel %vm511_vm0, %v6095_v17, -inf }
0x1886   :  { %2515 = vmax.xlane.f32.xlu0 %v2514_v6  ;;  %v6097_v30 = vpop.f32.mrb[33].mxu0 }
0x1887   :  { %v6098_v51 = vadd.f32 %v6097_v30, %v6096_v18 }
0x1889   :  { %v2517_v47 = vsel %vm511_vm0, %v6098_v51, -inf }
0x188a   :  { %2518 = vmax.xlane.f32.xlu1 %v2517_v47 }
0x1913   :  { %v2516_v54 = vpop.xlane.xlu0 %2515 }
0x1914   :  { %v2520_v10 = vsub.f32 %v6095_v17, %v2516_v54 }
0x1916   :  { %v2522_v42 = vmul.f32 1.442695, %v2520_v10 }
0x1917   :  { %v2519_v61 = vpop.xlane.xlu1 %2518 }
0x1918   :  { %7724 = vpow2.f32 %v2522_v42  ;;  %v2521_v22 = vsub.f32 %v6098_v51, %v2519_v61 }
0x191a   :  { %v2524_v60 = vmul.f32 1.442695, %v2521_v22 }
0x191c   :  { %7726 = vpow2.f32 %v2524_v60 }
0x1922   :  { %v7725_v49 = vpop.eup %7724 }
0x1923   :  { %v2526_v57 = vsel %vm511_vm0, %v7725_v49, 0.0 }
0x1924   :  { %2527 = vadd.xlane.f32.xlu0 %v2526_v57 }
0x1926   :  { %v7727_v16 = vpop.eup %7726 }
0x1927   :  { %v2529_v6 = vsel %vm511_vm0, %v7727_v16, 0.0 }
0x1928   :  { %2530 = vadd.xlane.f32.xlu0 %v2529_v6 }
0x19b1   :  { %v2528_v18 = vpop.xlane.xlu0 %2527 }
0x19b2   :  { %7728 = vrcp.f32 %v2528_v18 }
0x19b5   :  { %v2531_v30 = vpop.xlane.xlu0 %2530 }
0x19b6   :  { %7730 = vrcp.f32 %v2531_v30 }
0x19bc   :  { %v7729_v47 = vpop.eup %7728 }
0x19bd   :  { %v2534_v54 = vmul.f32 %v7729_v47, %v7725_v49 }
0x19bf   :  { %5736 = vmatmul.mubr.msk.f32.vlgmr.msra.gmra.mrb[32].mxu1 %vm511_vm0, %v2534_v54 }
0x19c0   :  { %v7731_v10 = vpop.eup %7730  ;;  %2612 = vmatprep.mubr.f32.mxu1 %v9602_v44  ;;  %7114 = vmatpush3.bf16.msra.mxu1 %v8529_v50 }
0x19c1   :  { %v2535_v22 = vmul.f32 %v7731_v10, %v7727_v16  ;;  %7116 = vmatprep.subr.bf16.mxu1 %v8531_v53 }
0x19c3   :  { %5737 = vmatmul.mubr.msk.f32.gmra.mrb[34].mxu1 %vm511_vm0, %v2535_v22  ;;  %v9622_v22 = vld [vmem:[#allocation9_spill] sm:$0xff] }
0x19c4   :  { %7118 = vmatpush3.bf16.msra.mxu1 %v8548_v1 }
0x19c5   :  { %7120 = vmatprep.subr.bf16.mxu1 %v8551_v5 }
0x19c8   :  { %7122 = vmatpush3.bf16.msra.mxu1 %v8567_v11 }
0x19c9   :  { %7124 = vmatprep.subr.bf16.mxu1 %v8570_v12 }
0x19cc   :  { %7126 = vmatpush3.bf16.msra.mxu1 %v8585_v31 }
0x19cd   :  { %7128 = vmatprep.subr.bf16.mxu1 %v8588_v36 }
0x19d0   :  { %7130 = vmatpush3.bf16.msra.mxu1 %v8603_v48 }
0x19d1   :  { %7132 = vmatprep.subr.bf16.mxu1 %v8606_v52 }
0x19d4   :  { %7134 = vmatpush3.bf16.msra.mxu1 %v8621_v63 }
0x19d5   :  { %7136 = vmatprep.subr.bf16.mxu1 %v8624_v4 }
0x19d8   :  { %7138 = vmatpush3.bf16.msra.mxu1 %v8633_v8 }
0x19d9   :  { %7140 = vmatprep.subr.bf16.mxu1 %v8643_v15 }
0x19dc   :  { %7142 = vmatpush3.bf16.msra.mxu1 %v8651_v41 }
0x19dd   :  { %7176 = vmatprep.subr.bf16.mxu1 %v8242_v19 }
0x1a92   :  { %v2608_v49 = vpop.f32.mrb[32].mxu1 }
0x1a93   :  { %v2610_v60 = vpop.f32.mrb[33].mxu1  ;;  %v2619_v51 = vmul.f32 %v8886_v14, %v2608_v49  ;;  %v9623_v49 = vld [vmem:[#allocation10_spill] sm:$0xff] }
0x1a94   :  { %v2620_v17 = vmul.f32 %v8883_v26, %v2610_v60  ;;  %v2855_v60 = vld [vmem:[#allocation4 + $0x30] sm:$0xff] }
0x1a96   :  { %v2614_v42 = vpop.f32.mrb[34].mxu1  ;;  %2687 = vmatprep.mubr.f32.mxu1 %v2620_v17 }
0x1a97   :  { %v2616_v61 = vpop.f32.mrb[35].mxu1  ;;  %2688 = vmatmul.mubr.f32.vlgmr.msra.gmra.mrb[36].mxu1 %v2619_v51  ;;  %v2621_v16 = vmul.f32 %v8893_v33, %v2614_v42 }
0x1a98   :  { %v2622_v57 = vmul.f32 %v8889_v21, %v2616_v61  ;;  %7178 = vmatpush3.bf16.msra.mxu1 %v8262_v25 }
0x1a99   :  { %7180 = vmatprep.subr.bf16.mxu1 %v8265_v27 }
0x1a9a   :  { %2692 = vmatprep.mubr.f32.mxu1 %v2622_v57  ;;  %v9044_v57 = vld [vmem:[#allocation6 + $0x40] ss:$0 sm:$0xff] }
0x1a9b   :  { %2693 = vmatmul.mubr.f32.gmra.mrb[38].mxu1 %v2621_v16  ;;  %9624 = vst [vmem:[#allocation15_spill] sm:$0xff] %v9044_v57 }
0x1a9c   :  { %7182 = vmatpush3.bf16.msra.mxu1 %v8288_v35 }
0x1a9d   :  { %7184 = vmatprep.subr.bf16.mxu1 %v8377_v24 }
0x1aa0   :  { %7186 = vmatpush3.bf16.msra.mxu1 %v8382_v28 }
0x1aa1   :  { %7188 = vmatprep.subr.bf16.mxu1 %v8395_v32 }
0x1aa4   :  { %7190 = vmatpush3.bf16.msra.mxu1 %v8400_v34 }
0x1aa5   :  { %7192 = vmatprep.subr.bf16.mxu1 %v8410_v38 }
0x1aa8   :  { %7194 = vmatpush3.bf16.msra.mxu1 %v8418_v43 }
0x1aa9   :  { %7196 = vmatprep.subr.bf16.mxu1 %v9604_v20 }
0x1aac   :  { %7198 = vmatpush3.bf16.msra.mxu1 %v9605_v7 }
0x1aad   :  { %7200 = vmatprep.subr.bf16.mxu1 %v9606_v3 }
0x1ab0   :  { %7202 = vmatpush3.bf16.msra.mxu1 %v9607_v9 }
0x1ab1   :  { %7204 = vmatprep.subr.bf16.mxu1 %v9608_v59 }
0x1ab4   :  { %7206 = vmatpush3.bf16.msra.mxu1 %v9609_v37 }
0x1ab5   :  { %7240 = vmatprep.subr.bf16.mxu1 %v8656_v45 }
0x1b6a   :  { %v6131_v6 = vpop.f32.mrb[36].mxu1 }
0x1b6b   :  { %v6132_v18 = vpop.f32.mrb[37].mxu1 }
0x1b6c   :  { %v6133_v30 = vadd.f32 %v6132_v18, %v6131_v6 }
0x1b6e   :  { %v6134_v47 = vpop.f32.mrb[38].mxu1  ;;  %6587 = vmatprep.mubr.msk.f32.mxu0 %vm238_vm1, %v6133_v30 }
0x1b6f   :  { %v6135_v54 = vpop.f32.mrb[39].mxu1 }
0x1b70   :  { %v6136_v10 = vadd.f32 %v6135_v54, %v6134_v47 }
0x1b72   :  { %6588 = vmatmul.mubr.msk.f32.vlgmr.msra.gmra.mrb[34].mxu0 %vm238_vm1, %v6136_v10 }
0x1b73   :  { %7154 = vmatpush3.bf16.msra.mxu0 %v8684_v56  ;;  %6598 = vmatprep.mubr.msk.f32.mxu0 %vm238_vm1, %v8961_v23  ;;  %v2856_v23 = vld [vmem:[#allocation4 + $0x38] sm:$0xff] }
0x1b74   :  { %7156 = vmatprep.subr.bf16.mxu0 %v8688_v0 }
0x1b77   :  { %7158 = vmatpush3.bf16.msra.mxu0 %v8688_v0 }
0x1b78   :  { %7160 = vmatprep.subr.bf16.mxu0 %v8133_v39 }
0x1b7a   :  { %6599 = vmatmul.mubr.msk.f32.vlgmr.msra.gmra.mrb[34].mxu0 %vm238_vm1, %v8973_v55 }
0x1b7b   :  { %7162 = vmatpush1.bf16.msra.mxu0 %v8135_v40  ;;  %2983 = vmatprep.mubr.f32.mxu0 %v9602_v44 }
0x1b7c   :  { %7164 = vmatprep.subr.bf16.mxu0 %v8150_v46 }
0x1b7f   :  { %7166 = vmatpush1.bf16.msra.mxu0 %v9622_v22 }
0x1b80   :  { %7168 = vmatprep.subr.bf16.mxu0 %v9623_v49 }
0x1c4d   :  { %v6600_v17 = vpop.f32.mrb[34].mxu0 }
0x1c4e   :  { %v2858_v51 = vadd.f32 %v6600_v17, %v2856_v23  ;;  %v2845_v42 = vpop.f32.mrb[35].mxu0 }
0x1c4f   :  { %v2857_v61 = vadd.f32 %v2855_v60, %v2845_v42 }
0x1c50   :  { %v2860_v55 = vadd.f32 %v9044_v57, %v2858_v51 }
0x1c51   :  { %v2859_v16 = vadd.f32 %v9044_v57, %v2857_v61 }
0x1c52   :  { %7732 = vtanh.f32 %v2860_v55  ;;  %v5743_v47 = vmul.f32 -1.442695, %v2860_v55 }
0x1c53   :  { %7734 = vtanh.f32 %v2859_v16  ;;  %v5742_v30 = vmul.f32 -1.442695, %v2859_v16 }
0x1c55   :  { %7736 = vpow2.f32 %v5742_v30 }
0x1c56   :  { %7738 = vpow2.f32 %v5743_v47 }
0x1c5c   :  { %v7733_v6 = vpop.eup %7732 }
0x1c5d   :  { %v7735_v18 = vpop.eup %7734  ;;  %2881 = vrot.lane.b32.xlu1 %v7733_v6, %s7968_s3 }
0x1c5e   :  { %2879 = vrot.lane.b32.xlu0 %v7735_v18, %s7968_s3 }
0x1c5f   :  { %v7737_v54 = vpop.eup %7736 }
0x1c60   :  { %v2867_v10 = vadd.f32 1.0, %v7737_v54  ;;  %v7739_v23 = vpop.eup %7738 }
0x1c61   :  { %v2868_v60 = vadd.f32 1.0, %v7739_v23 }
0x1c62   :  { %7740 = vrcp.f32 %v2867_v10 }
0x1c63   :  { %7742 = vrcp.f32 %v2868_v60 }
0x1c6c   :  { %v7741_v17 = vpop.eup %7740 }
0x1c6d   :  { %v7743_v57 = vpop.eup %7742  ;;  %v2875_v55 = vmul.f32 %v7741_v17, %v8933_v29 }
0x1c6e   :  { %v2876_v30 = vmul.f32 %v7743_v57, %v8937_v58 }
0x1ccf   :  { %v2882_v61 = vpop.permute.xlu1 %2881 }
0x1cd0   :  { %v2880_v51 = vpop.permute.xlu0 %2879  ;;  %v2886_v6 = vmul.f32 %v7743_v57, %v2882_v61 }
0x1cd1   :  { %v2885_v42 = vmul.f32 %v7741_v17, %v2880_v51 }
0x1cd3   :  { %2889 = vrot.lane.b32.xlu1 %v2885_v42, %s7969_s11 }
0x1cd7   :  { %2891 = vrot.lane.b32.xlu1 %v2886_v6, %s7969_s11  ;;  %v9626_v6 = vld [vmem:[#allocation14_spill] sm:$0xff] }
0x1d45   :  { %v2890_v16 = vpop.permute.xlu1 %2889 }
0x1d46   :  { %v9053_v18 = vadd.f32 %v2890_v16, %v2875_v55  ;;  %v9627_v55 = vld [vmem:[#allocation23_spill] sm:$0xff] }
0x1d48   :  { %7744 = vtanh.f32 %v9053_v18 }
0x1d49   :  { %v2892_v47 = vpop.permute.xlu1 %2891 }
0x1d4a   :  { %v9057_v54 = vadd.f32 %v2892_v47, %v2876_v30  ;;  %v9628_v47 = vld [vmem:[#allocation19_spill] sm:$0xff] }
0x1d4c   :  { %7746 = vtanh.f32 %v9057_v54 }
0x1d52   :  { %v7745_v10 = vpop.eup %7744 }
0x1d53   :  { %2901 = vrot.lane.b32.xlu0 %v7745_v10, %s7968_s3 }
0x1d56   :  { %v7747_v23 = vpop.eup %7746 }
0x1d57   :  { %2903 = vrot.lane.b32.xlu1 %v7747_v23, %s7968_s3  ;;  %2911 = vrot.lane.b32.xlu0 %v9053_v18, %s7970_s0 }
0x1d5b   :  { %2913 = vrot.lane.b32.xlu1 %v9057_v54, %s7970_s0 }
0x1dc5   :  { %v2902_v29 = vpop.permute.xlu0 %2901 }
0x1dc6   :  { %v2907_v60 = vmul.f32 %v7741_v17, %v2902_v29  ;;  %v9625_v17 = vld [vmem:[#allocation13_spill] sm:$0xff]  ;;  %v9629_v29 = vld [vmem:[#allocation20_spill] sm:$0xff] }
0x1dc8   :  { %2998 = vrot.lane.b32.xlu0 %v2907_v60, %s7969_s11 }
0x1dc9   :  { %v2904_v58 = vpop.permute.xlu1 %2903  ;;  %v2912_v51 = vpop.permute.xlu0 %2911 }
0x1dca   :  { %v2908_v42 = vmul.f32 %v7743_v57, %v2904_v58  ;;  %5744 = vmatmul.mubr.msk.f32.vlgmr.msra.gmra.mrb[36].mxu0 %vm238_vm1, %v2912_v51  ;;  %v9630_v51 = vld [vmem:[#allocation21_spill] sm:$0xff] }
0x1dcb   :  { %2989 = vmatprep.mubr.f32.mxu0 %v9602_v44  ;;  %7170 = vmatpush1.bf16.msra.mxu0 %v8192_v62 }
0x1dcc   :  { %3000 = vrot.lane.b32.xlu1 %v2908_v42, %s7969_s11  ;;  %7172 = vmatprep.subr.bf16.mxu0 %v8198_v2 }
0x1dcd   :  { %v2914_v61 = vpop.permute.xlu1 %2913 }
0x1dce   :  { %5745 = vmatmul.mubr.msk.f32.gmra.mrb[38].mxu0 %vm238_vm1, %v2914_v61 }
0x1dcf   :  { %7174 = vmatpush1.bf16.msra.mxu0 %v8229_v13  ;;  %3070 = vmatprep.mubr.f32.mxu0 %v9602_v44 }
0x1dd0   :  { %3194 = vmatprep.subr.mxu0 %v9625_v17 }
0x1e3a   :  { %v9076_v57 = vpop.permute.xlu0 %2998 }
0x1e3b   :  { %5746 = vmatmul.mubr.msk.f32.vlgmr.msra.gmra.mrb[36].mxu0 %vm238_vm1, %v9076_v57 }
0x1e3c   :  { %3076 = vmatprep.mubr.f32.mxu0 %v9602_v44  ;;  %3195 = vmatpush1.msra.mxu0 %v9626_v6 }
0x1e3d   :  { %7208 = vmatprep.subr.bf16.mxu0 %v9627_v55  ;;  %v9631_v55 = vld [vmem:[#allocation22_spill] sm:$0xff] }
0x1e3e   :  { %v9083_v16 = vpop.permute.xlu1 %3000 }
0x1e3f   :  { %5747 = vmatmul.mubr.msk.f32.gmra.mrb[38].mxu0 %vm238_vm1, %v9083_v16 }
0x1e40   :  { %3258 = vmatprep.mubr.f32.mxu0 %v9602_v44 }
0x1f0e   :  { %v3072_v30 = vpop.f32.mrb[36].mxu0 }
0x1f0f   :  { %v3083_v10 = vadd.f32 %v3072_v30, %v9628_v47  ;;  %v3074_v23 = vpop.f32.mrb[37].mxu0  ;;  %v9632_v47 = vld [vmem:[#allocation25_spill] sm:$0xff] }
0x1f10   :  { %v3084_v60 = vadd.f32 %v3074_v23, %v9629_v29 }
0x1f12   :  { %7748 = vtanh.f32 %v3084_v60  ;;  %v3078_v58 = vpop.f32.mrb[38].mxu0 }
0x1f13   :  { %7750 = vtanh.f32 %v3083_v10  ;;  %v3085_v42 = vadd.f32 %v3078_v58, %v9630_v51  ;;  %v3080_v61 = vpop.f32.mrb[39].mxu0 }
0x1f14   :  { %v3086_v6 = vadd.f32 %v3080_v61, %v9631_v55 }
0x1f16   :  { %7752 = vtanh.f32 %v3086_v6 }
0x1f17   :  { %7754 = vtanh.f32 %v3085_v42 }
0x1f1c   :  { %v7749_v17 = vpop.eup %7748 }
0x1f1d   :  { %v7751_v13 = vpop.eup %7750  ;;  %3155 = vmatprep.mubr.f32.mxu1 %v7749_v17 }
0x1f1e   :  { %3156 = vmatmul.mubr.f32.vlgmr.msra.gmra.mrb[40].mxu1 %v7751_v13 }
0x1f1f   :  { %7242 = vmatpush3.bf16.msra.mxu1 %v8656_v45 }
0x1f20   :  { %v7753_v30 = vpop.eup %7752  ;;  %7244 = vmatprep.subr.bf16.mxu1 %v9632_v47 }
0x1f21   :  { %v7755_v23 = vpop.eup %7754  ;;  %3160 = vmatprep.mubr.f32.mxu1 %v7753_v30 }
0x1f22   :  { %3161 = vmatmul.mubr.f32.gmra.mrb[42].mxu1 %v7755_v23 }
0x1f23   :  { %7246 = vmatpush3.bf16.msra.mxu1 %v9632_v47 }
0x1f24   :  { %7248 = vmatprep.subr.bf16.mxu1 %v8684_v56 }
0x1ff1   :  { %v6181_v10 = vpop.f32.mrb[40].mxu1 }
0x1ff2   :  { %v6182_v60 = vpop.f32.mrb[41].mxu1 }
0x1ff3   :  { %v6183_v6 = vadd.f32 %v6182_v60, %v6181_v10 }
0x1ff5   :  { %v6184_v58 = vpop.f32.mrb[42].mxu1  ;;  %v3166_v42 = vsel %vm511_vm0, %v6183_v6, -inf }
0x1ff6   :  { %3167 = vmax.xlane.f32.xlu0 %v3166_v42  ;;  %v6185_v13 = vpop.f32.mrb[43].mxu1 }
0x1ff7   :  { %v6186_v17 = vadd.f32 %v6185_v13, %v6184_v58 }
0x1ff9   :  { %v3169_v61 = vsel %vm511_vm0, %v6186_v17, -inf }
0x1ffa   :  { %3170 = vmax.xlane.f32.xlu1 %v3169_v61 }
0x2083   :  { %v3168_v55 = vpop.xlane.xlu0 %3167 }
0x2084   :  { %v3172_v51 = vsub.f32 %v6183_v6, %v3168_v55 }
0x2086   :  { %v3174_v30 = vmul.f32 1.442695, %v3172_v51 }
0x2087   :  { %v3171_v23 = vpop.xlane.xlu1 %3170 }
0x2088   :  { %7756 = vpow2.f32 %v3174_v30  ;;  %v3173_v47 = vsub.f32 %v6186_v17, %v3171_v23 }
0x208a   :  { %v3176_v29 = vmul.f32 1.442695, %v3173_v47 }
0x208c   :  { %7758 = vpow2.f32 %v3176_v29 }
0x2092   :  { %v7757_v2 = vpop.eup %7756 }
0x2093   :  { %v3178_v10 = vsel %vm511_vm0, %v7757_v2, 0.0 }
0x2094   :  { %3179 = vadd.xlane.f32.xlu0 %v3178_v10 }
0x2096   :  { %v7759_v60 = vpop.eup %7758 }
0x2097   :  { %v3181_v42 = vsel %vm511_vm0, %v7759_v60, 0.0 }
0x2098   :  { %3182 = vadd.xlane.f32.xlu0 %v3181_v42 }
0x2121   :  { %v3180_v58 = vpop.xlane.xlu0 %3179 }
0x2122   :  { %7760 = vrcp.f32 %v3180_v58 }
0x2125   :  { %v3183_v13 = vpop.xlane.xlu0 %3182 }
0x2126   :  { %7762 = vrcp.f32 %v3183_v13  ;;  %v3507_v13 = vld [vmem:[#allocation4 + $0x40] sm:$0xff] }
0x212c   :  { %v7761_v61 = vpop.eup %7760 }
0x212d   :  { %v3186_v55 = vmul.f32 %v7761_v61, %v7757_v2 }
0x212f   :  { %5748 = vmatmul.mubr.msk.f32.vlgmr.msra.gmra.mrb[40].mxu0 %vm511_vm0, %v3186_v55 }
0x2130   :  { %v7763_v51 = vpop.eup %7762  ;;  %3264 = vmatprep.mubr.f32.mxu0 %v9602_v44  ;;  %7210 = vmatpush3.bf16.msra.mxu0 %v8529_v50 }
0x2131   :  { %v3187_v47 = vmul.f32 %v7763_v51, %v7759_v60  ;;  %7212 = vmatprep.subr.bf16.mxu0 %v8531_v53 }
0x2133   :  { %5749 = vmatmul.mubr.msk.f32.gmra.mrb[42].mxu0 %vm511_vm0, %v3187_v47 }
0x2134   :  { %7214 = vmatpush3.bf16.msra.mxu0 %v8548_v1 }
0x2135   :  { %7216 = vmatprep.subr.bf16.mxu0 %v8551_v5 }
0x2138   :  { %7218 = vmatpush3.bf16.msra.mxu0 %v8567_v11 }
0x2139   :  { %7220 = vmatprep.subr.bf16.mxu0 %v8570_v12 }
0x213c   :  { %7222 = vmatpush3.bf16.msra.mxu0 %v8585_v31 }
0x213d   :  { %7224 = vmatprep.subr.bf16.mxu0 %v8588_v36 }
0x2140   :  { %7226 = vmatpush3.bf16.msra.mxu0 %v8603_v48 }
0x2141   :  { %7228 = vmatprep.subr.bf16.mxu0 %v8606_v52 }
0x2144   :  { %7230 = vmatpush3.bf16.msra.mxu0 %v8621_v63 }
0x2145   :  { %7232 = vmatprep.subr.bf16.mxu0 %v8624_v4 }
0x2148   :  { %7234 = vmatpush3.bf16.msra.mxu0 %v8633_v8 }
0x2149   :  { %7236 = vmatprep.subr.bf16.mxu0 %v8643_v15 }
0x214c   :  { %7238 = vmatpush3.bf16.msra.mxu0 %v8651_v41 }
0x214d   :  { %7272 = vmatprep.subr.bf16.mxu0 %v8242_v19 }
0x2202   :  { %v3260_v2 = vpop.f32.mrb[40].mxu0 }
0x2203   :  { %v3262_v29 = vpop.f32.mrb[41].mxu0  ;;  %v3271_v17 = vmul.f32 %v8886_v14, %v3260_v2  ;;  %v9633_v2 = vld [vmem:[#allocation15_spill] sm:$0xff] }
0x2204   :  { %v3272_v6 = vmul.f32 %v8883_v26, %v3262_v29 }
0x2206   :  { %v3266_v30 = vpop.f32.mrb[42].mxu0  ;;  %3339 = vmatprep.mubr.f32.mxu0 %v3272_v6 }
0x2207   :  { %v3268_v23 = vpop.f32.mrb[43].mxu0  ;;  %3340 = vmatmul.mubr.f32.vlgmr.msra.gmra.mrb[44].mxu0 %v3271_v17  ;;  %v3273_v60 = vmul.f32 %v8893_v33, %v3266_v30 }
0x2208   :  { %v3274_v10 = vmul.f32 %v8889_v21, %v3268_v23  ;;  %7274 = vmatpush3.bf16.msra.mxu0 %v8262_v25 }
0x2209   :  { %7276 = vmatprep.subr.bf16.mxu0 %v8265_v27 }
0x220a   :  { %3344 = vmatprep.mubr.f32.mxu0 %v3274_v10 }
0x220b   :  { %3345 = vmatmul.mubr.f32.gmra.mrb[46].mxu0 %v3273_v60 }
0x220c   :  { %7278 = vmatpush3.bf16.msra.mxu0 %v8288_v35 }
0x220d   :  { %7280 = vmatprep.subr.bf16.mxu0 %v8377_v24 }
0x2210   :  { %7282 = vmatpush3.bf16.msra.mxu0 %v8382_v28 }
0x2211   :  { %7284 = vmatprep.subr.bf16.mxu0 %v8395_v32 }
0x2214   :  { %7286 = vmatpush3.bf16.msra.mxu0 %v8400_v34 }
0x2215   :  { %7288 = vmatprep.subr.bf16.mxu0 %v8410_v38 }
0x2218   :  { %7290 = vmatpush3.bf16.msra.mxu0 %v8418_v43 }
0x2219   :  { %7292 = vmatprep.subr.bf16.mxu0 %v9604_v20 }
0x221c   :  { %7294 = vmatpush3.bf16.msra.mxu0 %v9605_v7 }
0x221d   :  { %7296 = vmatprep.subr.bf16.mxu0 %v9606_v3 }
0x2220   :  { %7298 = vmatpush3.bf16.msra.mxu0 %v9607_v9 }
0x2221   :  { %7300 = vmatprep.subr.bf16.mxu0 %v9608_v59 }
0x2224   :  { %7302 = vmatpush3.bf16.msra.mxu0 %v9609_v37 }
0x2225   :  { %7336 = vmatprep.subr.bf16.mxu0 %v8656_v45 }
0x22da   :  { %v6219_v26 = vpop.f32.mrb[44].mxu0 }
0x22db   :  { %v6220_v14 = vpop.f32.mrb[45].mxu0 }
0x22dc   :  { %v6221_v21 = vadd.f32 %v6220_v14, %v6219_v26 }
0x22de   :  { %v6222_v33 = vpop.f32.mrb[46].mxu0  ;;  %6609 = vmatprep.mubr.msk.f32.mxu1 %vm238_vm1, %v6221_v21 }
0x22df   :  { %v6223_v42 = vpop.f32.mrb[47].mxu0 }
0x22e0   :  { %v6224_v58 = vadd.f32 %v6223_v42, %v6222_v33 }
0x22e2   :  { %6610 = vmatmul.mubr.msk.f32.vlgmr.msra.gmra.mrb[44].mxu1 %vm238_vm1, %v6224_v58 }
0x22e3   :  { %7250 = vmatpush3.bf16.msra.mxu1 %v8684_v56  ;;  %6620 = vmatprep.mubr.msk.f32.mxu1 %vm238_vm1, %v9076_v57  ;;  %v3508_v57 = vld [vmem:[#allocation4 + $0x48] sm:$0xff] }
0x22e4   :  { %7252 = vmatprep.subr.bf16.mxu1 %v8688_v0 }
0x22e7   :  { %7254 = vmatpush3.bf16.msra.mxu1 %v8688_v0 }
0x22e8   :  { %7256 = vmatprep.subr.bf16.mxu1 %v8133_v39 }
0x22ea   :  { %6621 = vmatmul.mubr.msk.f32.vlgmr.msra.gmra.mrb[44].mxu1 %vm238_vm1, %v9083_v16 }
0x22eb   :  { %7258 = vmatpush1.bf16.msra.mxu1 %v8135_v40  ;;  %3635 = vmatprep.mubr.f32.mxu1 %v9602_v44 }
0x22ec   :  { %7260 = vmatprep.subr.bf16.mxu1 %v8150_v46 }
0x22ef   :  { %7262 = vmatpush1.bf16.msra.mxu1 %v9622_v22 }
0x22f0   :  { %7264 = vmatprep.subr.bf16.mxu1 %v9623_v49 }
0x23bd   :  { %v6622_v61 = vpop.f32.mrb[44].mxu1 }
0x23be   :  { %v3510_v55 = vadd.f32 %v6622_v61, %v3508_v57  ;;  %v3497_v51 = vpop.f32.mrb[45].mxu1 }
0x23bf   :  { %v3509_v47 = vadd.f32 %v3507_v13, %v3497_v51 }
0x23c0   :  { %v3512_v29 = vadd.f32 %v9633_v2, %v3510_v55 }
0x23c1   :  { %v3511_v16 = vadd.f32 %v9633_v2, %v3509_v47 }
0x23c2   :  { %7764 = vtanh.f32 %v3512_v29  ;;  %v5755_v23 = vmul.f32 -1.442695, %v3512_v29 }
0x23c3   :  { %7766 = vtanh.f32 %v3511_v16  ;;  %v5754_v30 = vmul.f32 -1.442695, %v3511_v16 }
0x23c5   :  { %7768 = vpow2.f32 %v5754_v30 }
0x23c6   :  { %7770 = vpow2.f32 %v5755_v23 }
0x23cc   :  { %v7765_v6 = vpop.eup %7764 }
0x23cd   :  { %v7767_v17 = vpop.eup %7766  ;;  %3533 = vrot.lane.b32.xlu1 %v7765_v6, %s7968_s3 }
0x23ce   :  { %3531 = vrot.lane.b32.xlu0 %v7767_v17, %s7968_s3 }
0x23cf   :  { %v7769_v10 = vpop.eup %7768 }
0x23d0   :  { %v3519_v60 = vadd.f32 1.0, %v7769_v10  ;;  %v7771_v26 = vpop.eup %7770 }
0x23d1   :  { %v3520_v14 = vadd.f32 1.0, %v7771_v26 }
0x23d2   :  { %7772 = vrcp.f32 %v3519_v60  ;;  %v9634_v60 = vld [vmem:[#allocation11_spill] sm:$0xff] }
0x23d3   :  { %7774 = vrcp.f32 %v3520_v14  ;;  %v9635_v14 = vld [vmem:[#allocation12_spill] sm:$0xff] }
0x23dc   :  { %v7773_v21 = vpop.eup %7772 }
0x23dd   :  { %v7775_v57 = vpop.eup %7774  ;;  %v3527_v61 = vmul.f32 %v7773_v21, %v9053_v18 }
0x23de   :  { %v3528_v47 = vmul.f32 %v7775_v57, %v9057_v54 }
0x243f   :  { %v3534_v58 = vpop.permute.xlu1 %3533 }
0x2440   :  { %v3532_v33 = vpop.permute.xlu0 %3531  ;;  %v3538_v13 = vmul.f32 %v7775_v57, %v3534_v58  ;;  %v9638_v58 = vld [vmem:[#allocation23_spill] sm:$0xff] }
0x2441   :  { %v3537_v42 = vmul.f32 %v7773_v21, %v3532_v33 }
0x2443   :  { %3541 = vrot.lane.b32.xlu1 %v3537_v42, %s7969_s11  ;;  %v9637_v42 = vld [vmem:[#allocation14_spill] sm:$0xff] }
0x2447   :  { %3543 = vrot.lane.b32.xlu1 %v3538_v13, %s7969_s11 }
0x24b5   :  { %v3542_v55 = vpop.permute.xlu1 %3541 }
0x24b6   :  { %v9161_v51 = vadd.f32 %v3542_v55, %v3527_v61  ;;  %v9639_v61 = vld [vmem:[#allocation19_spill] sm:$0xff] }
0x24b8   :  { %7776 = vtanh.f32 %v9161_v51 }
0x24b9   :  { %v3544_v29 = vpop.permute.xlu1 %3543 }
0x24ba   :  { %v9165_v16 = vadd.f32 %v3544_v29, %v3528_v47  ;;  %v9640_v29 = vld [vmem:[#allocation20_spill] sm:$0xff] }
0x24bc   :  { %7778 = vtanh.f32 %v9165_v16 }
0x24c2   :  { %v7777_v6 = vpop.eup %7776 }
0x24c3   :  { %3553 = vrot.lane.b32.xlu0 %v7777_v6, %s7968_s3 }
0x24c6   :  { %v7779_v17 = vpop.eup %7778 }
0x24c7   :  { %3555 = vrot.lane.b32.xlu1 %v7779_v17, %s7968_s3  ;;  %3563 = vrot.lane.b32.xlu0 %v9161_v51, %s7970_s0 }
0x24cb   :  { %3565 = vrot.lane.b32.xlu1 %v9165_v16, %s7970_s0 }
0x2535   :  { %v3554_v18 = vpop.permute.xlu0 %3553 }
0x2536   :  { %v3559_v30 = vmul.f32 %v7773_v21, %v3554_v18  ;;  %v9636_v21 = vld [vmem:[#allocation13_spill] sm:$0xff] }
0x2537   :  { %v9641_v18 = vld [vmem:[#allocation21_spill] sm:$0xff] }
0x2538   :  { %3650 = vrot.lane.b32.xlu0 %v3559_v30, %s7969_s11 }
0x2539   :  { %v3556_v54 = vpop.permute.xlu1 %3555  ;;  %v3564_v23 = vpop.permute.xlu0 %3563 }
0x253a   :  { %v3560_v10 = vmul.f32 %v7775_v57, %v3556_v54  ;;  %5756 = vmatmul.mubr.msk.f32.vlgmr.msra.gmra.mrb[46].mxu1 %vm238_vm1, %v3564_v23  ;;  %v9642_v23 = vld [vmem:[#allocation22_spill] sm:$0xff] }
0x253b   :  { %3641 = vmatprep.mubr.f32.mxu1 %v9602_v44  ;;  %7266 = vmatpush1.bf16.msra.mxu1 %v8192_v62 }
0x253c   :  { %3652 = vrot.lane.b32.xlu1 %v3560_v10, %s7969_s11  ;;  %7268 = vmatprep.subr.bf16.mxu1 %v9634_v60 }
0x253d   :  { %v3566_v26 = vpop.permute.xlu1 %3565 }
0x253e   :  { %5757 = vmatmul.mubr.msk.f32.gmra.mrb[48].mxu1 %vm238_vm1, %v3566_v26 }
0x253f   :  { %7270 = vmatpush1.bf16.msra.mxu1 %v9635_v14  ;;  %3722 = vmatprep.mubr.f32.mxu1 %v9602_v44 }
0x2540   :  { %3846 = vmatprep.subr.mxu1 %v9636_v21 }
0x25aa   :  { %v9184_v33 = vpop.permute.xlu0 %3650 }
0x25ab   :  { %5758 = vmatmul.mubr.msk.f32.vlgmr.msra.gmra.mrb[46].mxu1 %vm238_vm1, %v9184_v33 }
0x25ac   :  { %3728 = vmatprep.mubr.f32.mxu1 %v9602_v44  ;;  %3847 = vmatpush1.msra.mxu1 %v9637_v42 }
0x25ad   :  { %7304 = vmatprep.subr.bf16.mxu1 %v9638_v58 }
0x25ae   :  { %v9191_v57 = vpop.permute.xlu1 %3652 }
0x25af   :  { %5759 = vmatmul.mubr.msk.f32.gmra.mrb[48].mxu1 %vm238_vm1, %v9191_v57 }
0x25b0   :  { %3910 = vmatprep.mubr.f32.mxu1 %v9602_v44 }
0x267e   :  { %v3724_v13 = vpop.f32.mrb[46].mxu1 }
0x267f   :  { %v3735_v55 = vadd.f32 %v3724_v13, %v9639_v61  ;;  %v3726_v47 = vpop.f32.mrb[47].mxu1  ;;  %v9643_v13 = vld [vmem:[#allocation25_spill] sm:$0xff] }
0x2680   :  { %v3736_v6 = vadd.f32 %v3726_v47, %v9640_v29 }
0x2682   :  { %7780 = vtanh.f32 %v3736_v6  ;;  %v3730_v17 = vpop.f32.mrb[48].mxu1 }
0x2683   :  { %7782 = vtanh.f32 %v3735_v55  ;;  %v3737_v30 = vadd.f32 %v3730_v17, %v9641_v18  ;;  %v3732_v54 = vpop.f32.mrb[49].mxu1 }
0x2684   :  { %v3738_v10 = vadd.f32 %v3732_v54, %v9642_v23 }
0x2686   :  { %7784 = vtanh.f32 %v3738_v10 }
0x2687   :  { %7786 = vtanh.f32 %v3737_v30 }
0x268c   :  { %v7781_v26 = vpop.eup %7780 }
0x268d   :  { %v7783_v21 = vpop.eup %7782  ;;  %3807 = vmatprep.mubr.f32.mxu0 %v7781_v26 }
0x268e   :  { %3808 = vmatmul.mubr.f32.vlgmr.msra.gmra.mrb[48].mxu0 %v7783_v21 }
0x268f   :  { %7338 = vmatpush3.bf16.msra.mxu0 %v8656_v45 }
0x2690   :  { %v7785_v42 = vpop.eup %7784  ;;  %7340 = vmatprep.subr.bf16.mxu0 %v9643_v13 }
0x2691   :  { %v7787_v47 = vpop.eup %7786  ;;  %3812 = vmatprep.mubr.f32.mxu0 %v7785_v42 }
0x2692   :  { %3813 = vmatmul.mubr.f32.gmra.mrb[50].mxu0 %v7787_v47 }
0x2693   :  { %7342 = vmatpush3.bf16.msra.mxu0 %v9643_v13 }
0x2694   :  { %7344 = vmatprep.subr.bf16.mxu0 %v8684_v56 }
0x2761   :  { %v6269_v55 = vpop.f32.mrb[48].mxu0 }
0x2762   :  { %v6270_v6 = vpop.f32.mrb[49].mxu0 }
0x2763   :  { %v6271_v17 = vadd.f32 %v6270_v6, %v6269_v55 }
0x2765   :  { %v6272_v30 = vpop.f32.mrb[50].mxu0  ;;  %v3818_v54 = vsel %vm511_vm0, %v6271_v17, -inf }
0x2766   :  { %3819 = vmax.xlane.f32.xlu0 %v3818_v54  ;;  %v6273_v10 = vpop.f32.mrb[51].mxu0 }
0x2767   :  { %v6274_v26 = vadd.f32 %v6273_v10, %v6272_v30 }
0x2769   :  { %v3821_v21 = vsel %vm511_vm0, %v6274_v26, -inf }
0x276a   :  { %3822 = vmax.xlane.f32.xlu1 %v3821_v21 }
0x27f3   :  { %v3820_v23 = vpop.xlane.xlu0 %3819 }
0x27f4   :  { %v3824_v18 = vsub.f32 %v6271_v17, %v3820_v23  ;;  %v9227_v17 = vld [vmem:[#allocation2 + $0x8] sm:$0xff] }
0x27f6   :  { %v3826_v42 = vmul.f32 1.442695, %v3824_v18 }
0x27f7   :  { %v3823_v47 = vpop.xlane.xlu1 %3822 }
0x27f8   :  { %7788 = vpow2.f32 %v3826_v42  ;;  %v3825_v13 = vsub.f32 %v6274_v26, %v3823_v47  ;;  %v9230_v42 = vld [vmem:[#allocation2] sm:$0xff] }
0x27fa   :  { %v3828_v29 = vmul.f32 1.442695, %v3825_v13 }
0x27fc   :  { %7790 = vpow2.f32 %v3828_v29 }
0x2802   :  { %v7789_v61 = vpop.eup %7788 }
0x2803   :  { %v3830_v55 = vsel %vm511_vm0, %v7789_v61, 0.0 }
0x2804   :  { %3831 = vadd.xlane.f32.xlu0 %v3830_v55 }
0x2806   :  { %v7791_v6 = vpop.eup %7790 }
0x2807   :  { %v3833_v54 = vsel %vm511_vm0, %v7791_v6, 0.0 }
0x2808   :  { %3834 = vadd.xlane.f32.xlu0 %v3833_v54  ;;  %v9233_v54 = vld [vmem:[#allocation2 + $0x18] sm:$0xff] }
0x2891   :  { %v3832_v30 = vpop.xlane.xlu0 %3831 }
0x2892   :  { %7792 = vrcp.f32 %v3832_v30 }
0x2895   :  { %v3835_v10 = vpop.xlane.xlu0 %3834 }
0x2896   :  { %7794 = vrcp.f32 %v3835_v10  ;;  %v9237_v10 = vld [vmem:[#allocation2 + $0x10] sm:$0xff] }
0x289c   :  { %v7793_v21 = vpop.eup %7792 }
0x289d   :  { %v3838_v23 = vmul.f32 %v7793_v21, %v7789_v61 }
0x289f   :  { %5760 = vmatmul.mubr.msk.f32.vlgmr.msra.gmra.mrb[50].mxu1 %vm511_vm0, %v3838_v23 }
0x28a0   :  { %v7795_v18 = vpop.eup %7794  ;;  %3916 = vmatprep.mubr.f32.mxu1 %v9602_v44  ;;  %7306 = vmatpush3.bf16.msra.mxu1 %v8529_v50 }
0x28a1   :  { %v3839_v29 = vmul.f32 %v7795_v18, %v7791_v6  ;;  %7308 = vmatprep.subr.bf16.mxu1 %v8531_v53 }
0x28a3   :  { %5761 = vmatmul.mubr.msk.f32.gmra.mrb[52].mxu1 %vm511_vm0, %v3839_v29 }
0x28a4   :  { %7310 = vmatpush3.bf16.msra.mxu1 %v8548_v1 }
0x28a5   :  { %7312 = vmatprep.subr.bf16.mxu1 %v8551_v5 }
0x28a8   :  { %7314 = vmatpush3.bf16.msra.mxu1 %v8567_v11 }
0x28a9   :  { %7316 = vmatprep.subr.bf16.mxu1 %v8570_v12 }
0x28ac   :  { %7318 = vmatpush3.bf16.msra.mxu1 %v8585_v31 }
0x28ad   :  { %7320 = vmatprep.subr.bf16.mxu1 %v8588_v36 }
0x28b0   :  { %7322 = vmatpush3.bf16.msra.mxu1 %v8603_v48 }
0x28b1   :  { %7324 = vmatprep.subr.bf16.mxu1 %v8606_v52 }
0x28b4   :  { %7326 = vmatpush3.bf16.msra.mxu1 %v8621_v63 }
0x28b5   :  { %7328 = vmatprep.subr.bf16.mxu1 %v8624_v4 }
0x28b8   :  { %7330 = vmatpush3.bf16.msra.mxu1 %v8633_v8 }
0x28b9   :  { %7332 = vmatprep.subr.bf16.mxu1 %v8643_v15 }
0x28bc   :  { %7334 = vmatpush3.bf16.msra.mxu1 %v8651_v41 }
0x28bd   :  { %7368 = vmatprep.subr.bf16.mxu1 %v8242_v19 }
0x2972   :  { %v3912_v61 = vpop.f32.mrb[50].mxu1 }
0x2973   :  { %v3914_v13 = vpop.f32.mrb[51].mxu1  ;;  %v3923_v47 = vmul.f32 %v9230_v42, %v3912_v61 }
0x2974   :  { %v3924_v26 = vmul.f32 %v9227_v17, %v3914_v13 }
0x2976   :  { %v3918_v55 = vpop.f32.mrb[52].mxu1  ;;  %3991 = vmatprep.mubr.f32.mxu1 %v3924_v26 }
0x2977   :  { %v3920_v6 = vpop.f32.mrb[53].mxu1  ;;  %3992 = vmatmul.mubr.f32.vlgmr.msra.gmra.mrb[54].mxu1 %v3923_v47  ;;  %v3925_v21 = vmul.f32 %v9237_v10, %v3918_v55  ;;  %v4159_v47 = vld [vmem:[#allocation4 + $0x50] sm:$0xff] }
0x2978   :  { %v3926_v30 = vmul.f32 %v9233_v54, %v3920_v6  ;;  %7370 = vmatpush3.bf16.msra.mxu1 %v8262_v25 }
0x2979   :  { %7372 = vmatprep.subr.bf16.mxu1 %v8265_v27 }
0x297a   :  { %3996 = vmatprep.mubr.f32.mxu1 %v3926_v30 }
0x297b   :  { %3997 = vmatmul.mubr.f32.gmra.mrb[56].mxu1 %v3925_v21 }
0x297c   :  { %7374 = vmatpush3.bf16.msra.mxu1 %v8288_v35 }
0x297d   :  { %7376 = vmatprep.subr.bf16.mxu1 %v8377_v24 }
0x2980   :  { %7378 = vmatpush3.bf16.msra.mxu1 %v8382_v28 }
0x2981   :  { %7380 = vmatprep.subr.bf16.mxu1 %v8395_v32 }
0x2984   :  { %7382 = vmatpush3.bf16.msra.mxu1 %v8400_v34 }
0x2985   :  { %7384 = vmatprep.subr.bf16.mxu1 %v8410_v38 }
0x2988   :  { %7386 = vmatpush3.bf16.msra.mxu1 %v8418_v43 }
0x2989   :  { %7388 = vmatprep.subr.bf16.mxu1 %v9604_v20 }
0x298c   :  { %7390 = vmatpush3.bf16.msra.mxu1 %v9605_v7 }
0x298d   :  { %7392 = vmatprep.subr.bf16.mxu1 %v9606_v3 }
0x2990   :  { %7394 = vmatpush3.bf16.msra.mxu1 %v9607_v9 }
0x2991   :  { %7396 = vmatprep.subr.bf16.mxu1 %v9608_v59 }
0x2994   :  { %7398 = vmatpush3.bf16.msra.mxu1 %v9609_v37 }
0x2995   :  { %7432 = vmatprep.subr.bf16.mxu1 %v8656_v45 }
0x2a4a   :  { %v6307_v23 = vpop.f32.mrb[54].mxu1 }
0x2a4b   :  { %v6308_v18 = vpop.f32.mrb[55].mxu1 }
0x2a4c   :  { %v6309_v29 = vadd.f32 %v6308_v18, %v6307_v23 }
0x2a4e   :  { %v6310_v61 = vpop.f32.mrb[56].mxu1  ;;  %6631 = vmatprep.mubr.msk.f32.mxu0 %vm238_vm1, %v6309_v29 }
0x2a4f   :  { %v6311_v13 = vpop.f32.mrb[57].mxu1 }
0x2a50   :  { %v6312_v26 = vadd.f32 %v6311_v13, %v6310_v61 }
0x2a52   :  { %6632 = vmatmul.mubr.msk.f32.vlgmr.msra.gmra.mrb[52].mxu0 %vm238_vm1, %v6312_v26 }
0x2a53   :  { %7346 = vmatpush3.bf16.msra.mxu0 %v8684_v56  ;;  %6642 = vmatprep.mubr.msk.f32.mxu0 %vm238_vm1, %v9184_v33  ;;  %v4160_v33 = vld [vmem:[#allocation4 + $0x58] sm:$0xff] }
0x2a54   :  { %7348 = vmatprep.subr.bf16.mxu0 %v8688_v0 }
0x2a57   :  { %7350 = vmatpush3.bf16.msra.mxu0 %v8688_v0 }
0x2a58   :  { %7352 = vmatprep.subr.bf16.mxu0 %v8133_v39 }
0x2a5a   :  { %6643 = vmatmul.mubr.msk.f32.vlgmr.msra.gmra.mrb[52].mxu0 %vm238_vm1, %v9191_v57 }
0x2a5b   :  { %7354 = vmatpush1.bf16.msra.mxu0 %v8135_v40  ;;  %4287 = vmatprep.mubr.f32.mxu0 %v9602_v44 }
0x2a5c   :  { %7356 = vmatprep.subr.bf16.mxu0 %v8150_v46 }
0x2a5f   :  { %7358 = vmatpush1.bf16.msra.mxu0 %v9622_v22 }
0x2a60   :  { %7360 = vmatprep.subr.bf16.mxu0 %v9623_v49 }
0x2b2d   :  { %v6644_v55 = vpop.f32.mrb[52].mxu0 }
0x2b2e   :  { %v4162_v6 = vadd.f32 %v6644_v55, %v4160_v33  ;;  %v4149_v30 = vpop.f32.mrb[53].mxu0 }
0x2b2f   :  { %v4161_v21 = vadd.f32 %v4159_v47, %v4149_v30 }
0x2b30   :  { %v4164_v23 = vadd.f32 %v9633_v2, %v4162_v6 }
0x2b31   :  { %v4163_v57 = vadd.f32 %v9633_v2, %v4161_v21 }
0x2b32   :  { %7796 = vtanh.f32 %v4164_v23  ;;  %v5767_v13 = vmul.f32 -1.442695, %v4164_v23 }
0x2b33   :  { %7798 = vtanh.f32 %v4163_v57  ;;  %v5766_v61 = vmul.f32 -1.442695, %v4163_v57 }
0x2b35   :  { %7800 = vpow2.f32 %v5766_v61 }
0x2b36   :  { %7802 = vpow2.f32 %v5767_v13 }
0x2b3c   :  { %v7797_v18 = vpop.eup %7796 }
0x2b3d   :  { %v7799_v29 = vpop.eup %7798  ;;  %4185 = vrot.lane.b32.xlu1 %v7797_v18, %s7968_s3 }
0x2b3e   :  { %4183 = vrot.lane.b32.xlu0 %v7799_v29, %s7968_s3 }
0x2b3f   :  { %v7801_v26 = vpop.eup %7800 }
0x2b40   :  { %v4171_v33 = vadd.f32 1.0, %v7801_v26  ;;  %v7803_v55 = vpop.eup %7802 }
0x2b41   :  { %v4172_v47 = vadd.f32 1.0, %v7803_v55 }
0x2b42   :  { %7804 = vrcp.f32 %v4171_v33 }
0x2b43   :  { %7806 = vrcp.f32 %v4172_v47 }
0x2b4c   :  { %v7805_v6 = vpop.eup %7804 }
0x2b4d   :  { %v7807_v49 = vpop.eup %7806  ;;  %v4179_v23 = vmul.f32 %v7805_v6, %v9161_v51 }
0x2b4e   :  { %v4180_v61 = vmul.f32 %v7807_v49, %v9165_v16 }
0x2baf   :  { %v4186_v21 = vpop.permute.xlu1 %4185 }
0x2bb0   :  { %v4184_v2 = vpop.permute.xlu0 %4183  ;;  %v4190_v18 = vmul.f32 %v7807_v49, %v4186_v21 }
0x2bb1   :  { %v4189_v30 = vmul.f32 %v7805_v6, %v4184_v2 }
0x2bb3   :  { %4193 = vrot.lane.b32.xlu1 %v4189_v30, %s7969_s11 }
0x2bb7   :  { %4195 = vrot.lane.b32.xlu1 %v4190_v18, %s7969_s11  ;;  %v9313_v18 = vld [vmem:[%s9526_s2 + $0x280] sm:$0xff] }
0x2bb8   :  { %9645 = vst [vmem:[#allocation17_spill] sm:$0xff] %v9313_v18 }
0x2c25   :  { %v4194_v57 = vpop.permute.xlu1 %4193 }
0x2c26   :  { %v9277_v29 = vadd.f32 %v4194_v57, %v4179_v23 }
0x2c28   :  { %7808 = vtanh.f32 %v9277_v29 }
0x2c29   :  { %v4196_v13 = vpop.permute.xlu1 %4195 }
0x2c2a   :  { %v9281_v26 = vadd.f32 %v4196_v13, %v4180_v61  ;;  %v9646_v61 = vld [vmem:[#allocation19_spill] sm:$0xff] }
0x2c2c   :  { %7810 = vtanh.f32 %v9281_v26 }
0x2c32   :  { %v7809_v33 = vpop.eup %7808 }
0x2c33   :  { %4205 = vrot.lane.b32.xlu0 %v7809_v33, %s7968_s3 }
0x2c36   :  { %v7811_v55 = vpop.eup %7810 }
0x2c37   :  { %4207 = vrot.lane.b32.xlu1 %v7811_v55, %s7968_s3  ;;  %4215 = vrot.lane.b32.xlu0 %v9277_v29, %s7970_s0  ;;  %v9647_v55 = vld [vmem:[#allocation20_spill] sm:$0xff] }
0x2c3b   :  { %4217 = vrot.lane.b32.xlu1 %v9281_v26, %s7970_s0 }
0x2ca5   :  { %v4206_v51 = vpop.permute.xlu0 %4205 }
0x2ca6   :  { %v4211_v47 = vmul.f32 %v7805_v6, %v4206_v51 }
0x2ca8   :  { %4302 = vrot.lane.b32.xlu0 %v4211_v47, %s7969_s11 }
0x2ca9   :  { %v4208_v16 = vpop.permute.xlu1 %4207  ;;  %v4216_v2 = vpop.permute.xlu0 %4215 }
0x2caa   :  { %v4212_v30 = vmul.f32 %v7807_v49, %v4208_v16  ;;  %5768 = vmatmul.mubr.msk.f32.vlgmr.msra.gmra.mrb[54].mxu0 %vm238_vm1, %v4216_v2  ;;  %v9302_v49 = vld [vmem:[%s9526_s2 + $0x288] sm:$0xff] }
0x2cab   :  { %4293 = vmatprep.mubr.f32.mxu0 %v9602_v44  ;;  %7362 = vmatpush1.bf16.msra.mxu0 %v8192_v62  ;;  %9644 = vst [vmem:[#allocation16_spill] sm:$0xff] %v9302_v49  ;;  %v9648_v16 = vld [vmem:[#allocation21_spill] sm:$0xff] }
0x2cac   :  { %4304 = vrot.lane.b32.xlu1 %v4212_v30, %s7969_s11  ;;  %7364 = vmatprep.subr.bf16.mxu0 %v9634_v60 }
0x2cad   :  { %v4218_v21 = vpop.permute.xlu1 %4217 }
0x2cae   :  { %5769 = vmatmul.mubr.msk.f32.gmra.mrb[56].mxu0 %vm238_vm1, %v4218_v21  ;;  %v9649_v21 = vld [vmem:[#allocation22_spill] sm:$0xff] }
0x2caf   :  { %7366 = vmatpush1.bf16.msra.mxu0 %v9635_v14  ;;  %4374 = vmatprep.mubr.f32.mxu0 %v9602_v44 }
0x2cb0   :  { %4498 = vmatprep.subr.mxu0 %v9302_v49 }
0x2d1a   :  { %v9305_v6 = vpop.permute.xlu0 %4302 }
0x2d1b   :  { %5770 = vmatmul.mubr.msk.f32.vlgmr.msra.gmra.mrb[54].mxu0 %vm238_vm1, %v9305_v6 }
0x2d1c   :  { %4380 = vmatprep.mubr.f32.mxu0 %v9602_v44  ;;  %4499 = vmatpush1.msra.mxu0 %v9313_v18 }
0x2d1d   :  { %7400 = vmatprep.subr.bf16.mxu0 %v9638_v58 }
0x2d1e   :  { %v9317_v23 = vpop.permute.xlu1 %4304 }
0x2d1f   :  { %5771 = vmatmul.mubr.msk.f32.gmra.mrb[56].mxu0 %vm238_vm1, %v9317_v23 }
0x2d20   :  { %4562 = vmatprep.mubr.f32.mxu0 %v9602_v44 }
0x2dee   :  { %v4376_v57 = vpop.f32.mrb[54].mxu0 }
0x2def   :  { %v4387_v13 = vadd.f32 %v4376_v57, %v9646_v61  ;;  %v4378_v33 = vpop.f32.mrb[55].mxu0  ;;  %v9650_v61 = vld [vmem:[#allocation25_spill] sm:$0xff] }
0x2df0   :  { %v4388_v51 = vadd.f32 %v4378_v33, %v9647_v55 }
0x2df2   :  { %7812 = vtanh.f32 %v4388_v51  ;;  %v4382_v47 = vpop.f32.mrb[56].mxu0 }
0x2df3   :  { %7814 = vtanh.f32 %v4387_v13  ;;  %v4389_v2 = vadd.f32 %v4382_v47, %v9648_v16  ;;  %v4384_v30 = vpop.f32.mrb[57].mxu0 }
0x2df4   :  { %v4390_v58 = vadd.f32 %v4384_v30, %v9649_v21 }
0x2df6   :  { %7816 = vtanh.f32 %v4390_v58 }
0x2df7   :  { %7818 = vtanh.f32 %v4389_v2 }
0x2dfc   :  { %v7813_v18 = vpop.eup %7812 }
0x2dfd   :  { %v7815_v49 = vpop.eup %7814  ;;  %4459 = vmatprep.mubr.f32.mxu1 %v7813_v18 }
0x2dfe   :  { %4460 = vmatmul.mubr.f32.vlgmr.msra.gmra.mrb[58].mxu1 %v7815_v49 }
0x2dff   :  { %7434 = vmatpush3.bf16.msra.mxu1 %v8656_v45 }
0x2e00   :  { %v7817_v57 = vpop.eup %7816  ;;  %7436 = vmatprep.subr.bf16.mxu1 %v9650_v61 }
0x2e01   :  { %v7819_v33 = vpop.eup %7818  ;;  %4464 = vmatprep.mubr.f32.mxu1 %v7817_v57 }
0x2e02   :  { %4465 = vmatmul.mubr.f32.gmra.mrb[60].mxu1 %v7819_v33 }
0x2e03   :  { %7438 = vmatpush3.bf16.msra.mxu1 %v9650_v61 }
0x2e04   :  { %7440 = vmatprep.subr.bf16.mxu1 %v8684_v56 }
0x2ed1   :  { %v6357_v13 = vpop.f32.mrb[58].mxu1 }
0x2ed2   :  { %v6358_v51 = vpop.f32.mrb[59].mxu1 }
0x2ed3   :  { %v6359_v58 = vadd.f32 %v6358_v51, %v6357_v13 }
0x2ed5   :  { %v6360_v47 = vpop.f32.mrb[60].mxu1  ;;  %v4470_v2 = vsel %vm511_vm0, %v6359_v58, -inf }
0x2ed6   :  { %4471 = vmax.xlane.f32.xlu0 %v4470_v2  ;;  %v6361_v49 = vpop.f32.mrb[61].mxu1 }
0x2ed7   :  { %v6362_v18 = vadd.f32 %v6361_v49, %v6360_v47 }
0x2ed9   :  { %v4473_v30 = vsel %vm511_vm0, %v6362_v18, -inf }
0x2eda   :  { %4474 = vmax.xlane.f32.xlu1 %v4473_v30 }
0x2f63   :  { %v4472_v45 = vpop.xlane.xlu0 %4471 }
0x2f64   :  { %v4476_v21 = vsub.f32 %v6359_v58, %v4472_v45 }
0x2f66   :  { %v4478_v57 = vmul.f32 1.442695, %v4476_v21 }
0x2f67   :  { %v4475_v33 = vpop.xlane.xlu1 %4474 }
0x2f68   :  { %7820 = vpow2.f32 %v4478_v57  ;;  %v4477_v61 = vsub.f32 %v6362_v18, %v4475_v33 }
0x2f6a   :  { %v4480_v16 = vmul.f32 1.442695, %v4477_v61 }
0x2f6c   :  { %7822 = vpow2.f32 %v4480_v16 }
0x2f72   :  { %v7821_v55 = vpop.eup %7820 }
0x2f73   :  { %v4482_v13 = vsel %vm511_vm0, %v7821_v55, 0.0 }
0x2f74   :  { %4483 = vadd.xlane.f32.xlu0 %v4482_v13 }
0x2f76   :  { %v7823_v51 = vpop.eup %7822 }
0x2f77   :  { %v4485_v2 = vsel %vm511_vm0, %v7823_v51, 0.0 }
0x2f78   :  { %4486 = vadd.xlane.f32.xlu0 %v4485_v2 }
0x3001   :  { %v4484_v47 = vpop.xlane.xlu0 %4483 }
0x3002   :  { %7824 = vrcp.f32 %v4484_v47 }
0x3005   :  { %v4487_v49 = vpop.xlane.xlu0 %4486 }
0x3006   :  { %7826 = vrcp.f32 %v4487_v49 }
0x300c   :  { %v7825_v30 = vpop.eup %7824 }
0x300d   :  { %v4490_v45 = vmul.f32 %v7825_v30, %v7821_v55 }
0x300f   :  { %5772 = vmatmul.mubr.msk.f32.vlgmr.msra.gmra.mrb[58].mxu0 %vm511_vm0, %v4490_v45 }
0x3010   :  { %v7827_v21 = vpop.eup %7826  ;;  %4568 = vmatprep.mubr.f32.mxu0 %v9602_v44  ;;  %7402 = vmatpush3.bf16.msra.mxu0 %v8529_v50 }
0x3011   :  { %v4491_v61 = vmul.f32 %v7827_v21, %v7823_v51  ;;  %7404 = vmatprep.subr.bf16.mxu0 %v8531_v53 }
0x3013   :  { %5773 = vmatmul.mubr.msk.f32.gmra.mrb[60].mxu0 %vm511_vm0, %v4491_v61 }
0x3014   :  { %7406 = vmatpush3.bf16.msra.mxu0 %v8548_v1 }
0x3015   :  { %7408 = vmatprep.subr.bf16.mxu0 %v8551_v5 }
0x3018   :  { %7410 = vmatpush3.bf16.msra.mxu0 %v8567_v11 }
0x3019   :  { %7412 = vmatprep.subr.bf16.mxu0 %v8570_v12 }
0x301c   :  { %7414 = vmatpush3.bf16.msra.mxu0 %v8585_v31 }
0x301d   :  { %7416 = vmatprep.subr.bf16.mxu0 %v8588_v36 }
0x3020   :  { %7418 = vmatpush3.bf16.msra.mxu0 %v8603_v48 }
0x3021   :  { %7420 = vmatprep.subr.bf16.mxu0 %v8606_v52 }
0x3024   :  { %7422 = vmatpush3.bf16.msra.mxu0 %v8621_v63 }
0x3025   :  { %7424 = vmatprep.subr.bf16.mxu0 %v8624_v4 }
0x3028   :  { %7426 = vmatpush3.bf16.msra.mxu0 %v8633_v8 }
0x3029   :  { %7428 = vmatprep.subr.bf16.mxu0 %v8643_v15 }
0x302c   :  { %7430 = vmatpush3.bf16.msra.mxu0 %v8651_v41 }
0x302d   :  { %7464 = vmatprep.subr.bf16.mxu0 %v8242_v19 }
0x30e2   :  { %v4564_v55 = vpop.f32.mrb[58].mxu0 }
0x30e3   :  { %v4566_v16 = vpop.f32.mrb[59].mxu0  ;;  %v4575_v18 = vmul.f32 %v9230_v42, %v4564_v55 }
0x30e4   :  { %v4576_v58 = vmul.f32 %v9227_v17, %v4566_v16 }
0x30e6   :  { %v4570_v57 = vpop.f32.mrb[60].mxu0  ;;  %4643 = vmatprep.mubr.f32.mxu0 %v4576_v58 }
0x30e7   :  { %v4572_v33 = vpop.f32.mrb[61].mxu0  ;;  %4644 = vmatmul.mubr.f32.vlgmr.msra.gmra.mrb[62].mxu0 %v4575_v18  ;;  %v4577_v51 = vmul.f32 %v9237_v10, %v4570_v57 }
0x30e8   :  { %v4578_v13 = vmul.f32 %v9233_v54, %v4572_v33  ;;  %7466 = vmatpush3.bf16.msra.mxu0 %v8262_v25 }
0x30e9   :  { %7468 = vmatprep.subr.bf16.mxu0 %v8265_v27 }
0x30ea   :  { %4648 = vmatprep.mubr.f32.mxu0 %v4578_v13 }
0x30eb   :  { %4649 = vmatmul.mubr.f32.gmra.mrb[64].mxu0 %v4577_v51 }
0x30ec   :  { %7470 = vmatpush3.bf16.msra.mxu0 %v8288_v35 }
0x30ed   :  { %7472 = vmatprep.subr.bf16.mxu0 %v8377_v24 }
0x30f0   :  { %7474 = vmatpush3.bf16.msra.mxu0 %v8382_v28 }
0x30f1   :  { %7476 = vmatprep.subr.bf16.mxu0 %v8395_v32  ;;  %v9651_v32 = vld [vmem:[#allocation10_spill] sm:$0xff] }
0x30f4   :  { %7478 = vmatpush3.bf16.msra.mxu0 %v8400_v34  ;;  %v4812_v34 = vld [vmem:[#allocation4 + $0x68] sm:$0xff] }
0x30f5   :  { %7480 = vmatprep.subr.bf16.mxu0 %v8410_v38  ;;  %v4811_v38 = vld [vmem:[#allocation4 + $0x60] sm:$0xff] }
0x30f8   :  { %7482 = vmatpush3.bf16.msra.mxu0 %v8418_v43 }
0x30f9   :  { %7484 = vmatprep.subr.bf16.mxu0 %v9604_v20 }
0x30fc   :  { %7486 = vmatpush3.bf16.msra.mxu0 %v9605_v7 }
0x30fd   :  { %7488 = vmatprep.subr.bf16.mxu0 %v9606_v3 }
0x3100   :  { %7490 = vmatpush3.bf16.msra.mxu0 %v9607_v9 }
0x3101   :  { %7492 = vmatprep.subr.bf16.mxu0 %v9608_v59 }
0x3104   :  { %7494 = vmatpush3.bf16.msra.mxu0 %v9609_v37 }
0x3105   :  { %7536 = vmatprep.subr.bf16.mxu0 %v8684_v56 }
0x31ba   :  { %v6395_v19 = vpop.f32.mrb[62].mxu0 }
0x31bb   :  { %v6396_v25 = vpop.f32.mrb[63].mxu0 }
0x31bc   :  { %v6397_v27 = vadd.f32 %v6396_v25, %v6395_v19 }
0x31be   :  { %v6398_v35 = vpop.f32.mrb[64].mxu0  ;;  %6653 = vmatprep.mubr.msk.f32.mxu1 %vm238_vm1, %v6397_v27 }
0x31bf   :  { %v6399_v24 = vpop.f32.mrb[65].mxu0 }
0x31c0   :  { %v6400_v28 = vadd.f32 %v6399_v24, %v6398_v35 }
0x31c2   :  { %6654 = vmatmul.mubr.msk.f32.vlgmr.msra.gmra.mrb[62].mxu1 %vm238_vm1, %v6400_v28  ;;  %v9652_v28 = vld [vmem:[#allocation16_spill] sm:$0xff] }
0x31c3   :  { %7442 = vmatpush3.bf16.msra.mxu1 %v8684_v56  ;;  %6664 = vmatprep.mubr.msk.f32.mxu1 %vm238_vm1, %v9305_v6 }
0x31c4   :  { %7444 = vmatprep.subr.bf16.mxu1 %v8688_v0 }
0x31c7   :  { %7446 = vmatpush3.bf16.msra.mxu1 %v8688_v0 }
0x31c8   :  { %7448 = vmatprep.subr.bf16.mxu1 %v8133_v39  ;;  %v9388_v39 = vld [vmem:[#allocation6 + $0x40] ss:$0 sm:$0xff] }
0x31ca   :  { %6665 = vmatmul.mubr.msk.f32.vlgmr.msra.gmra.mrb[62].mxu1 %vm238_vm1, %v9317_v23 }
0x31cb   :  { %7450 = vmatpush1.bf16.msra.mxu1 %v8135_v40  ;;  %4939 = vmatprep.mubr.f32.mxu1 %v9602_v44 }
0x31cc   :  { %7452 = vmatprep.subr.bf16.mxu1 %v8150_v46 }
0x31cf   :  { %7454 = vmatpush1.bf16.msra.mxu1 %v9622_v22 }
0x31d0   :  { %7456 = vmatprep.subr.bf16.mxu1 %v9651_v32 }
0x329d   :  { %v6666_v43 = vpop.f32.mrb[62].mxu1 }
0x329e   :  { %v4814_v20 = vadd.f32 %v6666_v43, %v4812_v34  ;;  %v4801_v7 = vpop.f32.mrb[63].mxu1  ;;  %v9653_v34 = vld [vmem:[#allocation17_spill] sm:$0xff] }
0x329f   :  { %v4813_v3 = vadd.f32 %v4811_v38, %v4801_v7  ;;  %v9656_v7 = vld [vmem:[#allocation20_spill] sm:$0xff] }
0x32a0   :  { %v4816_v9 = vadd.f32 %v9388_v39, %v4814_v20 }
0x32a1   :  { %v4815_v40 = vadd.f32 %v9388_v39, %v4813_v3 }
0x32a2   :  { %7828 = vtanh.f32 %v4816_v9  ;;  %v5779_v22 = vmul.f32 -1.442695, %v4816_v9 }
0x32a3   :  { %7830 = vtanh.f32 %v4815_v40  ;;  %v5778_v37 = vmul.f32 -1.442695, %v4815_v40  ;;  %v9657_v40 = vld [vmem:[#allocation21_spill] sm:$0xff] }
0x32a5   :  { %7832 = vpow2.f32 %v5778_v37  ;;  %v9658_v37 = vld [vmem:[#allocation22_spill] sm:$0xff] }
0x32a6   :  { %7834 = vpow2.f32 %v5779_v22 }
0x32ac   :  { %v7829_v59 = vpop.eup %7828 }
0x32ad   :  { %v7831_v46 = vpop.eup %7830  ;;  %4837 = vrot.lane.b32.xlu1 %v7829_v59, %s7968_s3 }
0x32ae   :  { %4835 = vrot.lane.b32.xlu0 %v7831_v46, %s7968_s3 }
0x32af   :  { %v7833_v6 = vpop.eup %7832 }
0x32b0   :  { %v4823_v23 = vadd.f32 1.0, %v7833_v6  ;;  %v7835_v2 = vpop.eup %7834 }
0x32b1   :  { %v4824_v47 = vadd.f32 1.0, %v7835_v2 }
0x32b2   :  { %7836 = vrcp.f32 %v4823_v23 }
0x32b3   :  { %7838 = vrcp.f32 %v4824_v47 }
0x32bc   :  { %v7837_v49 = vpop.eup %7836 }
0x32bd   :  { %v7839_v61 = vpop.eup %7838  ;;  %v4831_v16 = vmul.f32 %v7837_v49, %v9277_v29 }
0x32be   :  { %v4832_v57 = vmul.f32 %v7839_v61, %v9281_v26 }
0x331f   :  { %v4838_v21 = vpop.permute.xlu1 %4837 }
0x3320   :  { %v4836_v30 = vpop.permute.xlu0 %4835  ;;  %v4842_v55 = vmul.f32 %v7839_v61, %v4838_v21 }
0x3321   :  { %v4841_v45 = vmul.f32 %v7837_v49, %v4836_v30 }
0x3323   :  { %4845 = vrot.lane.b32.xlu1 %v4841_v45, %s7969_s11 }
0x3327   :  { %4847 = vrot.lane.b32.xlu1 %v4842_v55, %s7969_s11 }
0x3395   :  { %v4846_v58 = vpop.permute.xlu1 %4845 }
0x3396   :  { %v9397_v18 = vadd.f32 %v4846_v58, %v4831_v16 }
0x3398   :  { %7840 = vtanh.f32 %v9397_v18 }
0x3399   :  { %v4848_v33 = vpop.permute.xlu1 %4847 }
0x339a   :  { %v9401_v13 = vadd.f32 %v4848_v33, %v4832_v57 }
0x339c   :  { %7842 = vtanh.f32 %v9401_v13 }
0x33a2   :  { %v7841_v51 = vpop.eup %7840 }
0x33a3   :  { %4857 = vrot.lane.b32.xlu0 %v7841_v51, %s7968_s3 }
0x33a6   :  { %v7843_v19 = vpop.eup %7842 }
0x33a7   :  { %4859 = vrot.lane.b32.xlu1 %v7843_v19, %s7968_s3  ;;  %4867 = vrot.lane.b32.xlu0 %v9397_v18, %s7970_s0 }
0x33ab   :  { %4869 = vrot.lane.b32.xlu1 %v9401_v13, %s7970_s0 }
0x3415   :  { %v4858_v29 = vpop.permute.xlu0 %4857 }
0x3416   :  { %v4863_v25 = vmul.f32 %v7837_v49, %v4858_v29 }
0x3418   :  { %4954 = vrot.lane.b32.xlu0 %v4863_v25, %s7969_s11 }
0x3419   :  { %v4860_v26 = vpop.permute.xlu1 %4859  ;;  %v4868_v27 = vpop.permute.xlu0 %4867 }
0x341a   :  { %v4864_v35 = vmul.f32 %v7839_v61, %v4860_v26  ;;  %5780 = vmatmul.mubr.msk.f32.vlgmr.msra.gmra.mrb[64].mxu1 %vm238_vm1, %v4868_v27 }
0x341b   :  { %4945 = vmatprep.mubr.f32.mxu1 %v9602_v44  ;;  %7458 = vmatpush1.bf16.msra.mxu1 %v8192_v62  ;;  %v9654_v62 = vld [vmem:[#allocation23_spill] sm:$0xff] }
0x341c   :  { %4956 = vrot.lane.b32.xlu1 %v4864_v35, %s7969_s11  ;;  %7460 = vmatprep.subr.bf16.mxu1 %v9634_v60 }
0x341d   :  { %v4870_v24 = vpop.permute.xlu1 %4869 }
0x341e   :  { %5781 = vmatmul.mubr.msk.f32.gmra.mrb[66].mxu1 %vm238_vm1, %v4870_v24 }
0x341f   :  { %7462 = vmatpush1.bf16.msra.mxu1 %v9635_v14  ;;  %5026 = vmatprep.mubr.f32.mxu1 %v9602_v44  ;;  %v9655_v14 = vld [vmem:[#allocation19_spill] sm:$0xff] }
0x3420   :  { %5150 = vmatprep.subr.mxu1 %v9652_v28 }
0x348a   :  { %v4955_v32 = vpop.permute.xlu0 %4954 }
0x348b   :  { %5782 = vmatmul.mubr.msk.f32.vlgmr.msra.gmra.mrb[64].mxu1 %vm238_vm1, %v4955_v32 }
0x348c   :  { %5032 = vmatprep.mubr.f32.mxu1 %v9602_v44  ;;  %5151 = vmatpush1.msra.mxu1 %v9653_v34 }
0x348d   :  { %7496 = vmatprep.subr.bf16.mxu1 %v9654_v62 }
0x348e   :  { %v4957_v38 = vpop.permute.xlu1 %4956 }
0x348f   :  { %5783 = vmatmul.mubr.msk.f32.gmra.mrb[66].mxu1 %vm238_vm1, %v4957_v38 }
0x3490   :  { %5214 = vmatprep.mubr.f32.mxu1 %v9602_v44 }
0x355e   :  { %v5028_v60 = vpop.f32.mrb[64].mxu1 }
0x355f   :  { %v5039_v43 = vadd.f32 %v5028_v60, %v9655_v14  ;;  %v5030_v20 = vpop.f32.mrb[65].mxu1 }
0x3560   :  { %v5040_v3 = vadd.f32 %v5030_v20, %v9656_v7  ;;  %v5464_v7 = vld [vmem:[#allocation4 + $0x78] sm:$0xff] }
0x3562   :  { %7844 = vtanh.f32 %v5040_v3  ;;  %v5034_v9 = vpop.f32.mrb[66].mxu1 }
0x3563   :  { %7846 = vtanh.f32 %v5039_v43  ;;  %v5041_v59 = vadd.f32 %v5034_v9, %v9657_v40  ;;  %v5036_v46 = vpop.f32.mrb[67].mxu1  ;;  %v5463_v40 = vld [vmem:[#allocation4 + $0x70] sm:$0xff] }
0x3564   :  { %v5042_v22 = vadd.f32 %v5036_v46, %v9658_v37 }
0x3566   :  { %7848 = vtanh.f32 %v5042_v22 }
0x3567   :  { %7850 = vtanh.f32 %v5041_v59 }
0x356c   :  { %v7845_v6 = vpop.eup %7844 }
0x356d   :  { %v7847_v23 = vpop.eup %7846  ;;  %5111 = vmatprep.mubr.f32.mxu0 %v7845_v6 }
0x356e   :  { %5112 = vmatmul.mubr.f32.vlgmr.msra.gmra.mrb[66].mxu0 %v7847_v23 }
0x356f   :  { %7538 = vmatpush3.bf16.msra.mxu0 %v8684_v56 }
0x3570   :  { %v7849_v2 = vpop.eup %7848  ;;  %7540 = vmatprep.subr.bf16.mxu0 %v8688_v0 }
0x3571   :  { %v7851_v47 = vpop.eup %7850  ;;  %5116 = vmatprep.mubr.f32.mxu0 %v7849_v2 }
0x3572   :  { %5117 = vmatmul.mubr.f32.gmra.mrb[68].mxu0 %v7851_v47 }
0x3573   :  { %7542 = vmatpush3.bf16.msra.mxu0 %v8688_v0  ;;  %6686 = vmatprep.mubr.msk.f32.mxu0 %vm238_vm1, %v4955_v32 }
0x3576   :  { %6687 = vmatmul.mubr.msk.f32.vlgmr.msra.gmra.mrb[70].mxu0 %vm238_vm1, %v4957_v38 }
0x3641   :  { %v6445_v49 = vpop.f32.mrb[66].mxu0 }
0x3642   :  { %v6446_v30 = vpop.f32.mrb[67].mxu0 }
0x3643   :  { %v6447_v45 = vadd.f32 %v6446_v30, %v6445_v49 }
0x3645   :  { %v6448_v21 = vpop.f32.mrb[68].mxu0  ;;  %v5122_v61 = vsel %vm511_vm0, %v6447_v45, -inf }
0x3646   :  { %5123 = vmax.xlane.f32.xlu0 %v5122_v61  ;;  %v6449_v56 = vpop.f32.mrb[69].mxu0 }
0x3647   :  { %v6450_v55 = vadd.f32 %v6449_v56, %v6448_v21 }
0x3649   :  { %v9436_v16 = vpop.f32.mrb[70].mxu0  ;;  %v5125_v58 = vsel %vm511_vm0, %v6450_v55, -inf }
0x364a   :  { %v9439_v57 = vpop.f32.mrb[71].mxu0  ;;  %5126 = vmax.xlane.f32.xlu1 %v5125_v58 }
0x36d3   :  { %v5124_v0 = vpop.xlane.xlu0 %5123 }
0x36d4   :  { %v5128_v33 = vsub.f32 %v6447_v45, %v5124_v0 }
0x36d6   :  { %v5130_v51 = vmul.f32 1.442695, %v5128_v33 }
0x36d7   :  { %v5127_v19 = vpop.xlane.xlu1 %5126 }
0x36d8   :  { %7852 = vpow2.f32 %v5130_v51  ;;  %v5129_v29 = vsub.f32 %v6450_v55, %v5127_v19 }
0x36da   :  { %v5132_v25 = vmul.f32 1.442695, %v5129_v29 }
0x36dc   :  { %7854 = vpow2.f32 %v5132_v25 }
0x36e2   :  { %v7853_v26 = vpop.eup %7852 }
0x36e3   :  { %v5134_v27 = vsel %vm511_vm0, %v7853_v26, 0.0 }
0x36e4   :  { %5135 = vadd.xlane.f32.xlu0 %v5134_v27  ;;  %v5518_v27 = vld [vmem:[%s9529_s5 + $0x108] sm:$0xff] }
0x36e6   :  { %v7855_v35 = vpop.eup %7854 }
0x36e7   :  { %v5137_v24 = vsel %vm511_vm0, %v7855_v35, 0.0 }
0x36e8   :  { %5138 = vadd.xlane.f32.xlu0 %v5137_v24 }
0x3771   :  { %v5136_v28 = vpop.xlane.xlu0 %5135 }
0x3772   :  { %7856 = vrcp.f32 %v5136_v28 }
0x3775   :  { %v5139_v32 = vpop.xlane.xlu0 %5138 }
0x3776   :  { %7858 = vrcp.f32 %v5139_v32 }
0x377c   :  { %v7857_v34 = vpop.eup %7856 }
0x377d   :  { %v5142_v62 = vmul.f32 %v7857_v34, %v7853_v26  ;;  %v5517_v26 = vld [vmem:[%s9529_s5 + $0x100] sm:$0xff] }
0x377f   :  { %5784 = vmatmul.mubr.msk.f32.vlgmr.msra.gmra.mrb[68].mxu1 %vm511_vm0, %v5142_v62 }
0x3780   :  { %v7859_v38 = vpop.eup %7858  ;;  %5220 = vmatprep.mubr.f32.mxu1 %v9602_v44  ;;  %7498 = vmatpush3.bf16.msra.mxu1 %v8529_v50  ;;  %v9659_v50 = vld [vmem:[#allocation24_spill] sm:$0xff] }
0x3781   :  { %v5143_v60 = vmul.f32 %v7859_v38, %v7855_v35  ;;  %7500 = vmatprep.subr.bf16.mxu1 %v8531_v53  ;;  %v7551_v35 = vpack.c.bf16 %v5518_v27, %v5517_v26 }
0x3783   :  { %5785 = vmatmul.mubr.msk.f32.gmra.mrb[70].mxu1 %vm511_vm0, %v5143_v60 }
0x3784   :  { %7502 = vmatpush3.bf16.msra.mxu1 %v8548_v1 }
0x3785   :  { %7504 = vmatprep.subr.bf16.mxu1 %v8551_v5 }
0x3788   :  { %7506 = vmatpush3.bf16.msra.mxu1 %v8567_v11 }
0x3789   :  { %7508 = vmatprep.subr.bf16.mxu1 %v8570_v12 }
0x378c   :  { %7510 = vmatpush3.bf16.msra.mxu1 %v8585_v31 }
0x378d   :  { %7512 = vmatprep.subr.bf16.mxu1 %v8588_v36 }
0x3790   :  { %7514 = vmatpush3.bf16.msra.mxu1 %v8603_v48 }
0x3791   :  { %7516 = vmatprep.subr.bf16.mxu1 %v8606_v52  ;;  %v9660_v52 = vld [vmem:[#allocation25_spill] sm:$0xff] }
0x3794   :  { %7518 = vmatpush3.bf16.msra.mxu1 %v8621_v63  ;;  %v5521_v63 = vld [vmem:[%s9529_s5 + $0x120] sm:$0xff] }
0x3795   :  { %7520 = vmatprep.subr.bf16.mxu1 %v8624_v4  ;;  %v5522_v4 = vld [vmem:[%s9529_s5 + $0x128] sm:$0xff] }
0x3798   :  { %7522 = vmatpush3.bf16.msra.mxu1 %v8633_v8  ;;  %v7543_v8 = vpack.c.bf16 %v5522_v4, %v5521_v63 }
0x3799   :  { %7524 = vmatprep.subr.bf16.mxu1 %v8643_v15  ;;  %v5523_v15 = vld [vmem:[%s9529_s5 + $0x130] sm:$0xff] }
0x379a   :  { %7544 = vmatprep.subr.bf16.mxu0 %v7543_v8 }
0x379b   :  { %7546 = vmatpush3.bf16.msra.mxu0 %v7543_v8 }
0x379c   :  { %7526 = vmatpush3.bf16.msra.mxu1 %v8651_v41  ;;  %v5524_v41 = vld [vmem:[%s9529_s5 + $0x138] sm:$0xff] }
0x379d   :  { %7528 = vmatprep.subr.bf16.mxu1 %v9659_v50  ;;  %v7547_v44 = vpack.c.bf16 %v5524_v41, %v5523_v15 }
0x379f   :  { %7548 = vmatprep.subr.bf16.mxu0 %v7547_v44 }
0x37a0   :  { %7550 = vmatpush3.bf16.msra.mxu0 %v7547_v44 }
0x37a1   :  { %7552 = vmatprep.subr.bf16.mxu0 %v7551_v35 }
0x3852   :  { %v5216_v53 = vpop.f32.mrb[68].mxu1 }
0x3853   :  { %v5218_v1 = vpop.f32.mrb[69].mxu1  ;;  %v5227_v11 = vmul.f32 %v9230_v42, %v5216_v53 }
0x3854   :  { %v5228_v5 = vmul.f32 %v9227_v17, %v5218_v1  ;;  %v5796_v1 = vld [vmem:[%s9529_s5 + $0x140] ss:$0 sm:$0xff] }
0x3856   :  { %v5222_v12 = vpop.f32.mrb[70].mxu1  ;;  %5295 = vmatprep.mubr.f32.mxu1 %v5228_v5 }
0x3857   :  { %v5224_v31 = vpop.f32.mrb[71].mxu1  ;;  %5296 = vmatmul.mubr.f32.vlgmr.msra.gmra.mrb[72].mxu1 %v5227_v11  ;;  %v5229_v48 = vmul.f32 %v9237_v10, %v5222_v12 }
0x3858   :  { %v5230_v36 = vmul.f32 %v9233_v54, %v5224_v31  ;;  %7530 = vmatpush3.bf16.msra.mxu1 %v9659_v50 }
0x3859   :  { %7532 = vmatprep.subr.bf16.mxu1 %v9660_v52 }
0x385a   :  { %5300 = vmatprep.mubr.f32.mxu1 %v5230_v36 }
0x385b   :  { %5301 = vmatmul.mubr.f32.gmra.mrb[74].mxu1 %v5229_v48 }
0x385c   :  { %7534 = vmatpush3.bf16.msra.mxu1 %v9660_v52 }
0x392a   :  { %v6483_v17 = vpop.f32.mrb[72].mxu1 }
0x392b   :  { %v6484_v42 = vpop.f32.mrb[73].mxu1 }
0x392c   :  { %v6485_v54 = vadd.f32 %v6484_v42, %v6483_v17 }
0x392e   :  { %v6486_v10 = vpop.f32.mrb[74].mxu1  ;;  %6675 = vmatprep.mubr.msk.f32.mxu1 %vm238_vm1, %v6485_v54  ;;  %6697 = vmatprep.mubr.msk.f32.mxu0 %vm238_vm1, %v6485_v54 }
0x392f   :  { %v6487_v14 = vpop.f32.mrb[75].mxu1 }
0x3930   :  { %v6488_v43 = vadd.f32 %v6487_v14, %v6486_v10 }
0x3932   :  { %6676 = vmatmul.mubr.msk.f32.vlgmr.msra.gmra.mrb[76].mxu1 %vm238_vm1, %v6488_v43  ;;  %6698 = vmatmul.mubr.msk.f32.vlgmr.msra.gmra.mrb[72].mxu0 %vm238_vm1, %v6488_v43 }
0x3933   :  { %7554 = vmatpush3.bf16.msra.mxu0 %v7551_v35 }
0x3a05   :  { %v6677_v20 = vpop.f32.mrb[76].mxu1 }
0x3a06   :  { %v5459_v3 = vadd.f32 %v9436_v16, %v6677_v20  ;;  %v5378_v9 = vpop.f32.mrb[77].mxu1 }
0x3a07   :  { %v5454_v59 = vadd.f32 %v9439_v57, %v5378_v9 }
0x3a08   :  { %v5466_v46 = vadd.f32 %v5464_v7, %v5459_v3 }
0x3a09   :  { %v5465_v37 = vadd.f32 %v5463_v40, %v5454_v59 }
0x3a0a   :  { %v5468_v22 = vadd.f32 %v9388_v39, %v5466_v46 }
0x3a0b   :  { %v5467_v6 = vadd.f32 %v9388_v39, %v5465_v37 }
0x3a0c   :  { %7860 = vtanh.f32 %v5468_v22  ;;  %v5791_v49 = vmul.f32 -1.442695, %v5468_v22 }
0x3a0d   :  { %7862 = vtanh.f32 %v5467_v6  ;;  %v5790_v47 = vmul.f32 -1.442695, %v5467_v6 }
0x3a0f   :  { %7864 = vpow2.f32 %v5790_v47 }
0x3a10   :  { %7866 = vpow2.f32 %v5791_v49 }
0x3a16   :  { %v7861_v23 = vpop.eup %7860 }
0x3a17   :  { %v7863_v2 = vpop.eup %7862  ;;  %5489 = vrot.lane.b32.xlu1 %v7861_v23, %s7968_s3 }
0x3a18   :  { %5487 = vrot.lane.b32.xlu0 %v7863_v2, %s7968_s3 }
0x3a19   :  { %v7865_v30 = vpop.eup %7864 }
0x3a1a   :  { %v5475_v45 = vadd.f32 1.0, %v7865_v30  ;;  %v7867_v21 = vpop.eup %7866 }
0x3a1b   :  { %v5476_v61 = vadd.f32 1.0, %v7867_v21 }
0x3a1c   :  { %7868 = vrcp.f32 %v5475_v45 }
0x3a1d   :  { %7870 = vrcp.f32 %v5476_v61 }
0x3a26   :  { %v7869_v56 = vpop.eup %7868 }
0x3a27   :  { %v7871_v58 = vpop.eup %7870  ;;  %v5483_v0 = vmul.f32 %v7869_v56, %v9397_v18  ;;  %v5519_v18 = vld [vmem:[%s9529_s5 + $0x110] sm:$0xff] }
0x3a28   :  { %v5484_v19 = vmul.f32 %v7871_v58, %v9401_v13  ;;  %v5520_v13 = vld [vmem:[%s9529_s5 + $0x118] sm:$0xff] }
0x3a29   :  { %v7555_v24 = vpack.c.bf16 %v5520_v13, %v5519_v18 }
0x3a2b   :  { %7556 = vmatprep.subr.bf16.mxu0 %v7555_v24 }
0x3a2c   :  { %7558 = vmatpush3.bf16.msra.mxu0 %v7555_v24 }
0x3a89   :  { %v5490_v16 = vpop.permute.xlu1 %5489 }
0x3a8a   :  { %v5488_v39 = vpop.permute.xlu0 %5487  ;;  %v5494_v57 = vmul.f32 %v7871_v58, %v5490_v16 }
0x3a8b   :  { %v5493_v55 = vmul.f32 %v7869_v56, %v5488_v39 }
0x3a8d   :  { %5497 = vrot.lane.b32.xlu1 %v5493_v55, %s7969_s11 }
0x3a91   :  { %5499 = vrot.lane.b32.xlu1 %v5494_v57, %s7969_s11 }
0x3aff   :  { %v5498_v33 = vpop.permute.xlu1 %5497 }
0x3b00   :  { %v5503_v51 = vadd.f32 %v5498_v33, %v5483_v0 }
0x3b02   :  { %7872 = vtanh.f32 %v5503_v51 }
0x3b03   :  { %v5500_v29 = vpop.permute.xlu1 %5499 }
0x3b04   :  { %v5504_v25 = vadd.f32 %v5500_v29, %v5484_v19 }
0x3b06   :  { %7874 = vtanh.f32 %v5504_v25 }
0x3b0c   :  { %v7873_v28 = vpop.eup %7872 }
0x3b0d   :  { %5509 = vrot.lane.b32.xlu0 %v7873_v28, %s7968_s3 }
0x3b10   :  { %v7875_v32 = vpop.eup %7874 }
0x3b11   :  { %5511 = vrot.lane.b32.xlu1 %v7875_v32, %s7968_s3 }
0x3b7f   :  { %v5510_v34 = vpop.permute.xlu0 %5509 }
0x3b80   :  { %v5515_v62 = vmul.f32 %v7869_v56, %v5510_v34 }
0x3b82   :  { %5602 = vrot.lane.b32.xlu0 %v5515_v62, %s7969_s11 }
0x3b83   :  { %v5512_v38 = vpop.permute.xlu1 %5511 }
0x3b84   :  { %v5516_v60 = vmul.f32 %v7871_v58, %v5512_v38 }
0x3b86   :  { %5604 = vrot.lane.b32.xlu1 %v5516_v60, %s7969_s11 }
0x3bf4   :  { %v5603_v50 = vpop.permute.xlu0 %5602 }
0x3bf5   :  { %6708 = vmatprep.mubr.msk.f32.mxu0 %vm238_vm1, %v5603_v50 }
0x3bf8   :  { %v5605_v53 = vpop.permute.xlu1 %5604 }
0x3bf9   :  { %6709 = vmatmul.mubr.msk.f32.vlgmr.msra.gmra.mrb[72].mxu0 %vm238_vm1, %v5605_v53 }
0x3ccc   :  { %v6710_v5 = vpop.f32.mrb[72].mxu0 }
0x3ccd   :  { %v5691_v11 = vadd.f32 %v6710_v5, %v5796_v1  ;;  %v5676_v12 = vpop.f32.mrb[73].mxu0 }
0x3cce   :  { %v5690_v31 = vadd.f32 %v5796_v1, %v5676_v12 }
0x3ccf   :  { %5693 = vst.msk [vmem:[%s9530_s6 + $0x8] sm:$0xff] %vm511_vm0, %v5691_v11 }
0x3cd0   :  { %5692 = vst.msk [vmem:[%s9530_s6] sm:$0xff] %vm511_vm0, %v5690_v31 }
0x3cd1   :  { %5698 = vsyncpa [#allocation3], 1 }
0x3cd2   :  { %5699 = vsyncpa [#allocation5], 1 }

</bundles_post_ra>
